<compile_context>
chip_gen: v7x
topology: tpu7x:2x2x1
jax: 0.10.0
libtpu: 0.0.40
codegen_flags: <defaults>
</compile_context>

<pallas_src>
import jax
import jax.numpy as jnp
from jax.experimental import pallas as pl
from jax.experimental.pallas import tpu as pltpu


def _arm_kernel(x_ref, w1_ref, s1_ref, b1_ref, w2_ref, s2_ref, b2_ref,
                out_ref, xpad_ref, col_ref):
    # x_ref   : (bn, H, W, Cin)        bf16 input tile (bn batch elements)
    # w1_ref  : (9*Cin, Cout)          bf16 3x3 conv weight, rows ordered (ky,kx,ci)
    # s1/b1   : (1, Cout)              f32 folded BN1 scale / bias
    # w2_ref  : (Cout, Cout)           f32 1x1 conv weight (attention branch)
    # s2/b2   : (1, Cout)              f32 folded BN2 scale / bias
    # out_ref : (bn, H*W, Cout)        output (wrapper reshapes to NHWC)
    # xpad_ref: (bn, H+2, W+2, Cin)    bf16 VMEM scratch for the 'SAME' halo
    # col_ref : (bn*H*W, 9*Cin)        bf16 VMEM scratch for the im2col operand
    bn, Hp, Wp, Cin = xpad_ref.shape
    H, W = Hp - 2, Wp - 2
    Cout = out_ref.shape[-1]
    HW = H * W
    M = bn * HW

    # 1) In-kernel 'SAME' padding: zero only the 1-pixel border strips (perimeter,
    #    not the whole tile), then drop the input tile into the interior.
    zrow = jnp.zeros((bn, 1, Wp, Cin), xpad_ref.dtype)
    zcol = jnp.zeros((bn, Hp, 1, Cin), xpad_ref.dtype)
    xpad_ref[:, 0:1, :, :] = zrow
    xpad_ref[:, H + 1:H + 2, :, :] = zrow
    xpad_ref[:, :, 0:1, :] = zcol
    xpad_ref[:, :, W + 1:W + 2, :] = zcol
    xpad_ref[:, 1:H + 1, 1:W + 1, :] = x_ref[...]            # bf16 -> bf16, no cast

    # 2) im2col via 9 direct stores into the pre-allocated bf16 scratch, then a
    #    single large-K (K = 9*Cin) MXU matmul with f32 accumulation.
    for k in range(9):
        ky, kx = k // 3, k % 3
        col_ref[:, k * Cin:(k + 1) * Cin] = (
            xpad_ref[:, ky:ky + H, kx:kx + W, :].reshape(M, Cin))
    acc = jnp.dot(col_ref[...], w1_ref[...],
                  preferred_element_type=jnp.float32)         # (M, Cout) f32

    # 3) Fused inference BN1 + ReLU, stored straight to the output block
    #    (bounds the live range of the big (bn, H*W, Cout) tile).
    y3 = jnp.maximum(acc * s1_ref[...] + b1_ref[...], 0.0).reshape(bn, HW, Cout)
    out_ref[...] = y3.astype(out_ref.dtype)

    # 4) Attention branch per image: GAP -> 1x1 conv (MXU dot) -> BN2 -> sigmoid.
    pooled = jnp.mean(out_ref[...].astype(jnp.float32), axis=1)      # (bn, Cout)
    att = jnp.dot(pooled, w2_ref[...], preferred_element_type=jnp.float32)
    att = att * s2_ref[...] + b2_ref[...]
    att = 1.0 / (1.0 + jnp.exp(-att))                                 # (bn, Cout)

    # 5) In-place broadcast multiply on the VMEM-resident output block.
    out_ref[...] = (out_ref[...] * att[:, None, :]).astype(out_ref.dtype)


def _default_vmem_limit_bytes():
    """~3/4 of physical VMEM: ~96 MiB on v5e/v6e, ~48 MiB on v7x."""
    try:
        cap = pltpu.get_tpu_info().vmem_capacity_bytes
    except Exception:
        cap = 64 << 20
    return int(min(96 << 20, (cap * 3) // 4))


def _pick_batch_block(N, H, W, Cin, Cout, budget_bytes, min_steps=2):
    """Largest divisor of N (capped so the grid has >= min_steps steps) whose
    per-step working set fits a conservative VMEM budget."""
    ceil_to = lambda v, m: -(-v // m) * m
    lane_ci = ceil_to(Cin, 128)
    lane_co = ceil_to(Cout, 128)
    lane_k = ceil_to(9 * Cin, 128)
    HW = H * W
    per_img = (
        2 * (H + 2) * ceil_to(W + 2, 16) * lane_ci        # bf16 halo scratch
        + 2 * ceil_to(HW, 16) * lane_k                    # bf16 im2col scratch
        + 2 * 2 * H * ceil_to(W, 16) * lane_ci            # double-buffered bf16 input block
        + 2 * 4 * ceil_to(HW, 8) * lane_co                # double-buffered output block (f32 bound)
        + 4 * 4 * ceil_to(HW, 8) * lane_co                # in-flight f32 acc / y3 / bcast temps
    )
    cap = max(1, N // min_steps)
    for cand in range(cap, 0, -1):
        if N % cand == 0 and cand * per_img <= budget_bytes:
            return cand
    return 1


def attention_refinement(x_nhwc, w1, s1, b1, w2, s2, b2,
                         *, out_dtype=jnp.float32, vmem_limit_bytes=None):
    """x_nhwc: (N, H, W, Cin) float.  Returns (N, H, W, Cout) in out_dtype."""
    N, H, W, Cin = x_nhwc.shape
    Cout = w1.shape[-1]

    if vmem_limit_bytes is None:
        vmem_limit_bytes = _default_vmem_limit_bytes()

    # Batch blocking: amortize per-grid-step overhead, keep >=2 steps for v7x's
    # two TensorCores, stay inside the VMEM budget.
    bn = _pick_batch_block(N, H, W, Cin, Cout,
                           budget_bytes=vmem_limit_bytes // 2, min_steps=2)

    # bf16 for the dominant conv operands (MXU-native, half the HBM bytes);
    # BN/ReLU/pool/attention math stays in f32.
    x_in = x_nhwc.astype(jnp.bfloat16)
    w1cat = w1.reshape(9 * Cin, Cout).astype(jnp.bfloat16)    # rows = (ky, kx, ci)
    s1 = jnp.asarray(s1, jnp.float32).reshape(1, Cout)
    b1 = jnp.asarray(b1, jnp.float32).reshape(1, Cout)
    w2 = jnp.asarray(w2, jnp.float32)
    s2 = jnp.asarray(s2, jnp.float32).reshape(1, Cout)
    b2 = jnp.asarray(b2, jnp.float32).reshape(1, Cout)

    out_flat = pl.pallas_call(
        _arm_kernel,
        out_shape=jax.ShapeDtypeStruct((N, H * W, Cout), out_dtype),
        grid_spec=pltpu.PrefetchScalarGridSpec(
            num_scalar_prefetch=0,
            grid=(N // bn,),
            in_specs=[
                pl.BlockSpec((bn, H, W, Cin), lambda n: (n, 0, 0, 0)),
                pl.BlockSpec((9 * Cin, Cout), lambda n: (0, 0)),
                pl.BlockSpec((1, Cout),       lambda n: (0, 0)),
                pl.BlockSpec((1, Cout),       lambda n: (0, 0)),
                pl.BlockSpec((Cout, Cout),    lambda n: (0, 0)),
                pl.BlockSpec((1, Cout),       lambda n: (0, 0)),
                pl.BlockSpec((1, Cout),       lambda n: (0, 0)),
            ],
            out_specs=pl.BlockSpec((bn, H * W, Cout), lambda n: (n, 0, 0)),
            scratch_shapes=[
                pltpu.VMEM((bn, H + 2, W + 2, Cin), jnp.bfloat16),   # halo
                pltpu.VMEM((bn * H * W, 9 * Cin), jnp.bfloat16),     # im2col
            ],
        ),
        compiler_params=pltpu.CompilerParams(
            dimension_semantics=("parallel",),
            vmem_limit_bytes=vmem_limit_bytes,
        ),
    )(x_in, w1cat, s1, b1, w2, s2, b2)

    return out_flat.reshape(N, H, W, Cout)


def _reference(x_nhwc, w1, s1, b1, w2, s2, b2):
    """Pure-JAX reference (same bf16 conv inputs / f32 accumulation as the kernel)."""
    y = jax.lax.conv_general_dilated(
        x_nhwc.astype(jnp.bfloat16), w1.astype(jnp.bfloat16),
        window_strides=(1, 1), padding="SAME",
        dimension_numbers=("NHWC", "HWIO", "NHWC"),
        preferred_element_type=jnp.float32)
    y = jnp.maximum(y * s1 + b1, 0.0)
    pooled = jnp.mean(y, axis=(1, 2), keepdims=True)              # (N,1,1,Cout)
    att = jnp.einsum("nijc,cd->nijd", pooled, w2,
                     precision=jax.lax.Precision.HIGHEST)
    att = jax.nn.sigmoid(att * s2 + b2)
    return y * att


def _fold_bn(gamma, beta, mean, var, eps=1e-5):
    # TODO(synk): training-mode BatchNorm (batch statistics + running-stat updates)
    # is not implemented; BN runs in inference mode with folded scale/bias.
    scale = gamma / jnp.sqrt(var + eps)
    bias = beta - mean * scale
    return scale, bias


if __name__ == "__main__":
    key = jax.random.PRNGKey(0)
    N, Cin, H, W = 2, 4, 16, 16
    Cout = 8

    ks = jax.random.split(key, 11)
    # Input generated in NCHW (PyTorch convention), moved to NHWC once (setup glue).
    x_nchw = jax.random.normal(ks[0], (N, Cin, H, W), jnp.float32)
    x_nhwc = jnp.transpose(x_nchw, (0, 2, 3, 1))

    # conv_first: Conv2d(Cin, Cout, 3, padding=1, bias=False) + BN + ReLU
    w1 = 0.1 * jax.random.normal(ks[1], (3, 3, Cin, Cout), jnp.float32)
    g1 = 1.0 + 0.1 * jax.random.normal(ks[2], (Cout,), jnp.float32)
    be1 = 0.1 * jax.random.normal(ks[3], (Cout,), jnp.float32)
    m1 = 0.05 * jax.random.normal(ks[4], (Cout,), jnp.float32)
    v1 = 1.0 + jnp.abs(0.1 * jax.random.normal(ks[5], (Cout,), jnp.float32))
    s1, b1 = _fold_bn(g1, be1, m1, v1)

    # attention_block: AdaptiveAvgPool2d(1) + Conv2d(Cout, Cout, 1, bias=False) + BN + Sigmoid
    w2 = 0.1 * jax.random.normal(ks[6], (Cout, Cout), jnp.float32)
    g2 = 1.0 + 0.1 * jax.random.normal(ks[7], (Cout,), jnp.float32)
    be2 = 0.1 * jax.random.normal(ks[8], (Cout,), jnp.float32)
    m2 = 0.05 * jax.random.normal(ks[9], (Cout,), jnp.float32)
    v2 = 1.0 + jnp.abs(0.1 * jax.random.normal(ks[10], (Cout,), jnp.float32))
    s2, b2 = _fold_bn(g2, be2, m2, v2)

    out = attention_refinement(x_nhwc, w1, s1, b1, w2, s2, b2)
    out = jax.block_until_ready(out)

    ref = _reference(x_nhwc, w1,
                     s1.reshape(1, 1, 1, Cout), b1.reshape(1, 1, 1, Cout),
                     w2,
                     s2.reshape(1, 1, 1, Cout), b2.reshape(1, 1, 1, Cout))
    ref = jax.block_until_ready(ref)

    assert out.shape == (N, H, W, Cout)
    assert jnp.allclose(out, ref, atol=2e-3, rtol=2e-3), "mismatch vs JAX reference"
    print("KERNEL_OK")
</pallas_src>

<mosaic_0001>
module attributes {stable_mosaic.version = 11 : i64} {
  func.func @_arm_kernel(%arg0: i32, %arg1: memref<1x16x16x4xbf16, #tpu.memory_space<vmem>>, %arg2: memref<36x8xbf16, #tpu.memory_space<vmem>>, %arg3: memref<1x8xf32, #tpu.memory_space<vmem>>, %arg4: memref<1x8xf32, #tpu.memory_space<vmem>>, %arg5: memref<8x8xf32, #tpu.memory_space<vmem>>, %arg6: memref<1x8xf32, #tpu.memory_space<vmem>>, %arg7: memref<1x8xf32, #tpu.memory_space<vmem>>, %arg8: memref<1x256x8xf32, #tpu.memory_space<vmem>>, %arg9: memref<1x18x18x4xbf16, #tpu.memory_space<vmem>>, %arg10: memref<256x36xbf16, #tpu.memory_space<vmem>>) attributes {dimension_semantics = [#tpu.dimension_semantics<parallel>], iteration_bounds = array<i64: 2>, scalar_prefetch = 0 : i64, scratch_operands = 2 : i64, tpu.core_type = #tpu.core_type<tc>, window_params = [{transform_indices = @transform_0, window_bounds = array<i64: 1, 16, 16, 4>}, {pipeline_mode = #tpu.pipeline_mode<synchronous>, transform_indices = @transform_1, window_bounds = array<i64: 36, 8>}, {pipeline_mode = #tpu.pipeline_mode<synchronous>, transform_indices = @transform_2, window_bounds = array<i64: 1, 8>}, {pipeline_mode = #tpu.pipeline_mode<synchronous>, transform_indices = @transform_3, window_bounds = array<i64: 1, 8>}, {pipeline_mode = #tpu.pipeline_mode<synchronous>, transform_indices = @transform_4, window_bounds = array<i64: 8, 8>}, {pipeline_mode = #tpu.pipeline_mode<synchronous>, transform_indices = @transform_5, window_bounds = array<i64: 1, 8>}, {pipeline_mode = #tpu.pipeline_mode<synchronous>, transform_indices = @transform_6, window_bounds = array<i64: 1, 8>}, {transform_indices = @transform_7, window_bounds = array<i64: 1, 256, 8>}]} {
    %cst = arith.constant 0.000000e+00 : bf16
    %0 = vector.broadcast %cst : bf16 to vector<1x1x18x4xbf16>
    %cst_0 = arith.constant 0.000000e+00 : bf16
    %1 = vector.broadcast %cst_0 : bf16 to vector<1x18x1x4xbf16>
    %c0 = arith.constant 0 : index
    %c0_1 = arith.constant 0 : index
    %c0_2 = arith.constant 0 : index
    %c0_3 = arith.constant 0 : index
    %2 = vector.load %arg9[%c0, %c0_1, %c0_2, %c0_3] : memref<1x18x18x4xbf16, #tpu.memory_space<vmem>>, vector<1x1x18x4xbf16>
    tpu.vector_store %arg9[%c0, %c0_1, %c0_2, %c0_3], %0 {strides = array<i32>} : memref<1x18x18x4xbf16, #tpu.memory_space<vmem>>, vector<1x1x18x4xbf16>,
    %c0_4 = arith.constant 0 : index
    %c17 = arith.constant 17 : index
    %c0_5 = arith.constant 0 : index
    %c0_6 = arith.constant 0 : index
    %3 = vector.load %arg9[%c0_4, %c17, %c0_5, %c0_6] : memref<1x18x18x4xbf16, #tpu.memory_space<vmem>>, vector<1x1x18x4xbf16>
    tpu.vector_store %arg9[%c0_4, %c17, %c0_5, %c0_6], %0 {strides = array<i32>} : memref<1x18x18x4xbf16, #tpu.memory_space<vmem>>, vector<1x1x18x4xbf16>,
    %c0_7 = arith.constant 0 : index
    %c0_8 = arith.constant 0 : index
    %c0_9 = arith.constant 0 : index
    %c0_10 = arith.constant 0 : index
    %4 = vector.load %arg9[%c0_7, %c0_8, %c0_9, %c0_10] : memref<1x18x18x4xbf16, #tpu.memory_space<vmem>>, vector<1x18x1x4xbf16>
    tpu.vector_store %arg9[%c0_7, %c0_8, %c0_9, %c0_10], %1 {strides = array<i32>} : memref<1x18x18x4xbf16, #tpu.memory_space<vmem>>, vector<1x18x1x4xbf16>,
    %c0_11 = arith.constant 0 : index
    %c0_12 = arith.constant 0 : index
    %c17_13 = arith.constant 17 : index
    %c0_14 = arith.constant 0 : index
    %5 = vector.load %arg9[%c0_11, %c0_12, %c17_13, %c0_14] : memref<1x18x18x4xbf16, #tpu.memory_space<vmem>>, vector<1x18x1x4xbf16>
    tpu.vector_store %arg9[%c0_11, %c0_12, %c17_13, %c0_14], %1 {strides = array<i32>} : memref<1x18x18x4xbf16, #tpu.memory_space<vmem>>, vector<1x18x1x4xbf16>,
    %c0_15 = arith.constant 0 : index
    %c0_16 = arith.constant 0 : index
    %c0_17 = arith.constant 0 : index
    %c0_18 = arith.constant 0 : index
    %6 = vector.load %arg1[%c0_15, %c0_16, %c0_17, %c0_18] : memref<1x16x16x4xbf16, #tpu.memory_space<vmem>>, vector<1x16x16x4xbf16>
    %c0_19 = arith.constant 0 : index
    %c1 = arith.constant 1 : index
    %c1_20 = arith.constant 1 : index
    %c0_21 = arith.constant 0 : index
    %7 = vector.load %arg9[%c0_19, %c1, %c1_20, %c0_21] : memref<1x18x18x4xbf16, #tpu.memory_space<vmem>>, vector<1x16x16x4xbf16>
    tpu.vector_store %arg9[%c0_19, %c1, %c1_20, %c0_21], %6 {strides = array<i32>} : memref<1x18x18x4xbf16, #tpu.memory_space<vmem>>, vector<1x16x16x4xbf16>,
    %c0_22 = arith.constant 0 : index
    %c0_23 = arith.constant 0 : index
    %c0_24 = arith.constant 0 : index
    %c0_25 = arith.constant 0 : index
    %8 = vector.load %arg9[%c0_22, %c0_23, %c0_24, %c0_25] : memref<1x18x18x4xbf16, #tpu.memory_space<vmem>>, vector<1x16x16x4xbf16>
    %9 = vector.shape_cast %8 : vector<1x16x16x4xbf16> to vector<256x4xbf16>
    %c0_26 = arith.constant 0 : index
    %c0_27 = arith.constant 0 : index
    %10 = vector.load %arg10[%c0_26, %c0_27] : memref<256x36xbf16, #tpu.memory_space<vmem>>, vector<256x4xbf16>
    tpu.vector_store %arg10[%c0_26, %c0_27], %9 {strides = array<i32>} : memref<256x36xbf16, #tpu.memory_space<vmem>>, vector<256x4xbf16>,
    %c0_28 = arith.constant 0 : index
    %c0_29 = arith.constant 0 : index
    %c1_30 = arith.constant 1 : index
    %c0_31 = arith.constant 0 : index
    %11 = vector.load %arg9[%c0_28, %c0_29, %c1_30, %c0_31] : memref<1x18x18x4xbf16, #tpu.memory_space<vmem>>, vector<1x16x16x4xbf16>
    %12 = vector.shape_cast %11 : vector<1x16x16x4xbf16> to vector<256x4xbf16>
    %c0_32 = arith.constant 0 : index
    %c4 = arith.constant 4 : index
    %13 = vector.load %arg10[%c0_32, %c4] : memref<256x36xbf16, #tpu.memory_space<vmem>>, vector<256x4xbf16>
    tpu.vector_store %arg10[%c0_32, %c4], %12 {strides = array<i32>} : memref<256x36xbf16, #tpu.memory_space<vmem>>, vector<256x4xbf16>,
    %c0_33 = arith.constant 0 : index
    %c0_34 = arith.constant 0 : index
    %c2 = arith.constant 2 : index
    %c0_35 = arith.constant 0 : index
    %14 = vector.load %arg9[%c0_33, %c0_34, %c2, %c0_35] : memref<1x18x18x4xbf16, #tpu.memory_space<vmem>>, vector<1x16x16x4xbf16>
    %15 = vector.shape_cast %14 : vector<1x16x16x4xbf16> to vector<256x4xbf16>
    %c0_36 = arith.constant 0 : index
    %c8 = arith.constant 8 : index
    %16 = vector.load %arg10[%c0_36, %c8] : memref<256x36xbf16, #tpu.memory_space<vmem>>, vector<256x4xbf16>
    tpu.vector_store %arg10[%c0_36, %c8], %15 {strides = array<i32>} : memref<256x36xbf16, #tpu.memory_space<vmem>>, vector<256x4xbf16>,
    %c0_37 = arith.constant 0 : index
    %c1_38 = arith.constant 1 : index
    %c0_39 = arith.constant 0 : index
    %c0_40 = arith.constant 0 : index
    %17 = vector.load %arg9[%c0_37, %c1_38, %c0_39, %c0_40] : memref<1x18x18x4xbf16, #tpu.memory_space<vmem>>, vector<1x16x16x4xbf16>
    %18 = vector.shape_cast %17 : vector<1x16x16x4xbf16> to vector<256x4xbf16>
    %c0_41 = arith.constant 0 : index
    %c12 = arith.constant 12 : index
    %19 = vector.load %arg10[%c0_41, %c12] : memref<256x36xbf16, #tpu.memory_space<vmem>>, vector<256x4xbf16>
    tpu.vector_store %arg10[%c0_41, %c12], %18 {strides = array<i32>} : memref<256x36xbf16, #tpu.memory_space<vmem>>, vector<256x4xbf16>,
    %c0_42 = arith.constant 0 : index
    %c1_43 = arith.constant 1 : index
    %c1_44 = arith.constant 1 : index
    %c0_45 = arith.constant 0 : index
    %20 = vector.load %arg9[%c0_42, %c1_43, %c1_44, %c0_45] : memref<1x18x18x4xbf16, #tpu.memory_space<vmem>>, vector<1x16x16x4xbf16>
    %21 = vector.shape_cast %20 : vector<1x16x16x4xbf16> to vector<256x4xbf16>
    %c0_46 = arith.constant 0 : index
    %c16 = arith.constant 16 : index
    %22 = vector.load %arg10[%c0_46, %c16] : memref<256x36xbf16, #tpu.memory_space<vmem>>, vector<256x4xbf16>
    tpu.vector_store %arg10[%c0_46, %c16], %21 {strides = array<i32>} : memref<256x36xbf16, #tpu.memory_space<vmem>>, vector<256x4xbf16>,
    %c0_47 = arith.constant 0 : index
    %c1_48 = arith.constant 1 : index
    %c2_49 = arith.constant 2 : index
    %c0_50 = arith.constant 0 : index
    %23 = vector.load %arg9[%c0_47, %c1_48, %c2_49, %c0_50] : memref<1x18x18x4xbf16, #tpu.memory_space<vmem>>, vector<1x16x16x4xbf16>
    %24 = vector.shape_cast %23 : vector<1x16x16x4xbf16> to vector<256x4xbf16>
    %c0_51 = arith.constant 0 : index
    %c20 = arith.constant 20 : index
    %25 = vector.load %arg10[%c0_51, %c20] : memref<256x36xbf16, #tpu.memory_space<vmem>>, vector<256x4xbf16>
    tpu.vector_store %arg10[%c0_51, %c20], %24 {strides = array<i32>} : memref<256x36xbf16, #tpu.memory_space<vmem>>, vector<256x4xbf16>,
    %c0_52 = arith.constant 0 : index
    %c2_53 = arith.constant 2 : index
    %c0_54 = arith.constant 0 : index
    %c0_55 = arith.constant 0 : index
    %26 = vector.load %arg9[%c0_52, %c2_53, %c0_54, %c0_55] : memref<1x18x18x4xbf16, #tpu.memory_space<vmem>>, vector<1x16x16x4xbf16>
    %27 = vector.shape_cast %26 : vector<1x16x16x4xbf16> to vector<256x4xbf16>
    %c0_56 = arith.constant 0 : index
    %c24 = arith.constant 24 : index
    %28 = vector.load %arg10[%c0_56, %c24] : memref<256x36xbf16, #tpu.memory_space<vmem>>, vector<256x4xbf16>
    tpu.vector_store %arg10[%c0_56, %c24], %27 {strides = array<i32>} : memref<256x36xbf16, #tpu.memory_space<vmem>>, vector<256x4xbf16>,
    %c0_57 = arith.constant 0 : index
    %c2_58 = arith.constant 2 : index
    %c1_59 = arith.constant 1 : index
    %c0_60 = arith.constant 0 : index
    %29 = vector.load %arg9[%c0_57, %c2_58, %c1_59, %c0_60] : memref<1x18x18x4xbf16, #tpu.memory_space<vmem>>, vector<1x16x16x4xbf16>
    %30 = vector.shape_cast %29 : vector<1x16x16x4xbf16> to vector<256x4xbf16>
    %c0_61 = arith.constant 0 : index
    %c28 = arith.constant 28 : index
    %31 = vector.load %arg10[%c0_61, %c28] : memref<256x36xbf16, #tpu.memory_space<vmem>>, vector<256x4xbf16>
    tpu.vector_store %arg10[%c0_61, %c28], %30 {strides = array<i32>} : memref<256x36xbf16, #tpu.memory_space<vmem>>, vector<256x4xbf16>,
    %c0_62 = arith.constant 0 : index
    %c2_63 = arith.constant 2 : index
    %c2_64 = arith.constant 2 : index
    %c0_65 = arith.constant 0 : index
    %32 = vector.load %arg9[%c0_62, %c2_63, %c2_64, %c0_65] : memref<1x18x18x4xbf16, #tpu.memory_space<vmem>>, vector<1x16x16x4xbf16>
    %33 = vector.shape_cast %32 : vector<1x16x16x4xbf16> to vector<256x4xbf16>
    %c0_66 = arith.constant 0 : index
    %c32 = arith.constant 32 : index
    %34 = vector.load %arg10[%c0_66, %c32] : memref<256x36xbf16, #tpu.memory_space<vmem>>, vector<256x4xbf16>
    tpu.vector_store %arg10[%c0_66, %c32], %33 {strides = array<i32>} : memref<256x36xbf16, #tpu.memory_space<vmem>>, vector<256x4xbf16>,
    %c0_67 = arith.constant 0 : index
    %c0_68 = arith.constant 0 : index
    %35 = vector.load %arg10[%c0_67, %c0_68] : memref<256x36xbf16, #tpu.memory_space<vmem>>, vector<256x36xbf16>
    %c0_69 = arith.constant 0 : index
    %c0_70 = arith.constant 0 : index
    %36 = vector.load %arg2[%c0_69, %c0_70] : memref<36x8xbf16, #tpu.memory_space<vmem>>, vector<36x8xbf16>
    %cst_71 = arith.constant dense<0.000000e+00> : vector<256x8xf32>
    %37 = tpu.matmul %35, %36, %cst_71 {dimension_numbers = #tpu.dot_dimension_numbers<[1], [0], [0], [1], [0, 0, 1, 1], [], []>} : vector<256x36xbf16>, vector<36x8xbf16>, vector<256x8xf32> -> vector<256x8xf32>
    %c0_72 = arith.constant 0 : index
    %c0_73 = arith.constant 0 : index
    %38 = vector.load %arg3[%c0_72, %c0_73] : memref<1x8xf32, #tpu.memory_space<vmem>>, vector<1x8xf32>
    %39 = vector.broadcast %38 : vector<1x8xf32> to vector<256x8xf32>
    %40 = arith.mulf %37, %39 : vector<256x8xf32>
    %c0_74 = arith.constant 0 : index
    %c0_75 = arith.constant 0 : index
    %41 = vector.load %arg4[%c0_74, %c0_75] : memref<1x8xf32, #tpu.memory_space<vmem>>, vector<1x8xf32>
    %42 = vector.broadcast %41 : vector<1x8xf32> to vector<256x8xf32>
    %43 = arith.addf %40, %42 : vector<256x8xf32>
    %cst_76 = arith.constant 0.000000e+00 : f32
    %44 = vector.broadcast %cst_76 : f32 to vector<256x8xf32>
    %45 = arith.maximumf %43, %44 : vector<256x8xf32>
    %46 = vector.shape_cast %45 : vector<256x8xf32> to vector<1x256x8xf32>
    %c0_77 = arith.constant 0 : index
    %c0_78 = arith.constant 0 : index
    %c0_79 = arith.constant 0 : index
    %47 = vector.load %arg8[%c0_77, %c0_78, %c0_79] : memref<1x256x8xf32, #tpu.memory_space<vmem>>, vector<1x256x8xf32>
    tpu.vector_store %arg8[%c0_77, %c0_78, %c0_79], %46 {strides = array<i32>} : memref<1x256x8xf32, #tpu.memory_space<vmem>>, vector<1x256x8xf32>,
    %c0_80 = arith.constant 0 : index
    %c0_81 = arith.constant 0 : index
    %c0_82 = arith.constant 0 : index
    %48 = vector.load %arg8[%c0_80, %c0_81, %c0_82] : memref<1x256x8xf32, #tpu.memory_space<vmem>>, vector<1x256x8xf32>
    %cst_83 = arith.constant dense<0.000000e+00> : vector<1x8xf32>
    %49 = vector.multi_reduction <add>, %48, %cst_83 [1] : vector<1x256x8xf32> to vector<1x8xf32>
    %cst_84 = arith.constant 2.560000e+02 : f32
    %50 = vector.broadcast %cst_84 : f32 to vector<1x8xf32>
    %51 = arith.divf %49, %50 : vector<1x8xf32>
    %c0_85 = arith.constant 0 : index
    %c0_86 = arith.constant 0 : index
    %52 = vector.load %arg5[%c0_85, %c0_86] : memref<8x8xf32, #tpu.memory_space<vmem>>, vector<8x8xf32>
    %cst_87 = arith.constant dense<0.000000e+00> : vector<1x8xf32>
    %53 = tpu.matmul %51, %52, %cst_87 {dimension_numbers = #tpu.dot_dimension_numbers<[1], [0], [0], [1], [0, 0, 1, 1], [], []>} : vector<1x8xf32>, vector<8x8xf32>, vector<1x8xf32> -> vector<1x8xf32>
    %c0_88 = arith.constant 0 : index
    %c0_89 = arith.constant 0 : index
    %54 = vector.load %arg6[%c0_88, %c0_89] : memref<1x8xf32, #tpu.memory_space<vmem>>, vector<1x8xf32>
    %55 = arith.mulf %53, %54 : vector<1x8xf32>
    %c0_90 = arith.constant 0 : index
    %c0_91 = arith.constant 0 : index
    %56 = vector.load %arg7[%c0_90, %c0_91] : memref<1x8xf32, #tpu.memory_space<vmem>>, vector<1x8xf32>
    %57 = arith.addf %55, %56 : vector<1x8xf32>
    %cst_92 = arith.constant 0.000000e+00 : f32
    %58 = vector.broadcast %cst_92 : f32 to vector<1x8xf32>
    %59 = arith.subf %58, %57 : vector<1x8xf32>
    %60 = math.exp %59 : vector<1x8xf32>
    %cst_93 = arith.constant 1.000000e+00 : f32
    %61 = vector.broadcast %cst_93 : f32 to vector<1x8xf32>
    %62 = arith.addf %61, %60 : vector<1x8xf32>
    %cst_94 = arith.constant 1.000000e+00 : f32
    %63 = vector.broadcast %cst_94 : f32 to vector<1x8xf32>
    %64 = arith.divf %63, %62 : vector<1x8xf32>
    %c0_95 = arith.constant 0 : index
    %c0_96 = arith.constant 0 : index
    %c0_97 = arith.constant 0 : index
    %65 = vector.load %arg8[%c0_95, %c0_96, %c0_97] : memref<1x256x8xf32, #tpu.memory_space<vmem>>, vector<1x256x8xf32>
    %66 = vector.shape_cast %64 : vector<1x8xf32> to vector<1x1x8xf32>
    %67 = vector.broadcast %66 : vector<1x1x8xf32> to vector<1x256x8xf32>
    %68 = arith.mulf %65, %67 : vector<1x256x8xf32>
    %c0_98 = arith.constant 0 : index
    %c0_99 = arith.constant 0 : index
    %c0_100 = arith.constant 0 : index
    %69 = vector.load %arg8[%c0_98, %c0_99, %c0_100] : memref<1x256x8xf32, #tpu.memory_space<vmem>>, vector<1x256x8xf32>
    tpu.vector_store %arg8[%c0_98, %c0_99, %c0_100], %68 {strides = array<i32>} : memref<1x256x8xf32, #tpu.memory_space<vmem>>, vector<1x256x8xf32>,
    return
  }
  func.func @transform_0(%arg0: i32) -> (i32, i32, i32, i32) {
    %c0_i32 = arith.constant 0 : i32
    %c0_i32_0 = arith.constant 0 : i32
    %c0_i32_1 = arith.constant 0 : i32
    %c0_i32_2 = arith.constant 0 : i32
    return %arg0, %c0_i32, %c0_i32_0, %c0_i32_1 : i32, i32, i32, i32
  }
  func.func @transform_1(%arg0: i32) -> (i32, i32) {
    %c0_i32 = arith.constant 0 : i32
    %c0_i32_0 = arith.constant 0 : i32
    %c0_i32_1 = arith.constant 0 : i32
    return %c0_i32, %c0_i32_0 : i32, i32
  }
  func.func @transform_2(%arg0: i32) -> (i32, i32) {
    %c0_i32 = arith.constant 0 : i32
    %c0_i32_0 = arith.constant 0 : i32
    %c0_i32_1 = arith.constant 0 : i32
    return %c0_i32, %c0_i32_0 : i32, i32
  }
  func.func @transform_3(%arg0: i32) -> (i32, i32) {
    %c0_i32 = arith.constant 0 : i32
    %c0_i32_0 = arith.constant 0 : i32
    %c0_i32_1 = arith.constant 0 : i32
    return %c0_i32, %c0_i32_0 : i32, i32
  }
  func.func @transform_4(%arg0: i32) -> (i32, i32) {
    %c0_i32 = arith.constant 0 : i32
    %c0_i32_0 = arith.constant 0 : i32
    %c0_i32_1 = arith.constant 0 : i32
    return %c0_i32, %c0_i32_0 : i32, i32
  }
  func.func @transform_5(%arg0: i32) -> (i32, i32) {
    %c0_i32 = arith.constant 0 : i32
    %c0_i32_0 = arith.constant 0 : i32
    %c0_i32_1 = arith.constant 0 : i32
    return %c0_i32, %c0_i32_0 : i32, i32
  }
  func.func @transform_6(%arg0: i32) -> (i32, i32) {
    %c0_i32 = arith.constant 0 : i32
    %c0_i32_0 = arith.constant 0 : i32
    %c0_i32_1 = arith.constant 0 : i32
    return %c0_i32, %c0_i32_0 : i32, i32
  }
  func.func @transform_7(%arg0: i32) -> (i32, i32, i32) {
    %c0_i32 = arith.constant 0 : i32
    %c0_i32_0 = arith.constant 0 : i32
    %c0_i32_1 = arith.constant 0 : i32
    return %arg0, %c0_i32, %c0_i32_0 : i32, i32, i32
  }
}

</mosaic_0001>

<bundles_post_ra>
// kernel: tpu_custom_call.1
= control target key start
LH: loop header
LB: loop body
LE: loop exit
PB: predicated region body
PF: predicated region fallthrough
CT: control target
= control target key end

     0   :  { %s5110_s24 = smov 0   ;;  %s6739_s0 = inlined_call_operand.vmem [shape: bf16[2,16,16,4], index: 0, kind: input, shape index: {}]   ;;  %s6740_s1 = inlined_call_operand.vmem [shape: bf16[36,8], index: 1, kind: input, shape index: {}]   ;;  %s6741_s2 = inlined_call_operand.vmem [shape: f32[1,8], index: 2, kind: input, shape index: {}]   ;;  %s6742_s3 = inlined_call_operand.vmem [shape: f32[1,8], index: 3, kind: input, shape index: {}]   ;;  %s6743_s4 = inlined_call_operand.vmem [shape: f32[8,8], index: 4, kind: input, shape index: {}]   ;;  %s6744_s5 = inlined_call_operand.vmem [shape: f32[1,8], index: 5, kind: input, shape index: {}]   ;;  %s6745_s6 = inlined_call_operand.vmem [shape: f32[1,8], index: 6, kind: input, shape index: {}]   ;;  %s6746_s7 = inlined_call_operand.vmem [shape: f32[2,256,8], index: 7, kind: output, shape index: {}]  }
   0x1 LB: > { %s4678_s25 = sadd.s32 4294967295, %s5057_s24   ;;  %p4682_p0 = scmp.ge.s32.totalorder %s5057_s24, 1  ;;  %s5057_s24 = sphi %s5110_s24, %s17_s24  }
   0x2   : > { %p237_p1 = scmp.lt.s32.totalorder %s5057_s24, 3 }
   0x4   : > { %p238_p2 = pnand %p4682_p0, %p237_p1 }
   0x5   : > { %p269_p3 = scmp.lt.s32.totalorder (!%p238_p2), %s4678_s25, 1  ;;  %vm280_vm0 = vcmask (!%p238_p2), 27648   ;;  %vm283_vm1 = vcmask (!%p238_p2), 24576   ;;  %vm290_vm2 = vsmask.f32 (!%p238_p2), 256  ;;  %v5059_v3 = vmov (!%p238_p2), 0  }
   0x6   : > { %241 = sbr.rel (%p238_p2) target bundleno = 1042 (0x412), region = 48  ;;  %vm5120_vm3 = vmand (!%p238_p2), %vm283_vm1, %vm290_vm2  ;;  %v295_v1 = vld [vmem:[#allocation2 + $0xc] sm:$0x1] (!%p238_p2)  ;;  %281 = vst.msk [vmem:[#allocation2] sm:$0xf] (!%p238_p2), %vm280_vm0, %v5059_v3  ;;  %vm1660_vm8 = vcmask (!%p238_p2), 1042432  }
   0x7   : > { %v296_v2 = vsel (!%p238_p2), %vm5120_vm3, 0, %v295_v1  ;;  %282 = vst.msk [vmem:[#allocation2 + $0x4] sm:$0xf] (!%p238_p2), %vm280_vm0, %v5059_v3  ;;  %286 = vst.msk [vmem:[#allocation2 + $0xcc] sm:$0xf] (!%p238_p2), %vm280_vm0, %v5059_v3  ;;  %vm1661_vm10 = vcmask (!%p238_p2), 1046532  }
   0x8   : > { %297 = vst [vmem:[#allocation2 + $0xc] sm:$0x1] (!%p238_p2), %v296_v2  ;;  %284 = vst.msk [vmem:[#allocation2 + $0x8] sm:$0x1] (!%p238_p2), %vm283_vm1, %v5059_v3  ;;  %v298_v4 = vld [vmem:[#allocation2 + $0x18] sm:$0x1] (!%p238_p2) }
   0x9   : > { %287 = vst.msk [vmem:[#allocation2 + $0xd0] sm:$0xf] (!%p238_p2), %vm280_vm0, %v5059_v3  ;;  %vm346_vm4 = vsmask.f32 (!%p238_p2), 7938  ;;  %v299_v5 = vsel (!%p238_p2), %vm5120_vm3, 0, %v298_v4  ;;  %vm5199_vm13 = vmor (!%p238_p2), %vm1660_vm8, %vm1661_vm10  ;;  %s5060_s30 = smov (!%p238_p2), 12  }
   0xa   : > { %288 = vst.msk [vmem:[#allocation2 + $0xd4] sm:$0x1] (!%p238_p2), %vm283_vm1, %v5059_v3  ;;  %vm434_vm5 = vsmask.f32 (!%p238_p2), 4368  ;;  %300 = vst [vmem:[#allocation2 + $0x18] sm:$0x1] (!%p238_p2), %v299_v5 }
   0xb   : > { %v301_v6 = vld [vmem:[#allocation2 + $0x24] sm:$0x1] (!%p238_p2)  ;;  %v351_v7 = vld [vmem:[#allocation2 + $0x14] sm:$0x1] (!%p238_p2)  ;;  %vm5147_vm6 = vmand (!%p238_p2), %vm283_vm1, %vm346_vm4  ;;  %vm1064_vm11 = vsmask.f32 (!%p238_p2), 3328 }
   0xc   : > { %vm5153_vm7 = vmor (!%p238_p2), %vm290_vm2, %vm434_vm5  ;;  %v302_v24 = vsel (!%p238_p2), %vm5120_vm3, 0, %v301_v6  ;;  %v352_v25 = vsel (!%p238_p2), %vm5147_vm6, 0, %v351_v7  ;;  %vm1065_vm12 = vsmask.f32 (!%p238_p2), 7440  ;;  %v354_v53 = vld [vmem:[#allocation2 + $0x20] sm:$0x1] (!%p238_p2) }
   0xd   : > { %s6782_s25 = smov (!%p269_p3, %s4678_s25), 1  ;;  %vm5161_vm9 = vmand %vm280_vm0, %vm346_vm4  ;;  %v5169_v28 = vld [vmem:[#allocation2] sm:$0xe]  ;;  %303 = vst [vmem:[#allocation2 + $0x24] sm:$0x1] %v302_v24  ;;  %v355_v5 = vsel %vm5147_vm6, 0, %v354_v53 }
   0xe   : > { %s4903_s26 = sshll.u32 %s6782_s25, 7  ;;  %353 = vst [vmem:[#allocation2 + $0x14] sm:$0x1] %v352_v25  ;;  %v5172_v32 = vld [vmem:[#allocation2 + $0x4] sm:$0xf]  ;;  %v4719_v46 = vrot.slane %v5169_v28, 9  ;;  %vm5234_vm14 = vmor %vm1064_vm11, %vm1065_vm12 }
   0xf   : > { %s5140_s29 = scalar_lea.vmem %s6739_s0, %s4903_s26  ;;  %v759_v26 = vld [vmem:[#allocation2 + $0xc] sm:$0xf]  ;;  %v348_v27 = vld [vmem:[#allocation2 + $0x8] sm:$0x1]  ;;  %v292_v34 = vld [vmem:[#allocation2] sm:$0x1] }
  0x10   : > { %v402_v8 = vld [vmem:[%s5140_s29] sm:$0xf]  ;;  %v403_v9 = vld [vmem:[%s5140_s29 + $0x4] sm:$0xf]  ;;  %v404_v10 = vld [vmem:[%s5140_s29 + $0x8] sm:$0xf] }
  0x11   : > { %v437_v12 = vshrl.u32 %v402_v8, 16  ;;  %v440_v13 = vshll.u32 %v402_v8, 16  ;;  %v445_v14 = vshrl.u32 %v403_v9, 16  ;;  %v448_v15 = vshll.u32 %v403_v9, 16  ;;  %v405_v16 = vld [vmem:[%s5140_s29 + $0xc] sm:$0xf] }
  0x12   : > { %v454_v18 = vshrl.u32 %v404_v10, 16  ;;  %v457_v19 = vshll.u32 %v404_v10, 16  ;;  %v462_v20 = vshrl.u32 %v405_v16, 16  ;;  %v465_v33 = vshll.u32 %v405_v16, 16  ;;  %v406_v35 = vld [vmem:[%s5140_s29 + $0x10] sm:$0xf] }
  0x13   : > { %v439_v21 = vrot.slane %v437_v12, 7  ;;  %v5157_v22 = vrot.slane %v445_v14, 7  ;;  %v349_v37 = vsel %vm5147_vm6, 0, %v348_v27  ;;  %v766_v39 = vld [vmem:[#allocation2 + $0x18] sm:$0xf]  ;;  %v293_v43 = vsel %vm5120_vm3, 0, %v292_v34 }
  0x14   : > { %v456_v38 = vrot.slane %v454_v18, 7  ;;  %350 = vst [vmem:[#allocation2 + $0x8] sm:$0x1] %v349_v37  ;;  %v5182_v42 = vrot.slane %v462_v20, 7  ;;  %v1017_v44 = vld [vmem:[#allocation2 + $0x4] sm:$0xf] }
  0x15   : > { %v442_v29 = vor.u32 %v440_v13, %v439_v21  ;;  %v443_v30 = vrot.slane %v439_v21, 4  ;;  %v450_v31 = vor.u32 %v448_v15, %v5157_v22  ;;  %v452_v36 = vrot.slane %v5157_v22, 4  ;;  %v407_v45 = vld [vmem:[%s5140_s29 + $0x14] sm:$0xf]  ;;  %294 = vst [vmem:[#allocation2] sm:$0x1] %v293_v43 }
  0x16   : > { %v1665_v47 = vrot.slane %v5172_v32, 5  ;;  %v459_v48 = vor.u32 %v457_v19, %v456_v38  ;;  %v460_v49 = vrot.slane %v456_v38, 4  ;;  %v467_v50 = vor.u32 %v465_v33, %v5182_v42  ;;  %v357_v54 = vld [vmem:[#allocation2 + $0x2c] sm:$0x1]  ;;  %v304_v59 = vld [vmem:[#allocation2 + $0x30] sm:$0x1] }
  0x17   : > { %v451_v40 = vsel %vm5153_vm7, %v443_v30, %v450_v31  ;;  %v760_v41 = vsel %vm5161_vm9, %v442_v29, %v759_v26  ;;  %v1077_v51 = vshll.u32 %v1017_v44, 16  ;;  %v1081_v52 = vshrl.u32 %v1017_v44, 16  ;;  %v763_v4 = vld [vmem:[#allocation2 + $0x14] sm:$0x1]  ;;  %v773_v9 = vld [vmem:[#allocation2 + $0x24] sm:$0xf] }
  0x18   : > { %761 = vst [vmem:[#allocation2 + $0xc] sm:$0xf] %v760_v41  ;;  %762 = vst.msk [vmem:[#allocation2 + $0x10] sm:$0xf] %vm280_vm0, %v451_v40  ;;  %v767_v55 = vsel %vm5161_vm9, %v459_v48, %v766_v39  ;;  %v471_v56 = vshrl.u32 %v406_v35, 16  ;;  %v474_v57 = vshll.u32 %v406_v35, 16  ;;  %v468_v60 = vsel %vm5153_vm7, %v460_v49, %v467_v50 }
  0x19   : > { %v479_v58 = vshrl.u32 %v407_v45, 16  ;;  %768 = vst [vmem:[#allocation2 + $0x18] sm:$0xf] %v767_v55  ;;  %v5195_v61 = vrot.slane %v1077_v51, 5  ;;  %v1083_v62 = vrot.slane %v1081_v52, 4  ;;  %v482_v63 = vshll.u32 %v407_v45, 16 }
  0x1a   : > { %769 = vst.msk [vmem:[#allocation2 + $0x1c] sm:$0xf] %vm280_vm0, %v468_v60  ;;  %v473_v2 = vrot.slane %v471_v56, 7  ;;  %v358_v6 = vsel %vm5147_vm6, 0, %v357_v54  ;;  %v1667_v7 = vrot.slane %v1665_v47, 4  ;;  %v764_v10 = vsel %vm5120_vm3, %v452_v36, %v763_v4  ;;  %s5061_s8 = smov 8  }
  0x1b   : > { %v5204_v3 = vrot.slane %v479_v58, 7  ;;  %v1084_v8 = vor.u32 %v1083_v62, %v5195_v61  ;;  %356 = vst [vmem:[#allocation2 + $0x20] sm:$0x1] %v355_v5  ;;  %359 = vst [vmem:[#allocation2 + $0x2c] sm:$0x1] %v358_v6  ;;  %v305_v12 = vsel %vm5120_vm3, 0, %v304_v59  ;;  %v1666_v21 = vsel %vm5199_vm13, %v4719_v46, %v1665_v47 }
  0x1c   : > { %v1566_v13 = vld [vmem:[#allocation2 + $0x8] sm:$0x1]  ;;  %v469_v14 = vrot.slane %v5182_v42, 4  ;;  %v476_v16 = vor.u32 %v474_v57, %v473_v2  ;;  %v477_v18 = vrot.slane %v473_v2, 4  ;;  %765 = vst [vmem:[#allocation2 + $0x14] sm:$0x1] %v764_v10 }
  0x1d   : > { %v1018_v15 = vld [vmem:[#allocation2 + $0x8] sm:$0x1]  ;;  %v484_v19 = vor.u32 %v482_v63, %v5204_v3  ;;  %306 = vst [vmem:[#allocation2 + $0x30] sm:$0x1] %v305_v12  ;;  %v1668_v22 = vrot.slane %v1566_v13, 5  ;;  %v486_v27 = vrot.slane %v5204_v3, 4 }
  0x1e   : > { %v1016_v24 = vld [vmem:[#allocation2] sm:$0xf]  ;;  %v1087_v25 = vshll.u32 %v1018_v15, 16  ;;  %v774_v28 = vsel %vm5161_vm9, %v476_v16, %v773_v9  ;;  %v1085_v33 = vrot.slane %v1084_v8, 4  ;;  %v5229_v38 = vld [vmem:[%s5140_s29 + $0x18] sm:$0xf] }
  0x1f   : > { %v4996_v20 = vld [vmem:[#allocation2 + $0xc] sm:$0xff]   ;;  %v485_v26 = vsel %vm5153_vm7, %v477_v18, %v484_v19  ;;  %v1669_v30 = vsel %vm5199_vm13, %v1667_v7, %v1668_v22  ;;  %v1068_v31 = vshrl.u32 %v1016_v24, 16  ;;  %v1071_v32 = vshll.u32 %v1016_v24, 16  ;;  %775 = vst [vmem:[#allocation2 + $0x24] sm:$0xf] %v774_v28  ;;  %s5062_s9 = smov 24  }
  0x20   : > { %v2610_v29 = vld [vmem:[#allocation2 + $0xc] sm:$0xe]  ;;  %2000 = vrot.lane.b32.xlu0 %v4996_v20, %s5060_s30  ;;  %776 = vst.msk [vmem:[#allocation2 + $0x28] sm:$0xf] %vm280_vm0, %v485_v26  ;;  %v2611_v34 = vld [vmem:[#allocation2 + $0x10] sm:$0xf]  ;;  %v4735_v35 = vcombine.low %v1666_v21, %v1669_v30 }
  0x21   : > { %v4783_v36 = vrot.slane %v2610_v29, 9  ;;  %v2708_v37 = vrot.slane %v2611_v34, 5  ;;  %v4997_v39 = vld [vmem:[#allocation2 + $0x18] sm:$0xff]   ;;  %v1070_v40 = vrot.slane %v1068_v31, 4  ;;  %v1073_v43 = vrot.slane %v1071_v32, 5  ;;  %s5063_s10 = smov 4  }
  0x22   : > { %1823 = vrot.lane.b32.xlu1 %v4735_v35, %s5061_s8  ;;  %v4998_v41 = vld [vmem:[#allocation2 + $0x18] sm:$0xff]   ;;  %v1089_v44 = vrot.slane %v1087_v25, 5  ;;  %v1567_v46 = vld [vmem:[#allocation2 + $0xc] sm:$0xe]  ;;  %v1568_v48 = vld [vmem:[#allocation2 + $0x10] sm:$0xf] }
  0x23   : > { %v2710_v45 = vrot.slane %v2708_v37, 4  ;;  %v2612_v47 = vld [vmem:[#allocation2 + $0x14] sm:$0x1]  ;;  %v1074_v50 = vor.u32 %v1073_v43, %v1070_v40  ;;  %v4720_v52 = vrot.slane %v1567_v46, 9  ;;  %v1672_v53 = vrot.slane %v1568_v48, 5  ;;  %s5064_s11 = smov 20  }
  0x24   : > { %3044 = vrot.lane.b32.xlu0 %v4997_v39, %s5062_s9  ;;  %v1569_v49 = vld [vmem:[#allocation2 + $0x14] sm:$0x1]  ;;  %v2711_v51 = vrot.slane %v2612_v47, 5  ;;  %v770_v54 = vld [vmem:[#allocation2 + $0x20] sm:$0x1]  ;;  %v2709_v55 = vsel %vm5199_vm13, %v4783_v36, %v2708_v37  ;;  %v488_v60 = vshrl.u32 %v5229_v38, 16  ;;  %v1090_v63 = vsel %vm5234_vm14, %v1085_v33, %v1089_v44 }
  0x25   : > { %v1675_v56 = vrot.slane %v1569_v49, 5  ;;  %v771_v57 = vsel %vm5120_vm3, %v469_v14, %v770_v54  ;;  %v3654_v58 = vld [vmem:[#allocation2 + $0x18] sm:$0xe]  ;;  %v3655_v59 = vld [vmem:[#allocation2 + $0x1c] sm:$0xf]  ;;  %v1075_v62 = vrot.slane %v1074_v50, 4  ;;  %v1673_v5 = vsel %vm5199_vm13, %v4720_v52, %v1672_v53 }
  0x26   : > { %2002 = vrot.lane.b32.xlu1 %v4998_v41, %s5060_s30  ;;  %v2712_v4 = vsel %vm5199_vm13, %v2710_v45, %v2711_v51  ;;  %772 = vst [vmem:[#allocation2 + $0x20] sm:$0x1] %v771_v57  ;;  %v1674_v6 = vrot.slane %v1672_v53, 4  ;;  %v3752_v7 = vrot.slane %v3655_v59, 5  ;;  %v2613_v8 = vld [vmem:[#allocation2 + $0x18] sm:$0xe] }
  0x27   : > { %v4999_v2 = vld [vmem:[#allocation2 + $0x24] sm:$0xff]   ;;  %v1080_v9 = vsel %vm5234_vm14, %v1075_v62, %v5195_v61  ;;  %v4799_v10 = vcombine.low %v2709_v55, %v2712_v4  ;;  %v4847_v12 = vrot.slane %v3654_v58, 9  ;;  %v2614_v13 = vld [vmem:[#allocation2 + $0x1c] sm:$0xf]  ;;  %v4784_v14 = vrot.slane %v2613_v8, 9  ;;  %s5065_s12 = smov 32  }
  0x28   : > { %v777_v15 = vld [vmem:[#allocation2 + $0x2c] sm:$0x1]  ;;  %v4703_v16 = vcombine.low %v1080_v9, %v1090_v63  ;;  %v1676_v18 = vsel %vm5199_vm13, %v1674_v6, %v1675_v56  ;;  %v3754_v19 = vrot.slane %v3752_v7, 4  ;;  %v3657_v20 = vld [vmem:[#allocation2 + $0x24] sm:$0xe]  ;;  %v5256_v22 = vrot.slane %v488_v60, 7 }
  0x29   : > { %v3658_v21 = vld [vmem:[#allocation2 + $0x28] sm:$0xf]  ;;  %v4736_v24 = vcombine.low %v1673_v5, %v1676_v18  ;;  %v2715_v25 = vrot.slane %v2614_v13, 5  ;;  %v778_v61 = vsel %vm5120_vm3, %v486_v27, %v777_v15  ;;  %v4848_v26 = vrot.slane %v3657_v20, 9  ;;  %v2068_v28 = vld [vmem:[#allocation2 + $0x18] sm:$0xf] }
  0x2a   : > { %3046 = vrot.lane.b32.xlu1 %v4999_v2, %s5062_s9  ;;  %v2069_v29 = vld [vmem:[#allocation2 + $0x1c] sm:$0xf]  ;;  %1499 = vrot.lane.b32.xlu0 %v4703_v16, %s5063_s10  ;;  %779 = vst [vmem:[#allocation2 + $0x2c] sm:$0x1] %v778_v61  ;;  %v3759_v30 = vrot.slane %v3658_v21, 5  ;;  %v2138_v31 = vshrl.u32 %v2068_v28, 16  ;;  %v3753_v34 = vsel %vm5199_vm13, %v4847_v12, %v3752_v7 }
  0x2b   : > { %v2141_v32 = vshll.u32 %v2068_v28, 16  ;;  %v2147_v33 = vshll.u32 %v2069_v29, 16  ;;  %v2717_v35 = vrot.slane %v2715_v25, 4  ;;  %v2151_v36 = vshrl.u32 %v2069_v29, 16  ;;  %v1019_v3 = vld [vmem:[#allocation2 + $0xc] sm:$0xf] }
  0x2c   : > { %v1020_v37 = vld [vmem:[#allocation2 + $0x10] sm:$0xf]  ;;  %v2716_v40 = vsel %vm5199_vm13, %v4784_v14, %v2715_v25  ;;  %v3760_v41 = vsel %vm5199_vm13, %v4848_v26, %v3759_v30  ;;  %v3761_v43 = vrot.slane %v3759_v30, 4  ;;  %v2140_v44 = vrot.slane %v2138_v31, 4  ;;  %v1021_v57 = vld [vmem:[#allocation2 + $0x14] sm:$0x1] }
  0x2d   : > { %v3656_v39 = vld [vmem:[#allocation2 + $0x20] sm:$0x1]  ;;  %v2143_v48 = vrot.slane %v2141_v32, 5  ;;  %v2149_v49 = vrot.slane %v2147_v33, 5  ;;  %v2153_v50 = vrot.slane %v2151_v36, 4  ;;  %v1092_v52 = vshrl.u32 %v1019_v3, 16 }
  0x2e   : > { %v2615_v27 = vld [vmem:[#allocation2 + $0x20] sm:$0x1]  ;;  %1825 = vrot.lane.b32.xlu1 %v4736_v24, %s5061_s8  ;;  %v3755_v45 = vrot.slane %v3656_v39, 5  ;;  %2866 = vrot.lane.b32.xlu0 %v4799_v10, %s5064_s11  ;;  %v1095_v53 = vshll.u32 %v1019_v3, 16  ;;  %v1101_v58 = vshll.u32 %v1020_v37, 16  ;;  %v1105_v12 = vshrl.u32 %v1020_v37, 16 }
  0x2f   : > { %v2718_v46 = vrot.slane %v2615_v27, 5  ;;  %v2070_v47 = vld [vmem:[#allocation2 + $0x20] sm:$0x1]  ;;  %v2144_v56 = vor.u32 %v2143_v48, %v2140_v44  ;;  %v2154_v62 = vor.u32 %v2153_v50, %v2149_v49  ;;  %v3112_v2 = vld [vmem:[#allocation2 + $0x24] sm:$0xf]  ;;  %v1094_v6 = vrot.slane %v1092_v52, 4 }
  0x30   : > { %v2157_v51 = vshll.u32 %v2070_v47, 16  ;;  %v3756_v54 = vsel %vm5199_vm13, %v3754_v19, %v3755_v45  ;;  %v1097_v7 = vrot.slane %v1095_v53, 5  ;;  %v1103_v8 = vrot.slane %v1101_v58, 5  ;;  %v3113_v16 = vld [vmem:[#allocation2 + $0x28] sm:$0xf]  ;;  %s5066_s13 = smov 16  }
  0x31   : > { %v2719_v55 = vsel %vm5199_vm13, %v2717_v35, %v2718_v46  ;;  %v4863_v59 = vcombine.low %v3753_v34, %v3756_v54  ;;  %v3659_v4 = vld [vmem:[#allocation2 + $0x2c] sm:$0x1]  ;;  %v2145_v5 = vrot.slane %v2144_v56, 4  ;;  %v2155_v10 = vrot.slane %v2154_v62, 4  ;;  %v2066_v36 = vld [vmem:[#allocation2 + $0x10] sm:$0xf] }
  0x32   : > { %v4800_v60 = vcombine.low %v2716_v40, %v2719_v55  ;;  %v2159_v63 = vrot.slane %v2157_v51, 5  ;;  %v3762_v9 = vrot.slane %v3659_v4, 5  ;;  %v1111_v13 = vshll.u32 %v1021_v57, 16  ;;  %v3114_v61 = vld [vmem:[#allocation2 + $0x2c] sm:$0x1]  ;;  %s5067_s14 = smov 28  }
  0x33   : > { %3910 = vrot.lane.b32.xlu0 %v4863_v59, %s5065_s12  ;;  %v2150_v14 = vsel %vm5234_vm14, %v2145_v5, %v2149_v49  ;;  %v1098_v15 = vor.u32 %v1097_v7, %v1094_v6  ;;  %v3182_v18 = vshrl.u32 %v3112_v2, 16  ;;  %v3185_v19 = vshll.u32 %v3112_v2, 16  ;;  %v2065_v26 = vld [vmem:[#allocation2 + $0xc] sm:$0xf]  ;;  %v2067_v45 = vld [vmem:[#allocation2 + $0x14] sm:$0x1] }
  0x34   : > { %2868 = vrot.lane.b32.xlu1 %v4800_v60, %s5064_s11  ;;  %v3763_v20 = vsel %vm5199_vm13, %v3761_v43, %v3762_v9  ;;  %v2160_v21 = vsel %vm5234_vm14, %v2155_v10, %v2159_v63  ;;  %v1107_v24 = vrot.slane %v1105_v12, 4  ;;  %v1113_v25 = vrot.slane %v1111_v13, 5  ;;  %v1022_v50 = vld [vmem:[#allocation2 + $0x18] sm:$0xf]  ;;  %v1023_v55 = vld [vmem:[#allocation2 + $0x1c] sm:$0xf] }
  0x35   : > { %v4864_v28 = vcombine.low %v3760_v41, %v3763_v20  ;;  %v4768_v29 = vcombine.low %v2150_v14, %v2160_v21  ;;  %v1099_v30 = vrot.slane %v1098_v15, 4  ;;  %v3184_v31 = vrot.slane %v3182_v18, 4  ;;  %v1024_v60 = vld [vmem:[#allocation2 + $0x20] sm:$0x1]  ;;  %v3109_v5 = vld [vmem:[#allocation2 + $0x18] sm:$0xf] }
  0x36   : > { %v1108_v32 = vor.u32 %v1107_v24, %v1103_v8  ;;  %v3187_v33 = vrot.slane %v3185_v19, 5  ;;  %v3191_v34 = vshll.u32 %v3113_v16, 16  ;;  %v3195_v35 = vshrl.u32 %v3113_v16, 16  ;;  %v3110_v15 = vld [vmem:[#allocation2 + $0x1c] sm:$0xf]  ;;  %s4904_s27 = sshll.u32 %s6782_s25, 8 }
  0x37   : > { %3912 = vrot.lane.b32.xlu0 %v4864_v28, %s5065_s12  ;;  %v1104_v3 = vsel %vm5234_vm14, %v1099_v30, %v1103_v8  ;;  %v3201_v37 = vshll.u32 %v3114_v61, 16  ;;  %v2114_v39 = vshrl.u32 %v2065_v26, 16  ;;  %v2117_v27 = vshll.u32 %v2065_v26, 16  ;;  %v3111_v61 = vld [vmem:[#allocation2 + $0x20] sm:$0x1] }
  0x38   : > { %2547 = vrot.lane.b32.xlu1 %v4768_v29, %s5066_s13  ;;  %v1109_v40 = vrot.slane %v1108_v32, 4  ;;  %v3188_v41 = vor.u32 %v3187_v33, %v3184_v31  ;;  %v3193_v43 = vrot.slane %v3191_v34, 5  ;;  %v3197_v44 = vrot.slane %v3195_v35, 4  ;;  %v1025_v32 = vld [vmem:[#allocation2 + $0x24] sm:$0xf] }
  0x39   : > { %v3203_v46 = vrot.slane %v3201_v37, 5  ;;  %v2116_v47 = vrot.slane %v2114_v39, 4  ;;  %v2119_v48 = vrot.slane %v2117_v27, 5  ;;  %v2123_v49 = vshll.u32 %v2066_v36, 16 }
  0x3a   : > { %v1114_v51 = vsel %vm5234_vm14, %v1109_v40, %v1113_v25  ;;  %v3189_v52 = vrot.slane %v3188_v41, 4  ;;  %v3198_v53 = vor.u32 %v3197_v44, %v3193_v43  ;;  %v2127_v54 = vshrl.u32 %v2066_v36, 16 }
  0x3b   : > { %v4704_v56 = vcombine.low %v1104_v3, %v1114_v51  ;;  %v2120_v57 = vor.u32 %v2119_v48, %v2116_v47  ;;  %v2125_v58 = vrot.slane %v2123_v49, 5  ;;  %v2133_v59 = vshll.u32 %v2067_v45, 16  ;;  %v1026_v3 = vld [vmem:[#allocation2 + $0x28] sm:$0xf]  ;;  %v1027_v48 = vld [vmem:[#allocation2 + $0x2c] sm:$0x1] }
  0x3c   : > { %v3194_v62 = vsel %vm5234_vm14, %v3189_v52, %v3193_v43  ;;  %v3199_v63 = vrot.slane %v3198_v53, 4  ;;  %v2129_v2 = vrot.slane %v2127_v54, 4  ;;  %v1116_v4 = vshrl.u32 %v1022_v50, 16  ;;  %v1570_v51 = vld [vmem:[#allocation2 + $0x18] sm:$0xe] }
  0x3d   : > { %1501 = vrot.lane.b32.xlu0 %v4704_v56, %s5063_s10  ;;  %v2121_v6 = vrot.slane %v2120_v57, 4  ;;  %v2135_v7 = vrot.slane %v2133_v59, 5  ;;  %v1119_v8 = vshll.u32 %v1022_v50, 16  ;;  %v1125_v9 = vshll.u32 %v1023_v55, 16  ;;  %v1571_v56 = vld [vmem:[#allocation2 + $0x1c] sm:$0xf] }
  0x3e   : > { %v3204_v10 = vsel %vm5234_vm14, %v3199_v63, %v3203_v46  ;;  %v2130_v12 = vor.u32 %v2129_v2, %v2125_v58  ;;  %v1118_v13 = vrot.slane %v1116_v4, 4  ;;  %v1129_v14 = vshrl.u32 %v1023_v55, 16  ;;  %v1572_v57 = vld [vmem:[#allocation2 + $0x20] sm:$0x1]  ;;  %v1573_v63 = vld [vmem:[#allocation2 + $0x24] sm:$0xe] }
  0x3f   : > { %v4832_v16 = vcombine.low %v3194_v62, %v3204_v10  ;;  %v2126_v18 = vsel %vm5234_vm14, %v2121_v6, %v2125_v58  ;;  %v1121_v19 = vrot.slane %v1119_v8, 5  ;;  %v1127_v20 = vrot.slane %v1125_v9, 5 }
  0x40   : > { %v2131_v21 = vrot.slane %v2130_v12, 4  ;;  %v1131_v24 = vrot.slane %v1129_v14, 4  ;;  %v1135_v25 = vshll.u32 %v1024_v60, 16  ;;  %v3158_v26 = vshrl.u32 %v3109_v5, 16  ;;  %v1574_v12 = vld [vmem:[#allocation2 + $0x28] sm:$0xf] }
  0x41   : > { %3591 = vrot.lane.b32.xlu1 %v4832_v16, %s5067_s14  ;;  %v1122_v28 = vor.u32 %v1121_v19, %v1118_v13  ;;  %v3161_v29 = vshll.u32 %v3109_v5, 16  ;;  %v3167_v30 = vshll.u32 %v3110_v15, 16  ;;  %v3171_v31 = vshrl.u32 %v3110_v15, 16  ;;  %v1575_v13 = vld [vmem:[#allocation2 + $0x2c] sm:$0x1] }
  0x42   : > { %v2136_v33 = vsel %vm5234_vm14, %v2131_v21, %v2135_v7  ;;  %v1132_v34 = vor.u32 %v1131_v24, %v1127_v20  ;;  %v1137_v35 = vrot.slane %v1135_v25, 5  ;;  %v3160_v36 = vrot.slane %v3158_v26, 4  ;;  %v409_v19 = vld [vmem:[%s5140_s29 + $0x1c] sm:$0xf] }
  0x43   : > { %v4767_v37 = vcombine.low %v2126_v18, %v2136_v33  ;;  %v1123_v39 = vrot.slane %v1122_v28, 4  ;;  %v3163_v27 = vrot.slane %v3161_v29, 5  ;;  %v3169_v40 = vrot.slane %v3167_v30, 5  ;;  %v2071_v30 = vld [vmem:[#allocation2 + $0x24] sm:$0xf] }
  0x44   : > { %v1133_v41 = vrot.slane %v1132_v34, 4  ;;  %v3173_v43 = vrot.slane %v3171_v31, 4  ;;  %v3177_v44 = vshll.u32 %v3111_v61, 16  ;;  %v1140_v45 = vshrl.u32 %v1025_v32, 16 }
  0x45   : > { %2545 = vrot.lane.b32.xlu0 %v4767_v37, %s5066_s13  ;;  %v1128_v46 = vsel %vm5234_vm14, %v1123_v39, %v1127_v20  ;;  %v3164_v47 = vor.u32 %v3163_v27, %v3160_v36  ;;  %v1143_v49 = vshll.u32 %v1025_v32, 16  ;;  %v1149_v50 = vshll.u32 %v1026_v3, 16  ;;  %v2072_v36 = vld [vmem:[#allocation2 + $0x28] sm:$0xf]  ;;  %v2073_v27 = vld [vmem:[#allocation2 + $0x2c] sm:$0x1] }
  0x46   : > { %v1138_v52 = vsel %vm5234_vm14, %v1133_v41, %v1137_v35  ;;  %v3174_v53 = vor.u32 %v3173_v43, %v3169_v40  ;;  %v3179_v54 = vrot.slane %v3177_v44, 5  ;;  %v1142_v55 = vrot.slane %v1140_v45, 4  ;;  %v780_v35 = vld [vmem:[#allocation2 + $0x30] sm:$0xf]  ;;  %v5000_v41 = vld [vmem:[#allocation2 + $0x24] sm:$0xff]  }
  0x47   : > { %v4705_v58 = vcombine.low %v1128_v46, %v1138_v52  ;;  %v3165_v59 = vrot.slane %v3164_v47, 4  ;;  %v1145_v60 = vrot.slane %v1143_v49, 5  ;;  %v1151_v62 = vrot.slane %v1149_v50, 5  ;;  %v2616_v47 = vld [vmem:[#allocation2 + $0x24] sm:$0xe] }
  0x48   : > { %v3175_v2 = vrot.slane %v3174_v53, 4  ;;  %v1153_v4 = vshrl.u32 %v1026_v3, 16  ;;  %v1159_v5 = vshll.u32 %v1027_v48, 16  ;;  %v4721_v6 = vrot.slane %v1570_v51, 9  ;;  %v2617_v48 = vld [vmem:[#allocation2 + $0x28] sm:$0xf] }
  0x49   : > { %1503 = vrot.lane.b32.xlu1 %v4705_v58, %s5063_s10  ;;  %v3170_v7 = vsel %vm5234_vm14, %v3165_v59, %v3169_v40  ;;  %v1146_v8 = vor.u32 %v1145_v60, %v1142_v55  ;;  %v1679_v9 = vrot.slane %v1571_v56, 5  ;;  %v1682_v10 = vrot.slane %v1572_v57, 5  ;;  %v360_v40 = vld [vmem:[#allocation2 + $0x38] sm:$0x1]  ;;  %v2618_v53 = vld [vmem:[#allocation2 + $0x2c] sm:$0x1] }
  0x4a   : > { %v3180_v14 = vsel %vm5234_vm14, %v3175_v2, %v3179_v54  ;;  %v1155_v15 = vrot.slane %v1153_v4, 4  ;;  %v1161_v16 = vrot.slane %v1159_v5, 5  ;;  %v4722_v18 = vrot.slane %v1573_v63, 9  ;;  %v307_v54 = vld [vmem:[#allocation2 + $0x3c] sm:$0x1] }
  0x4b   : > { %v4831_v20 = vcombine.low %v3170_v7, %v3180_v14  ;;  %v1147_v21 = vrot.slane %v1146_v8, 4  ;;  %v1680_v24 = vsel %vm5199_vm13, %v4721_v6, %v1679_v9  ;;  %v1681_v25 = vrot.slane %v1679_v9, 4  ;;  %v410_v57 = vld [vmem:[%s5140_s29 + $0x20] sm:$0xf]  ;;  %v5335_v63 = vld [vmem:[%s5140_s29 + $0x24] sm:$0xf] }
  0x4c   : > { %v1156_v61 = vor.u32 %v1155_v15, %v1151_v62  ;;  %v1686_v26 = vrot.slane %v1574_v12, 5  ;;  %v1689_v28 = vrot.slane %v1575_v13, 5  ;;  %v491_v29 = vshll.u32 %v5229_v38, 16  ;;  %v363_v7 = vld [vmem:[#allocation2 + $0x44] sm:$0x1] }
  0x4d   : > { %3589 = vrot.lane.b32.xlu0 %v4831_v20, %s5067_s14  ;;  %v1152_v31 = vsel %vm5234_vm14, %v1147_v21, %v1151_v62  ;;  %v1683_v32 = vsel %vm5199_vm13, %v1681_v25, %v1682_v10  ;;  %v494_v33 = vrot.slane %v5256_v22, 4  ;;  %v496_v34 = vshrl.u32 %v409_v19, 16  ;;  %v310_v13 = vld [vmem:[#allocation2 + $0x48] sm:$0x1] }
  0x4e   : > { %v1157_v3 = vrot.slane %v1156_v61, 4  ;;  %v4737_v37 = vcombine.low %v1680_v24, %v1683_v32  ;;  %v1687_v39 = vsel %vm5199_vm13, %v4722_v18, %v1686_v26  ;;  %v1688_v38 = vrot.slane %v1686_v26, 4 }
  0x4f   : > { %v493_v43 = vor.u32 %v491_v29, %v5256_v22  ;;  %v5323_v44 = vrot.slane %v496_v34, 7  ;;  %v499_v45 = vshll.u32 %v409_v19, 16  ;;  %v2162_v46 = vshrl.u32 %v2071_v30, 16 }
  0x50   : > { %v1162_v49 = vsel %vm5234_vm14, %v1157_v3, %v1161_v16  ;;  %v1690_v50 = vsel %vm5199_vm13, %v1688_v38, %v1689_v28  ;;  %v2165_v51 = vshll.u32 %v2071_v30, 16  ;;  %v2171_v52 = vshll.u32 %v2072_v36, 16  ;;  %v5361_v3 = vld [vmem:[%s5140_s29 + $0x28] sm:$0xf] }
  0x51   : > { %v4706_v55 = vcombine.low %v1152_v31, %v1162_v49  ;;  %1827 = vrot.lane.b32.xlu0 %v4737_v37, %s5061_s8  ;;  %v4738_v22 = vcombine.low %v1687_v39, %v1690_v50  ;;  %v501_v56 = vor.u32 %v499_v45, %v5323_v44  ;;  %v781_v58 = vsel %vm5161_vm9, %v493_v43, %v780_v35 }
  0x52   : > { %v2164_v59 = vrot.slane %v2162_v46, 4  ;;  %v2167_v60 = vrot.slane %v2165_v51, 5  ;;  %v2173_v62 = vrot.slane %v2171_v52, 5  ;;  %782 = vst [vmem:[#allocation2 + $0x30] sm:$0xf] %v781_v58  ;;  %v2175_v4 = vshrl.u32 %v2072_v36, 16 }
  0x53   : > { %1505 = vrot.lane.b32.xlu1 %v4706_v55, %s5063_s10  ;;  %v502_v2 = vsel %vm5153_vm7, %v494_v33, %v501_v56  ;;  %v2181_v5 = vshll.u32 %v2073_v27, 16  ;;  %v361_v6 = vsel %vm5147_vm6, 0, %v360_v40  ;;  %v4785_v9 = vrot.slane %v2616_v47, 9 }
  0x54   : > { %783 = vst.msk [vmem:[#allocation2 + $0x34] sm:$0xf] %vm280_vm0, %v502_v2  ;;  %v2168_v8 = vor.u32 %v2167_v60, %v2164_v59  ;;  %362 = vst [vmem:[#allocation2 + $0x38] sm:$0x1] %v361_v6  ;;  %v2722_v10 = vrot.slane %v2617_v48, 5  ;;  %v2725_v12 = vrot.slane %v2618_v53, 5 }
  0x55   : > { %2004 = vrot.lane.b32.xlu0 %v5000_v41, %s5060_s30  ;;  %v2177_v14 = vrot.slane %v2175_v4, 4  ;;  %v308_v15 = vsel %vm5120_vm3, 0, %v307_v54  ;;  %v505_v16 = vshrl.u32 %v410_v57, 16  ;;  %v503_v18 = vrot.slane %v5323_v44, 4 }
  0x56   : > { %v2169_v19 = vrot.slane %v2168_v8, 4  ;;  %v2183_v20 = vrot.slane %v2181_v5, 5  ;;  %v2724_v21 = vrot.slane %v2722_v10, 4  ;;  %309 = vst [vmem:[#allocation2 + $0x3c] sm:$0x1] %v308_v15  ;;  %v508_v61 = vshll.u32 %v410_v57, 16 }
  0x57   : > { %1829 = vrot.lane.b32.xlu1 %v4738_v22, %s5061_s8  ;;  %v2178_v24 = vor.u32 %v2177_v14, %v2173_v62  ;;  %v507_v25 = vrot.slane %v505_v16, 7  ;;  %v513_v26 = vshrl.u32 %v5335_v63, 16  ;;  %v2723_v28 = vsel %vm5199_vm13, %v4785_v9, %v2722_v10 }
  0x58   : > { %v2726_v29 = vsel %vm5199_vm13, %v2724_v21, %v2725_v12  ;;  %v364_v30 = vsel %vm5147_vm6, 0, %v363_v7  ;;  %v311_v31 = vsel %vm5120_vm3, 0, %v310_v13  ;;  %v2174_v32 = vsel %vm5234_vm14, %v2169_v19, %v2173_v62 }
  0x59   : > { %v2179_v33 = vrot.slane %v2178_v24, 4  ;;  %v516_v34 = vshll.u32 %v5335_v63, 16  ;;  %365 = vst [vmem:[#allocation2 + $0x44] sm:$0x1] %v364_v30  ;;  %312 = vst [vmem:[#allocation2 + $0x48] sm:$0x1] %v311_v31  ;;  %v4801_v40 = vcombine.low %v2723_v28, %v2726_v29  ;;  %v510_v47 = vor.u32 %v508_v61, %v507_v25 }
  0x5a   : > { %v2074_v35 = vld [vmem:[#allocation2 + $0x30] sm:$0xf]  ;;  %v511_v54 = vrot.slane %v507_v25, 4  ;;  %v515_v55 = vrot.slane %v513_v26, 7  ;;  %v522_v59 = vshrl.u32 %v5361_v3, 16  ;;  %vm6747_vm15 = vcmask 31744  }
  0x5b   : > { %v2619_v36 = vld [vmem:[#allocation2 + $0x30] sm:$0xe]  ;;  %v2184_v39 = vsel %vm5234_vm14, %v2179_v33, %v2183_v20  ;;  %v784_v38 = vld [vmem:[#allocation2 + $0x38] sm:$0x1]  ;;  %v2186_v27 = vshrl.u32 %v2074_v35, 16  ;;  %v2189_v45 = vshll.u32 %v2074_v35, 16 }
  0x5c   : > { %v5001_v37 = vld [vmem:[#allocation2 + $0x30] sm:$0xff]   ;;  %v4769_v41 = vcombine.low %v2174_v32, %v2184_v39  ;;  %v785_v43 = vsel %vm5120_vm3, %v503_v18, %v784_v38  ;;  %v4786_v53 = vrot.slane %v2619_v36, 9  ;;  %v518_v62 = vor.u32 %v516_v34, %v515_v55 }
  0x5d   : > { %v2075_v44 = vld [vmem:[#allocation2 + $0x34] sm:$0xf]  ;;  %2006 = vrot.lane.b32.xlu1 %v5001_v37, %s5060_s30  ;;  %786 = vst [vmem:[#allocation2 + $0x38] sm:$0x1] %v785_v43  ;;  %v2188_v48 = vrot.slane %v2186_v27, 4  ;;  %v2191_v52 = vrot.slane %v2189_v45, 5 }
  0x5e   : > { %v2620_v46 = vld [vmem:[#allocation2 + $0x34] sm:$0xf]  ;;  %v2195_v49 = vshll.u32 %v2075_v44, 16  ;;  %v2199_v50 = vshrl.u32 %v2075_v44, 16  ;;  %2549 = vrot.lane.b32.xlu0 %v4769_v41, %s5066_s13  ;;  %v787_v58 = vld [vmem:[#allocation2 + $0x3c] sm:$0xf]  ;;  %v519_v14 = vsel %vm5153_vm7, %v511_v54, %v518_v62 }
  0x5f   : > { %v2729_v51 = vrot.slane %v2620_v46, 5  ;;  %v2192_v60 = vor.u32 %v2191_v52, %v2188_v48  ;;  %v520_v63 = vrot.slane %v515_v55, 4  ;;  %v788_v2 = vsel %vm5161_vm9, %v510_v47, %v787_v58  ;;  %v3115_v4 = vld [vmem:[#allocation2 + $0x30] sm:$0xf]  ;;  %v3116_v5 = vld [vmem:[#allocation2 + $0x34] sm:$0xf] }
  0x60   : > { %v2197_v22 = vrot.slane %v2195_v49, 5  ;;  %v2201_v56 = vrot.slane %v2199_v50, 4  ;;  %789 = vst [vmem:[#allocation2 + $0x3c] sm:$0xf] %v788_v2  ;;  %v3206_v7 = vshrl.u32 %v3115_v4, 16  ;;  %v3209_v8 = vshll.u32 %v3115_v4, 16 }
  0x61   : > { %v2731_v57 = vrot.slane %v2729_v51, 4  ;;  %v3215_v9 = vshll.u32 %v3116_v5, 16  ;;  %v791_v10 = vld [vmem:[#allocation2 + $0x44] sm:$0x1]  ;;  %v2193_v12 = vrot.slane %v2192_v60, 4  ;;  %v5002_v13 = vld [vmem:[#allocation2 + $0x30] sm:$0xff]   ;;  %v2730_v29 = vsel %vm5199_vm13, %v4786_v53, %v2729_v51 }
  0x62   : > { %v2202_v6 = vor.u32 %v2201_v56, %v2197_v22  ;;  %2870 = vrot.lane.b32.xlu0 %v4801_v40, %s5064_s11  ;;  %v3219_v15 = vshrl.u32 %v3116_v5, 16  ;;  %v792_v16 = vsel %vm5120_vm3, %v520_v63, %v791_v10  ;;  %v3660_v18 = vld [vmem:[#allocation2 + $0x30] sm:$0xe]  ;;  %790 = vst.msk [vmem:[#allocation2 + $0x40] sm:$0xf] %vm280_vm0, %v519_v14  ;;  %v3208_v20 = vrot.slane %v3206_v7, 4 }
  0x63   : > { %v3211_v21 = vrot.slane %v3209_v8, 5  ;;  %v3217_v24 = vrot.slane %v3215_v9, 5  ;;  %793 = vst [vmem:[#allocation2 + $0x44] sm:$0x1] %v792_v16  ;;  %v3661_v25 = vld [vmem:[#allocation2 + $0x34] sm:$0xf]  ;;  %v2198_v26 = vsel %vm5234_vm14, %v2193_v12, %v2197_v22 }
  0x64   : > { %v2203_v19 = vrot.slane %v2202_v6, 4  ;;  %v2076_v61 = vld [vmem:[#allocation2 + $0x38] sm:$0x1]  ;;  %v3221_v34 = vrot.slane %v3219_v15, 4  ;;  %v4849_v37 = vrot.slane %v3660_v18, 9  ;;  %v3766_v39 = vrot.slane %v3661_v25, 5 }
  0x65   : > { %v2621_v28 = vld [vmem:[#allocation2 + $0x38] sm:$0x1]  ;;  %v2205_v31 = vshll.u32 %v2076_v61, 16  ;;  %v3212_v33 = vor.u32 %v3211_v21, %v3208_v20  ;;  %v1028_v52 = vld [vmem:[#allocation2 + $0x30] sm:$0xf]  ;;  %vm1547_vm1 = vcmask 64544  }
  0x66   : > { %v3117_v30 = vld [vmem:[#allocation2 + $0x38] sm:$0x1]  ;;  %v2732_v32 = vrot.slane %v2621_v28, 5  ;;  %3048 = vrot.lane.b32.xlu0 %v5002_v13, %s5062_s9  ;;  %v3222_v43 = vor.u32 %v3221_v34, %v3217_v24  ;;  %v3767_v46 = vsel %vm5199_vm13, %v4849_v37, %v3766_v39  ;;  %v3768_v47 = vrot.slane %v3766_v39, 4  ;;  %v1029_v53 = vld [vmem:[#allocation2 + $0x34] sm:$0xf] }
  0x67   : > { %v3662_v35 = vld [vmem:[#allocation2 + $0x38] sm:$0x1]  ;;  %v3225_v36 = vshll.u32 %v3117_v30, 16  ;;  %v2207_v27 = vrot.slane %v2205_v31, 5  ;;  %v3213_v41 = vrot.slane %v3212_v33, 4  ;;  %v1164_v13 = vshrl.u32 %v1028_v52, 16 }
  0x68   : > { %v3769_v38 = vrot.slane %v3662_v35, 5  ;;  %v2733_v40 = vsel %vm5199_vm13, %v2731_v57, %v2732_v32  ;;  %v3118_v45 = vld [vmem:[#allocation2 + $0x3c] sm:$0xf]  ;;  %v3223_v50 = vrot.slane %v3222_v43, 4  ;;  %v1030_v8 = vld [vmem:[#allocation2 + $0x38] sm:$0x1] }
  0x69   : > { %v3227_v44 = vrot.slane %v3225_v36, 5  ;;  %v2208_v48 = vsel %vm5234_vm14, %v2203_v19, %v2207_v27  ;;  %v3218_v49 = vsel %vm5234_vm14, %v3213_v41, %v3217_v24  ;;  %v3230_v51 = vshrl.u32 %v3118_v45, 16  ;;  %v3119_v22 = vld [vmem:[#allocation2 + $0x40] sm:$0xf]  ;;  %v3663_v9 = vld [vmem:[#allocation2 + $0x3c] sm:$0xe] }
  0x6a   : > { %v4770_v54 = vcombine.low %v2198_v26, %v2208_v48  ;;  %v4802_v55 = vcombine.low %v2730_v29, %v2733_v40  ;;  %v3233_v56 = vshll.u32 %v3118_v45, 16  ;;  %v3770_v57 = vsel %vm5199_vm13, %v3768_v47, %v3769_v38  ;;  %v3120_v60 = vld [vmem:[#allocation2 + $0x44] sm:$0x1]  ;;  %v1031_v15 = vld [vmem:[#allocation2 + $0x3c] sm:$0xf] }
  0x6b   : > { %v3228_v58 = vsel %vm5234_vm14, %v3223_v50, %v3227_v44  ;;  %v3232_v62 = vrot.slane %v3230_v51, 4  ;;  %v3239_v63 = vshll.u32 %v3119_v22, 16  ;;  %v3243_v2 = vshrl.u32 %v3119_v22, 16  ;;  %v3664_v21 = vld [vmem:[#allocation2 + $0x40] sm:$0xf] }
  0x6c   : > { %2551 = vrot.lane.b32.xlu1 %v4770_v54, %s5066_s13  ;;  %v4833_v4 = vcombine.low %v3218_v49, %v3228_v58  ;;  %v3235_v5 = vrot.slane %v3233_v56, 5  ;;  %v3249_v6 = vshll.u32 %v3120_v60, 16  ;;  %v4865_v7 = vcombine.low %v3767_v46, %v3770_v57  ;;  %v3665_v28 = vld [vmem:[#allocation2 + $0x44] sm:$0x1]  ;;  %v5003_v29 = vld [vmem:[#allocation2 + $0x3c] sm:$0xff]  }
  0x6d   : > { %v3241_v10 = vrot.slane %v3239_v63, 5  ;;  %v3245_v12 = vrot.slane %v3243_v2, 4  ;;  %v1167_v14 = vshll.u32 %v1028_v52, 16  ;;  %v1173_v19 = vshll.u32 %v1029_v53, 16  ;;  %v1032_v40 = vld [vmem:[#allocation2 + $0x40] sm:$0xf] }
  0x6e   : > { %3593 = vrot.lane.b32.xlu0 %v4833_v4, %s5067_s14  ;;  %v3236_v16 = vor.u32 %v3235_v5, %v3232_v62  ;;  %v3251_v18 = vrot.slane %v3249_v6, 5  ;;  %v1177_v20 = vshrl.u32 %v1029_v53, 16  ;;  %v1166_v25 = vrot.slane %v1164_v13, 4  ;;  %v1033_v41 = vld [vmem:[#allocation2 + $0x44] sm:$0x1] }
  0x6f   : > { %v3246_v24 = vor.u32 %v3245_v12, %v3241_v10  ;;  %v1169_v61 = vrot.slane %v1167_v14, 5  ;;  %v1183_v26 = vshll.u32 %v1030_v8, 16  ;;  %v1175_v31 = vrot.slane %v1173_v19, 5  ;;  %v1576_v44 = vld [vmem:[#allocation2 + $0x30] sm:$0xe] }
  0x70   : > { %2872 = vrot.lane.b32.xlu1 %v4802_v55, %s5064_s11  ;;  %v3237_v30 = vrot.slane %v3236_v16, 4  ;;  %v1179_v32 = vrot.slane %v1177_v20, 4  ;;  %v4850_v33 = vrot.slane %v3663_v9, 9  ;;  %v3773_v37 = vrot.slane %v3664_v21, 5  ;;  %v1577_v53 = vld [vmem:[#allocation2 + $0x34] sm:$0xf] }
  0x71   : > { %v3247_v34 = vrot.slane %v3246_v24, 4  ;;  %v1170_v35 = vor.u32 %v1169_v61, %v1166_v25  ;;  %v1185_v36 = vrot.slane %v1183_v26, 5  ;;  %v3776_v27 = vrot.slane %v3665_v28, 5  ;;  %v1578_v57 = vld [vmem:[#allocation2 + $0x38] sm:$0x1] }
  0x72   : > { %v3242_v39 = vsel %vm5234_vm14, %v3237_v30, %v3241_v10  ;;  %3914 = vrot.lane.b32.xlu0 %v4865_v7, %s5065_s12  ;;  %v1180_v38 = vor.u32 %v1179_v32, %v1175_v31  ;;  %v1188_v43 = vshrl.u32 %v1031_v15, 16  ;;  %v3774_v47 = vsel %vm5199_vm13, %v4850_v33, %v3773_v37  ;;  %v1579_v58 = vld [vmem:[#allocation2 + $0x3c] sm:$0xe]  ;;  %v1580_v4 = vld [vmem:[#allocation2 + $0x40] sm:$0xf] }
  0x73   : > { %v3252_v45 = vsel %vm5234_vm14, %v3247_v34, %v3251_v18  ;;  %v1171_v46 = vrot.slane %v1170_v35, 4  ;;  %v3775_v48 = vrot.slane %v3773_v37, 4  ;;  %v1191_v52 = vshll.u32 %v1031_v15, 16  ;;  %v1581_v5 = vld [vmem:[#allocation2 + $0x44] sm:$0x1] }
  0x74   : > { %3050 = vrot.lane.b32.xlu1 %v5003_v29, %s5062_s9  ;;  %v4834_v49 = vcombine.low %v3242_v39, %v3252_v45  ;;  %v1181_v50 = vrot.slane %v1180_v38, 4  ;;  %v1190_v51 = vrot.slane %v1188_v43, 4  ;;  %v1197_v22 = vshll.u32 %v1032_v40, 16  ;;  %v413_v20 = vld [vmem:[%s5140_s29 + $0x2c] sm:$0xf]  ;;  %v5017_v29 = vld [vmem:[%s6740_s1] sm:$0xff]  }
  0x75   : > { %v1176_v54 = vsel %vm5234_vm14, %v1171_v46, %v1175_v31  ;;  %v3777_v55 = vsel %vm5199_vm13, %v3775_v48, %v3776_v27  ;;  %v1201_v56 = vshrl.u32 %v1032_v40, 16  ;;  %v1193_v63 = vrot.slane %v1191_v52, 5  ;;  %v794_v26 = vld [vmem:[#allocation2 + $0x48] sm:$0xf]  ;;  %v2077_v28 = vld [vmem:[#allocation2 + $0x3c] sm:$0xf]  ;;  %4926 = vmatprep.subr.bf16.mxu0 %v5017_v29  ;;  %4969 = vmatprep.subr.bf16.mxu1 %v5017_v29 }
  0x76   : > { %v1186_v60 = vsel %vm5234_vm14, %v1181_v50, %v1185_v36  ;;  %v4866_v62 = vcombine.low %v3774_v47, %v3777_v55  ;;  %v1207_v2 = vshll.u32 %v1033_v41, 16  ;;  %v1199_v7 = vrot.slane %v1197_v22, 5  ;;  %v2078_v36 = vld [vmem:[#allocation2 + $0x40] sm:$0xf]  ;;  %v2079_v27 = vld [vmem:[#allocation2 + $0x44] sm:$0x1]  ;;  %4927 = vmatpush3.bf16.msra.mxu0 %v5017_v29  ;;  %4972 = vmatpush3.bf16.msra.mxu1 %v5017_v29 }
  0x77   : > { %v4707_v6 = vcombine.low %v1176_v54, %v1186_v60  ;;  %v1203_v8 = vrot.slane %v1201_v56, 4  ;;  %v4723_v9 = vrot.slane %v1576_v44, 9  ;;  %v1194_v10 = vor.u32 %v1193_v63, %v1190_v51  ;;  %v366_v40 = vld [vmem:[#allocation2 + $0x50] sm:$0x1]  ;;  %v5020_v41 = vld [vmem:[%s6740_s1 + $0x8] sm:$0xff]   ;;  %v5004_v48 = vld [vmem:[#allocation2 + $0x3c] sm:$0xff]  }
  0x78   : > { %3595 = vrot.lane.b32.xlu1 %v4834_v49, %s5067_s14  ;;  %3916 = vrot.lane.b32.xlu0 %v4866_v62, %s5065_s12  ;;  %v1209_v12 = vrot.slane %v1207_v2, 5  ;;  %v1693_v13 = vrot.slane %v1577_v53, 5  ;;  %v1696_v14 = vrot.slane %v1578_v57, 5  ;;  %v4724_v16 = vrot.slane %v1579_v58, 9  ;;  %v313_v47 = vld [vmem:[#allocation2 + $0x54] sm:$0x1] }
  0x79   : > { %v1204_v15 = vor.u32 %v1203_v8, %v1199_v7  ;;  %v1700_v18 = vrot.slane %v1580_v4, 5  ;;  %v1703_v19 = vrot.slane %v1581_v5, 5  ;;  %v1195_v21 = vrot.slane %v1194_v10, 4  ;;  %v2622_v53 = vld [vmem:[#allocation2 + $0x3c] sm:$0xe]  ;;  %4928 = vmatprep.subr.bf16.mxu0 %v5020_v41  ;;  %4970 = vmatprep.subr.bf16.mxu1 %v5020_v41 }
  0x7a   : > { %v1694_v24 = vsel %vm5199_vm13, %v4723_v9, %v1693_v13  ;;  %v1695_v25 = vrot.slane %v1693_v13, 4  ;;  %v524_v61 = vrot.slane %v522_v59, 7  ;;  %v525_v32 = vshll.u32 %v5361_v3, 16  ;;  %v414_v54 = vld [vmem:[%s5140_s29 + $0x30] sm:$0xf]  ;;  %4929 = vmatpush3.bf16.msra.mxu0 %v5020_v41  ;;  %4973 = vmatpush3.bf16.msra.mxu1 %v5020_v41 }
  0x7b   : > { %v1205_v30 = vrot.slane %v1204_v15, 4  ;;  %v1702_v31 = vrot.slane %v1700_v18, 4  ;;  %v1200_v33 = vsel %vm5234_vm14, %v1195_v21, %v1199_v7  ;;  %v1701_v59 = vsel %vm5199_vm13, %v4724_v16, %v1700_v18  ;;  %v5444_v55 = vld [vmem:[%s5140_s29 + $0x34] sm:$0xf]  ;;  %v2623_v60 = vld [vmem:[#allocation2 + $0x40] sm:$0xf] }
  0x7c   : > { %1507 = vrot.lane.b32.xlu1 %v4707_v6, %s5063_s10  ;;  %v1697_v34 = vsel %vm5199_vm13, %v1695_v25, %v1696_v14  ;;  %v530_v35 = vshrl.u32 %v413_v20, 16  ;;  %v527_v38 = vor.u32 %v525_v32, %v524_v61  ;;  %v528_v44 = vrot.slane %v524_v61, 4  ;;  %v2624_v62 = vld [vmem:[#allocation2 + $0x44] sm:$0x1]  ;;  %v369_v10 = vld [vmem:[#allocation2 + $0x5c] sm:$0x1] }
  0x7d   : > { %v1210_v37 = vsel %vm5234_vm14, %v1205_v30, %v1209_v12  ;;  %v4739_v39 = vcombine.low %v1694_v24, %v1697_v34  ;;  %v1704_v3 = vsel %vm5199_vm13, %v1702_v31, %v1703_v19  ;;  %v533_v46 = vshll.u32 %v413_v20, 16 }
  0x7e   : > { %v4708_v43 = vcombine.low %v1200_v33, %v1210_v37  ;;  %v5437_v45 = vrot.slane %v530_v35, 7  ;;  %v795_v49 = vsel %vm5161_vm9, %v527_v38, %v794_v26  ;;  %v2210_v50 = vshrl.u32 %v2077_v28, 16 }
  0x7f   : > { %1831 = vrot.lane.b32.xlu0 %v4739_v39, %s5061_s8  ;;  %v2213_v51 = vshll.u32 %v2077_v28, 16  ;;  %v2219_v52 = vshll.u32 %v2078_v36, 16  ;;  %v4740_v22 = vcombine.low %v1701_v59, %v1704_v3  ;;  %796 = vst [vmem:[#allocation2 + $0x48] sm:$0xf] %v795_v49  ;;  %v2223_v57 = vshrl.u32 %v2078_v36, 16 }
  0x80   : > { %1509 = vrot.lane.b32.xlu1 %v4708_v43, %s5063_s10  ;;  %v535_v56 = vor.u32 %v533_v46, %v5437_v45  ;;  %v2229_v58 = vshll.u32 %v2079_v27, 16  ;;  %v2212_v63 = vrot.slane %v2210_v50, 4  ;;  %v367_v5 = vsel %vm5147_vm6, 0, %v366_v40 }
  0x81   : > { %v2215_v2 = vrot.slane %v2213_v51, 5  ;;  %v2221_v4 = vrot.slane %v2219_v52, 5  ;;  %v537_v7 = vrot.slane %v5437_v45, 4  ;;  %v2225_v8 = vrot.slane %v2223_v57, 4  ;;  %368 = vst [vmem:[#allocation2 + $0x50] sm:$0x1] %v367_v5 }
  0x82   : > { %v536_v6 = vsel %vm5153_vm7, %v528_v44, %v535_v56  ;;  %v4787_v9 = vrot.slane %v2622_v53, 9  ;;  %v2736_v13 = vrot.slane %v2623_v60, 5  ;;  %v2739_v14 = vrot.slane %v2624_v62, 5 }
  0x83   : > { %2008 = vrot.lane.b32.xlu0 %v5004_v48, %s5060_s30  ;;  %797 = vst.msk [vmem:[#allocation2 + $0x4c] sm:$0xf] %vm280_vm0, %v536_v6  ;;  %v2216_v12 = vor.u32 %v2215_v2, %v2212_v63  ;;  %v314_v15 = vsel %vm5120_vm3, 0, %v313_v47  ;;  %v2226_v16 = vor.u32 %v2225_v8, %v2221_v4  ;;  %v2231_v18 = vrot.slane %v2229_v58, 5 }
  0x84   : > { %1833 = vrot.lane.b32.xlu1 %v4740_v22, %s5061_s8  ;;  %315 = vst [vmem:[#allocation2 + $0x54] sm:$0x1] %v314_v15  ;;  %v539_v19 = vshrl.u32 %v414_v54, 16  ;;  %v547_v20 = vshrl.u32 %v5444_v55, 16  ;;  %v2738_v24 = vrot.slane %v2736_v13, 4  ;;  %v542_v25 = vshll.u32 %v414_v54, 16 }
  0x85   : > { %v2217_v21 = vrot.slane %v2216_v12, 4  ;;  %v550_v61 = vshll.u32 %v5444_v55, 16  ;;  %v2227_v26 = vrot.slane %v2226_v16, 4  ;;  %v370_v30 = vsel %vm5147_vm6, 0, %v369_v10 }
  0x86   : > { %v541_v28 = vrot.slane %v539_v19, 7  ;;  %v549_v29 = vrot.slane %v547_v20, 7  ;;  %v2080_v32 = vld [vmem:[#allocation2 + $0x48] sm:$0xf]  ;;  %v2737_v33 = vsel %vm5199_vm13, %v4787_v9, %v2736_v13  ;;  %v2740_v34 = vsel %vm5199_vm13, %v2738_v24, %v2739_v14  ;;  %371 = vst [vmem:[#allocation2 + $0x5c] sm:$0x1] %v370_v30 }
  0x87   : > { %v2222_v31 = vsel %vm5234_vm14, %v2217_v21, %v2221_v4  ;;  %v2232_v59 = vsel %vm5234_vm14, %v2227_v26, %v2231_v18  ;;  %v2234_v35 = vshrl.u32 %v2080_v32, 16  ;;  %v2237_v36 = vshll.u32 %v2080_v32, 16  ;;  %v2625_v37 = vld [vmem:[#allocation2 + $0x48] sm:$0xe] }
  0x88   : > { %v4771_v39 = vcombine.low %v2222_v31, %v2232_v59  ;;  %v798_v3 = vld [vmem:[#allocation2 + $0x50] sm:$0x1]  ;;  %v544_v38 = vor.u32 %v542_v25, %v541_v28  ;;  %v545_v27 = vrot.slane %v541_v28, 4  ;;  %v3121_v40 = vld [vmem:[#allocation2 + $0x48] sm:$0xf]  ;;  %v4803_v46 = vcombine.low %v2737_v33, %v2740_v34 }
  0x89   : > { %v799_v43 = vsel %vm5120_vm3, %v537_v7, %v798_v3  ;;  %v2236_v45 = vrot.slane %v2234_v35, 4  ;;  %v552_v47 = vor.u32 %v550_v61, %v549_v29  ;;  %v2239_v48 = vrot.slane %v2237_v36, 5  ;;  %v3666_v5 = vld [vmem:[#allocation2 + $0x48] sm:$0xe] }
  0x8a   : > { %v5005_v41 = vld [vmem:[#allocation2 + $0x48] sm:$0xff]   ;;  %2553 = vrot.lane.b32.xlu0 %v4771_v39, %s5066_s13  ;;  %800 = vst [vmem:[#allocation2 + $0x50] sm:$0x1] %v799_v43  ;;  %v4788_v52 = vrot.slane %v2625_v37, 9  ;;  %v554_v55 = vrot.slane %v549_v29, 4  ;;  %v3254_v63 = vshrl.u32 %v3121_v40, 16 }
  0x8b   : > { %v2081_v44 = vld [vmem:[#allocation2 + $0x4c] sm:$0xf]  ;;  %2010 = vrot.lane.b32.xlu1 %v5005_v41, %s5060_s30  ;;  %v553_v54 = vsel %vm5153_vm7, %v545_v27, %v552_v47  ;;  %v801_v22 = vld [vmem:[#allocation2 + $0x54] sm:$0xf]  ;;  %v2240_v56 = vor.u32 %v2239_v48, %v2236_v45  ;;  %v3257_v2 = vshll.u32 %v3121_v40, 16  ;;  %v4851_v24 = vrot.slane %v3666_v5, 9 }
  0x8c   : > { %v2243_v49 = vshll.u32 %v2081_v44, 16  ;;  %v2247_v50 = vshrl.u32 %v2081_v44, 16  ;;  %v2626_v51 = vld [vmem:[#allocation2 + $0x4c] sm:$0xf]  ;;  %v802_v60 = vsel %vm5161_vm9, %v544_v38, %v801_v22  ;;  %804 = vst.msk [vmem:[#allocation2 + $0x58] sm:$0xf] %vm280_vm0, %v553_v54 }
  0x8d   : > { %v2743_v53 = vrot.slane %v2626_v51, 5  ;;  %v3122_v62 = vld [vmem:[#allocation2 + $0x4c] sm:$0xf]  ;;  %803 = vst [vmem:[#allocation2 + $0x54] sm:$0xf] %v802_v60  ;;  %v2241_v12 = vrot.slane %v2240_v56, 4 }
  0x8e   : > { %v2245_v57 = vrot.slane %v2243_v49, 5  ;;  %v2249_v58 = vrot.slane %v2247_v50, 4  ;;  %v805_v4 = vld [vmem:[#allocation2 + $0x5c] sm:$0x1]  ;;  %2874 = vrot.lane.b32.xlu0 %v4803_v46, %s5064_s11  ;;  %v5006_v8 = vld [vmem:[#allocation2 + $0x48] sm:$0xff]   ;;  %v3263_v9 = vshll.u32 %v3122_v62, 16 }
  0x8f   : > { %v2745_v7 = vrot.slane %v2743_v53, 4  ;;  %v3267_v10 = vshrl.u32 %v3122_v62, 16  ;;  %v3256_v13 = vrot.slane %v3254_v63, 4  ;;  %v3259_v14 = vrot.slane %v3257_v2, 5  ;;  %v3667_v21 = vld [vmem:[#allocation2 + $0x4c] sm:$0xf] }
  0x90   : > { %v2250_v6 = vor.u32 %v2249_v58, %v2245_v57  ;;  %v806_v15 = vsel %vm5120_vm3, %v554_v55, %v805_v4  ;;  %v3265_v19 = vrot.slane %v3263_v9, 5  ;;  %v5486_v26 = vsel %vm5199_vm13, %v4788_v52, %v2743_v53  ;;  %v1034_v52 = vld [vmem:[#allocation2 + $0x48] sm:$0xf]  ;;  %v1035_v58 = vld [vmem:[#allocation2 + $0x4c] sm:$0xf] }
  0x91   : > { %v3269_v20 = vrot.slane %v3267_v10, 4  ;;  %807 = vst [vmem:[#allocation2 + $0x5c] sm:$0x1] %v806_v15  ;;  %v2082_v25 = vld [vmem:[#allocation2 + $0x50] sm:$0x1]  ;;  %v3260_v29 = vor.u32 %v3259_v14, %v3256_v13  ;;  %v2246_v59 = vsel %vm5234_vm14, %v2241_v12, %v2245_v57  ;;  %v3780_v37 = vrot.slane %v3667_v21, 5 }
  0x92   : > { %v5482_v16 = vpop.permute.xlu0 %2000  ;;  %v2251_v18 = vrot.slane %v2250_v6, 4  ;;  %v2627_v61 = vld [vmem:[#allocation2 + $0x50] sm:$0x1]  ;;  %v2253_v30 = vshll.u32 %v2082_v25, 16  ;;  %3052 = vrot.lane.b32.xlu0 %v5006_v8, %s5062_s9  ;;  %v1212_v8 = vshrl.u32 %v1034_v52, 16  ;;  %v1215_v13 = vshll.u32 %v1034_v52, 16 }
  0x93   : > { %v3123_v28 = vld [vmem:[#allocation2 + $0x50] sm:$0x1]  ;;  %v2746_v31 = vrot.slane %v2627_v61, 5  ;;  %v3270_v32 = vor.u32 %v3269_v20, %v3265_v19  ;;  %v3261_v35 = vrot.slane %v3260_v29, 4  ;;  %v3125_v36 = vld [vmem:[#allocation2 + $0x58] sm:$0xf]  ;;  %v3781_v2 = vsel %vm5199_vm13, %v4851_v24, %v3780_v37 }
  0x94   : > { %v3273_v33 = vshll.u32 %v3123_v28, 16  ;;  %v5489_v34 = vpop.permute.xlu1 %1823  ;;  %v2255_v39 = vrot.slane %v2253_v30, 5  ;;  %v3124_v43 = vld [vmem:[#allocation2 + $0x54] sm:$0xf]  ;;  %v3287_v44 = vshll.u32 %v3125_v36, 16  ;;  %v3291_v45 = vshrl.u32 %v3125_v36, 16 }
  0x95   : > { %v2747_v3 = vsel %vm5199_vm13, %v2745_v7, %v2746_v31  ;;  %v3271_v38 = vrot.slane %v3270_v32, 4  ;;  %v3266_v41 = vsel %vm5234_vm14, %v3261_v35, %v3265_v19  ;;  %v3278_v49 = vshrl.u32 %v3124_v43, 16  ;;  %v3668_v51 = vld [vmem:[#allocation2 + $0x50] sm:$0x1]  ;;  %v3669_v9 = vld [vmem:[#allocation2 + $0x54] sm:$0xe] }
  0x96   : > { %v3275_v27 = vrot.slane %v3273_v33, 5  ;;  %v4804_v40 = vcombine.low %v5486_v26, %v2747_v3  ;;  %v5498_v46 = vpop.permute.xlu0 %3044  ;;  %v2256_v47 = vsel %vm5234_vm14, %v2251_v18, %v2255_v39  ;;  %v3281_v50 = vshll.u32 %v3124_v43, 16  ;;  %v1036_v4 = vld [vmem:[#allocation2 + $0x50] sm:$0x1]  ;;  %v3670_v15 = vld [vmem:[#allocation2 + $0x58] sm:$0xf] }
  0x97   : > { %v4772_v54 = vcombine.low %v2246_v59, %v2256_v47  ;;  %v3289_v56 = vrot.slane %v3287_v44, 5  ;;  %v3293_v57 = vrot.slane %v3291_v45, 4  ;;  %v3280_v60 = vrot.slane %v3278_v49, 4  ;;  %v1037_v30 = vld [vmem:[#allocation2 + $0x54] sm:$0xf] }
  0x98   : > { %v3276_v48 = vsel %vm5234_vm14, %v3271_v38, %v3275_v27  ;;  %v5504_v53 = vpop.permute.xlu1 %2002  ;;  %v3126_v22 = vld [vmem:[#allocation2 + $0x5c] sm:$0x1]  ;;  %v3283_v62 = vrot.slane %v3281_v50, 5  ;;  %v3782_v6 = vrot.slane %v3780_v37, 4  ;;  %v3783_v7 = vrot.slane %v3668_v51, 5  ;;  %v5007_v32 = vld [vmem:[#allocation2 + $0x54] sm:$0xff]  }
  0x99   : > { %v4835_v55 = vcombine.low %v3266_v41, %v3276_v48  ;;  %v3297_v63 = vshll.u32 %v3126_v22, 16  ;;  %2555 = vrot.lane.b32.xlu1 %v4772_v54, %s5066_s13  ;;  %v3294_v5 = vor.u32 %v3293_v57, %v3289_v56  ;;  %v1221_v14 = vshll.u32 %v1035_v58, 16  ;;  %v3671_v24 = vld [vmem:[#allocation2 + $0x5c] sm:$0x1]  ;;  %v1038_v27 = vld [vmem:[#allocation2 + $0x58] sm:$0xf] }
  0x9a   : > { %v3284_v10 = vor.u32 %v3283_v62, %v3280_v60  ;;  %v3784_v19 = vsel %vm5199_vm13, %v3782_v6, %v3783_v7  ;;  %v1214_v20 = vrot.slane %v1212_v8, 4  ;;  %v1225_v21 = vshrl.u32 %v1035_v58, 16  ;;  %v1039_v41 = vld [vmem:[#allocation2 + $0x5c] sm:$0x1]  ;;  %v1582_v51 = vld [vmem:[#allocation2 + $0x48] sm:$0xe] }
  0x9b   : > { %3597 = vrot.lane.b32.xlu0 %v4835_v55, %s5067_s14  ;;  %v3299_v12 = vrot.slane %v3297_v63, 5  ;;  %v3295_v18 = vrot.slane %v3294_v5, 4  ;;  %v4867_v26 = vcombine.low %v3781_v2, %v3784_v19  ;;  %v1217_v28 = vrot.slane %v1215_v13, 5  ;;  %v1583_v57 = vld [vmem:[#allocation2 + $0x4c] sm:$0xf] }
  0x9c   : > { %v5512_v25 = vpop.permute.xlu0 %1499  ;;  %v3285_v61 = vrot.slane %v3284_v10, 4  ;;  %v1223_v29 = vrot.slane %v1221_v14, 5  ;;  %v5514_v31 = vpop.permute.xlu1 %3046  ;;  %v1227_v59 = vrot.slane %v1225_v21, 4  ;;  %v1231_v35 = vshll.u32 %v1036_v4, 16  ;;  %v316_v58 = vld [vmem:[#allocation2 + $0x60] sm:$0x1] }
  0x9d   : > { %2876 = vrot.lane.b32.xlu1 %v4804_v40, %s5064_s11  ;;  %v3300_v33 = vsel %vm5234_vm14, %v3295_v18, %v3299_v12  ;;  %v4852_v36 = vrot.slane %v3669_v9, 9  ;;  %v1218_v39 = vor.u32 %v1217_v28, %v1214_v20  ;;  %v3787_v3 = vrot.slane %v3670_v15, 5  ;;  %v1584_v4 = vld [vmem:[#allocation2 + $0x50] sm:$0x1]  ;;  %v1585_v5 = vld [vmem:[#allocation2 + $0x54] sm:$0xe] }
  0x9e   : > { %v3290_v37 = vsel %vm5234_vm14, %v3285_v61, %v3289_v56  ;;  %v3790_v38 = vrot.slane %v3671_v24, 5  ;;  %v1228_v44 = vor.u32 %v1227_v59, %v1223_v29  ;;  %v1233_v40 = vrot.slane %v1231_v35, 5  ;;  %v1586_v12 = vld [vmem:[#allocation2 + $0x58] sm:$0xf]  ;;  %v1587_v13 = vld [vmem:[#allocation2 + $0x5c] sm:$0x1] }
  0x9f   : > { %3918 = vrot.lane.b32.xlu0 %v4867_v26, %s5065_s12  ;;  %v4836_v43 = vcombine.low %v3290_v37, %v3300_v33  ;;  %v1236_v45 = vshrl.u32 %v1037_v30, 16  ;;  %v1219_v47 = vrot.slane %v1218_v39, 4  ;;  %v3788_v48 = vsel %vm5199_vm13, %v4852_v36, %v3787_v3  ;;  %v416_v20 = vld [vmem:[%s5140_s29 + $0x38] sm:$0xf]  ;;  %v417_v33 = vld [vmem:[%s5140_s29 + $0x3c] sm:$0xf] }
  0xa0   : > { %v3789_v49 = vrot.slane %v3787_v3, 4  ;;  %v1239_v50 = vshll.u32 %v1037_v30, 16  ;;  %v5524_v52 = vpop.permute.xlu0 %2866  ;;  %v1229_v54 = vrot.slane %v1228_v44, 4  ;;  %v1245_v22 = vshll.u32 %v1038_v27, 16  ;;  %v5531_v6 = vpop.permute.xlu1 %1825  ;;  %v2084_v44 = vld [vmem:[#allocation2 + $0x58] sm:$0xf] }
  0xa1   : > { %3054 = vrot.lane.b32.xlu1 %v5007_v32, %s5062_s9  ;;  %v1238_v55 = vrot.slane %v1236_v45, 4  ;;  %v1249_v56 = vshrl.u32 %v1038_v27, 16  ;;  %v1224_v60 = vsel %vm5234_vm14, %v1219_v47, %v1223_v29  ;;  %v1255_v2 = vshll.u32 %v1039_v41, 16 }
  0xa2   : > { %v3791_v62 = vsel %vm5199_vm13, %v3789_v49, %v3790_v38  ;;  %v1241_v63 = vrot.slane %v1239_v50, 5  ;;  %v1234_v7 = vsel %vm5234_vm14, %v1229_v54, %v1233_v40  ;;  %v1247_v9 = vrot.slane %v1245_v22, 5  ;;  %v372_v40 = vld [vmem:[#allocation2 + $0x68] sm:$0x1]  ;;  %v5008_v22 = vld [vmem:[#allocation2 + $0x54] sm:$0xff]  }
  0xa3   : > { %v4868_v8 = vcombine.low %v3788_v48, %v3791_v62  ;;  %v1251_v10 = vrot.slane %v1249_v56, 4  ;;  %v4709_v14 = vcombine.low %v1224_v60, %v1234_v7  ;;  %v1257_v18 = vrot.slane %v1255_v2, 5  ;;  %v2628_v2 = vld [vmem:[#allocation2 + $0x54] sm:$0xe] }
  0xa4   : > { %v1242_v15 = vor.u32 %v1241_v63, %v1238_v55  ;;  %v4725_v19 = vrot.slane %v1582_v51, 9  ;;  %v1707_v24 = vrot.slane %v1583_v57, 5  ;;  %v1710_v61 = vrot.slane %v1584_v4, 5  ;;  %v2085_v57 = vld [vmem:[#allocation2 + $0x5c] sm:$0x1] }
  0xa5   : > { %3599 = vrot.lane.b32.xlu1 %v4836_v43, %s5067_s14  ;;  %3920 = vrot.lane.b32.xlu0 %v4868_v8, %s5065_s12  ;;  %v1252_v21 = vor.u32 %v1251_v10, %v1247_v9  ;;  %v4726_v26 = vrot.slane %v1585_v5, 9  ;;  %v1714_v29 = vrot.slane %v1586_v12, 5  ;;  %v1717_v30 = vrot.slane %v1587_v13, 5  ;;  %v5541_v59 = vpop.permute.xlu0 %3910  ;;  %v2083_v43 = vld [vmem:[#allocation2 + $0x54] sm:$0xf] }
  0xa6   : > { %v1243_v28 = vrot.slane %v1242_v15, 4  ;;  %v317_v32 = vsel %vm5120_vm3, 0, %v316_v58  ;;  %v1708_v36 = vsel %vm5199_vm13, %v4725_v19, %v1707_v24  ;;  %v1709_v37 = vrot.slane %v1707_v24, 4  ;;  %v5549_v45 = vpop.permute.xlu1 %2868  ;;  %v319_v10 = vld [vmem:[#allocation2 + $0x6c] sm:$0x1] }
  0xa7   : > { %v1253_v35 = vrot.slane %v1252_v21, 4  ;;  %318 = vst [vmem:[#allocation2 + $0x60] sm:$0x1] %v317_v32  ;;  %v556_v39 = vshrl.u32 %v416_v20, 16  ;;  %v1715_v38 = vsel %vm5199_vm13, %v4726_v26, %v1714_v29  ;;  %v1716_v27 = vrot.slane %v1714_v29, 4 }
  0xa8   : > { %v1248_v3 = vsel %vm5234_vm14, %v1243_v28, %v1247_v9  ;;  %v559_v41 = vshll.u32 %v416_v20, 16  ;;  %v1711_v48 = vsel %vm5199_vm13, %v1709_v37, %v1710_v61  ;;  %v564_v50 = vshrl.u32 %v417_v33, 16  ;;  %v2629_v9 = vld [vmem:[#allocation2 + $0x58] sm:$0xf]  ;;  %v5562_v12 = vld [vmem:[%s5140_s29 + $0x40] sm:$0xf] }
  0xa9   : > { %1511 = vrot.lane.b32.xlu1 %v4709_v14, %s5063_s10  ;;  %v1258_v47 = vsel %vm5234_vm14, %v1253_v35, %v1257_v18  ;;  %v558_v49 = vrot.slane %v556_v39, 7  ;;  %v4741_v54 = vcombine.low %v1708_v36, %v1711_v48  ;;  %v1718_v55 = vsel %vm5199_vm13, %v1716_v27, %v1717_v30  ;;  %v5565_v13 = vld [vmem:[%s5140_s29 + $0x44] sm:$0xf]  ;;  %v5567_v14 = vpop.permute.xlu0 %3912  ;;  %v2630_v21 = vld [vmem:[#allocation2 + $0x5c] sm:$0x1] }
  0xaa   : > { %v4710_v51 = vcombine.low %v1248_v3, %v1258_v47  ;;  %v567_v56 = vshll.u32 %v417_v33, 16  ;;  %v4742_v58 = vcombine.low %v1715_v38, %v1718_v55  ;;  %v5558_v63 = vrot.slane %v564_v50, 7  ;;  %v5574_v30 = vpop.permute.xlu1 %2547  ;;  %v375_v37 = vld [vmem:[#allocation2 + $0x74] sm:$0x1]  ;;  %v5012_v39 = vld [vmem:[#allocation2] sm:$0xff]  }
  0xab   : > { %v561_v60 = vor.u32 %v559_v41, %v558_v49  ;;  %v562_v62 = vrot.slane %v558_v49, 4  ;;  %1835 = vrot.lane.b32.xlu0 %v4741_v54, %s5061_s8  ;;  %v2258_v4 = vshrl.u32 %v2083_v43, 16  ;;  %v2261_v5 = vshll.u32 %v2083_v43, 16  ;;  %v5015_v43 = vld [vmem:[#allocation2 + $0xc] sm:$0xff]   ;;  %v5026_v54 = vld [vmem:[#allocation2 + $0x3c] sm:$0xff]   ;;  %1000 = vst.msk [vmem:[#allocation3] sm:$0xff] %vm6747_vm15, %v5012_v39 }
  0xac   : > { %v2267_v7 = vshll.u32 %v2084_v44, 16  ;;  %v2271_v8 = vshrl.u32 %v2084_v44, 16  ;;  %v569_v15 = vor.u32 %v567_v56, %v5558_v63  ;;  %v571_v18 = vrot.slane %v5558_v63, 4  ;;  %v5016_v44 = vld [vmem:[#allocation2 + $0x18] sm:$0xff]   ;;  %1001 = vst.msk [vmem:[#allocation3 + $0x8] sm:$0xff] %vm6747_vm15, %v5015_v43  ;;  %1005 = vst.msk [vmem:[#allocation3 + $0x28] sm:$0xff] %vm6747_vm15, %v5026_v54 }
  0xad   : > { %1513 = vrot.lane.b32.xlu1 %v4710_v51, %s5063_s10  ;;  %v2277_v19 = vshll.u32 %v2085_v57, 16  ;;  %v373_v20 = vsel %vm5147_vm6, 0, %v372_v40  ;;  %v2260_v61 = vrot.slane %v2258_v4, 4  ;;  %v2263_v26 = vrot.slane %v2261_v5, 5  ;;  %v5018_v40 = vld [vmem:[#allocation2 + $0x24] sm:$0xff]   ;;  %v5025_v51 = vld [vmem:[#allocation2 + $0x30] sm:$0xff]  }
  0xae   : > { %v808_v24 = vld [vmem:[#allocation2 + $0x60] sm:$0xf]  ;;  %v2269_v28 = vrot.slane %v2267_v7, 5  ;;  %v2273_v29 = vrot.slane %v2271_v8, 4  ;;  %374 = vst [vmem:[#allocation2 + $0x68] sm:$0x1] %v373_v20  ;;  %v570_v32 = vsel %vm5153_vm7, %v562_v62, %v569_v15 }
  0xaf   : > { %v809_v33 = vsel %vm5161_vm9, %v561_v60, %v808_v24  ;;  %v2279_v35 = vrot.slane %v2277_v19, 5  ;;  %v4789_v36 = vrot.slane %v2628_v2, 9  ;;  %2012 = vrot.lane.b32.xlu0 %v5008_v22, %s5060_s30  ;;  %811 = vst.msk [vmem:[#allocation2 + $0x64] sm:$0xf] %vm280_vm0, %v570_v32  ;;  %v2264_v3 = vor.u32 %v2263_v26, %v2260_v61  ;;  %v1502_v60 = vpop.permute.xlu0 %1501  ;;  %v322_v24 = vld [vmem:[#allocation2 + $0x78] sm:$0x1] }
  0xb0   : > { %810 = vst [vmem:[#allocation2 + $0x60] sm:$0xf] %v809_v33  ;;  %v2274_v38 = vor.u32 %v2273_v29, %v2269_v28  ;;  %v2750_v27 = vrot.slane %v2629_v9, 5  ;;  %v2753_v41 = vrot.slane %v2630_v21, 5  ;;  %v320_v47 = vsel %vm5120_vm3, 0, %v319_v10  ;;  %1002 = vst.msk [vmem:[#allocation3 + $0x10] sm:$0xff] %vm6747_vm15, %v5016_v44 }
  0xb1   : > { %1837 = vrot.lane.b32.xlu1 %v4742_v58, %s5061_s8  ;;  %v573_v48 = vshrl.u32 %v5562_v12, 16  ;;  %v576_v49 = vshll.u32 %v5562_v12, 16  ;;  %v581_v50 = vshrl.u32 %v5565_v13, 16  ;;  %v2265_v55 = vrot.slane %v2264_v3, 4  ;;  %321 = vst [vmem:[#allocation2 + $0x6c] sm:$0x1] %v320_v47 }
  0xb2   : > { %v2275_v22 = vrot.slane %v2274_v38, 4  ;;  %v2751_v56 = vsel %vm5199_vm13, %v4789_v36, %v2750_v27  ;;  %v2752_v57 = vrot.slane %v2750_v27, 4  ;;  %v584_v63 = vshll.u32 %v5565_v13, 16  ;;  %1003 = vst.msk [vmem:[#allocation3 + $0x18] sm:$0xff] %vm6747_vm15, %v5018_v40  ;;  %1004 = vst.msk [vmem:[#allocation3 + $0x20] sm:$0xff] %vm6747_vm15, %v5025_v51 }
  0xb3   : > { %v575_v58 = vrot.slane %v573_v48, 7  ;;  %v5590_v62 = vrot.slane %v581_v50, 7  ;;  %v376_v2 = vsel %vm5147_vm6, 0, %v375_v37  ;;  %v2270_v4 = vsel %vm5234_vm14, %v2265_v55, %v2269_v28  ;;  %v5601_v8 = vpop.permute.xlu1 %3591  ;;  %1548 = vst.msk [vmem:[#allocation3] sm:$0xff] %vm1547_vm1, %v5512_v25  ;;  %1549 = vst.msk [vmem:[#allocation3 + $0x8] sm:$0xff] %vm1547_vm1, %v1502_v60 }
  0xb4   : > { %v2280_v5 = vsel %vm5234_vm14, %v2275_v22, %v2279_v35  ;;  %v2754_v7 = vsel %vm5199_vm13, %v2752_v57, %v2753_v41  ;;  %377 = vst [vmem:[#allocation2 + $0x74] sm:$0x1] %v376_v2  ;;  %vm1871_vm2 = vcmask 97344   ;;  %v323_v48 = vsel %vm5120_vm3, 0, %v322_v24 }
  0xb5   : > { %v4773_v9 = vcombine.low %v2270_v4, %v2280_v5  ;;  %v812_v10 = vld [vmem:[#allocation2 + $0x68] sm:$0x1]  ;;  %v579_v12 = vrot.slane %v575_v58, 4  ;;  %v586_v15 = vor.u32 %v584_v63, %v5590_v62  ;;  %v588_v19 = vrot.slane %v5590_v62, 4  ;;  %1872 = vst.msk [vmem:[#allocation3] sm:$0xff] %vm1871_vm2, %v5489_v34  ;;  %1873 = vst.msk [vmem:[#allocation3 + $0x8] sm:$0xff] %vm1871_vm2, %v5531_v6 }
  0xb6   : > { %v813_v13 = vsel %vm5120_vm3, %v571_v18, %v812_v10  ;;  %v4805_v21 = vcombine.low %v2751_v56, %v2754_v7  ;;  %v2087_v26 = vld [vmem:[#allocation2 + $0x64] sm:$0xf]  ;;  %v578_v28 = vor.u32 %v576_v49, %v575_v58  ;;  %324 = vst [vmem:[#allocation2 + $0x78] sm:$0x1] %v323_v48  ;;  %vm6748_vm4 = vcmask 130144  }
  0xb7   : > { %v5009_v20 = vld [vmem:[#allocation2 + $0x60] sm:$0xff]   ;;  %2557 = vrot.lane.b32.xlu0 %v4773_v9, %s5066_s13  ;;  %814 = vst [vmem:[#allocation2 + $0x68] sm:$0x1] %v813_v13  ;;  %v587_v29 = vsel %vm5153_vm7, %v579_v12, %v586_v15  ;;  %v5623_v32 = vpop.permute.xlu0 %2545  ;;  %v2291_v35 = vshll.u32 %v2087_v26, 16  ;;  %v2295_v36 = vshrl.u32 %v2087_v26, 16  ;;  %vm2593_vm5 = vcmask 162944  }
  0xb8   : > { %v2086_v61 = vld [vmem:[#allocation2 + $0x60] sm:$0xf]  ;;  %2014 = vrot.lane.b32.xlu1 %v5009_v20, %s5060_s30  ;;  %v2632_v37 = vld [vmem:[#allocation2 + $0x64] sm:$0xf]  ;;  %818 = vst.msk [vmem:[#allocation2 + $0x70] sm:$0xf] %vm280_vm0, %v587_v29 }
  0xb9   : > { %v2631_v18 = vld [vmem:[#allocation2 + $0x60] sm:$0xe]  ;;  %v2282_v25 = vshrl.u32 %v2086_v61, 16  ;;  %v2285_v33 = vshll.u32 %v2086_v61, 16  ;;  %v2757_v3 = vrot.slane %v2632_v37, 5  ;;  %v2293_v34 = vrot.slane %v2291_v35, 5 }
  0xba   : > { %v4790_v39 = vrot.slane %v2631_v18, 9  ;;  %v2297_v43 = vrot.slane %v2295_v36, 4  ;;  %v5010_v6 = vld [vmem:[#allocation2 + $0x60] sm:$0xff]   ;;  %v815_v40 = vld [vmem:[#allocation2 + $0x6c] sm:$0xf]  ;;  %vm2914_vm8 = vcmask 195744  }
  0xbb   : > { %v1504_v38 = vpop.permute.xlu1 %1503  ;;  %v2284_v27 = vrot.slane %v2282_v25, 4  ;;  %v2287_v41 = vrot.slane %v2285_v33, 5  ;;  %2878 = vrot.lane.b32.xlu0 %v4805_v21, %s5064_s11  ;;  %v2759_v44 = vrot.slane %v2757_v3, 4  ;;  %v3127_v47 = vld [vmem:[#allocation2 + $0x60] sm:$0xf]  ;;  %v816_v51 = vsel %vm5161_vm9, %v578_v28, %v815_v40  ;;  %2050 = vst.msk [vmem:[#allocation3 + $0x8] sm:$0xff] %vm6748_vm4, %v5504_v53 }
  0xbc   : > { %1550 = vst.msk [vmem:[#allocation3 + $0x10] sm:$0xff] %vm1547_vm1, %v1504_v38  ;;  %v2298_v50 = vor.u32 %v2297_v43, %v2293_v34  ;;  %v3128_v54 = vld [vmem:[#allocation2 + $0x64] sm:$0xf]  ;;  %v3302_v55 = vshrl.u32 %v3127_v47, 16  ;;  %v819_v22 = vld [vmem:[#allocation2 + $0x74] sm:$0x1] }
  0xbd   : > { %v2288_v49 = vor.u32 %v2287_v41, %v2284_v27  ;;  %817 = vst [vmem:[#allocation2 + $0x6c] sm:$0xf] %v816_v51  ;;  %v820_v58 = vsel %vm5120_vm3, %v588_v19, %v819_v22  ;;  %v3305_v9 = vshll.u32 %v3127_v47, 16  ;;  %v3311_v10 = vshll.u32 %v3128_v54, 16  ;;  %v3672_v28 = vld [vmem:[#allocation2 + $0x60] sm:$0xe] }
  0xbe   : > { %v2088_v56 = vld [vmem:[#allocation2 + $0x68] sm:$0x1]  ;;  %v2299_v2 = vrot.slane %v2298_v50, 4  ;;  %821 = vst [vmem:[#allocation2 + $0x74] sm:$0x1] %v820_v58  ;;  %v3304_v7 = vrot.slane %v3302_v55, 4  ;;  %v2758_v19 = vsel %vm5199_vm13, %v4790_v39, %v2757_v3 }
  0xbf   : > { %v2633_v57 = vld [vmem:[#allocation2 + $0x68] sm:$0x1]  ;;  %v5635_v62 = vpop.permute.xlu0 %3589  ;;  %v2289_v63 = vrot.slane %v2288_v49, 4  ;;  %v2301_v4 = vshll.u32 %v2088_v56, 16  ;;  %3056 = vrot.lane.b32.xlu0 %v5010_v6, %s5062_s9  ;;  %v3315_v12 = vshrl.u32 %v3128_v54, 16  ;;  %v3307_v61 = vrot.slane %v3305_v9, 5 }
  0xc0   : > { %v3129_v60 = vld [vmem:[#allocation2 + $0x68] sm:$0x1]  ;;  %v2760_v5 = vrot.slane %v2633_v57, 5  ;;  %v3131_v21 = vld [vmem:[#allocation2 + $0x70] sm:$0xf]  ;;  %v3313_v26 = vrot.slane %v3311_v10, 5 }
  0xc1   : > { %v2294_v13 = vsel %vm5234_vm14, %v2289_v63, %v2293_v34  ;;  %v2303_v15 = vrot.slane %v2301_v4, 5  ;;  %v3321_v20 = vshll.u32 %v3129_v60, 16  ;;  %v3317_v18 = vrot.slane %v3315_v12, 4  ;;  %v3673_v38 = vld [vmem:[#allocation2 + $0x64] sm:$0xf]  ;;  %2049 = vst.msk [vmem:[#allocation3] sm:$0xff] %vm6748_vm4, %v5482_v16 }
  0xc2   : > { %v2761_v24 = vsel %vm5199_vm13, %v2759_v44, %v2760_v5  ;;  %v3335_v33 = vshll.u32 %v3131_v21, 16  ;;  %v3339_v35 = vshrl.u32 %v3131_v21, 16  ;;  %v3308_v37 = vor.u32 %v3307_v61, %v3304_v7  ;;  %v3674_v27 = vld [vmem:[#allocation2 + $0x68] sm:$0x1]  ;;  %v1040_v56 = vld [vmem:[#allocation2 + $0x60] sm:$0xf] }
  0xc3   : > { %v1828_v29 = vpop.permute.xlu0 %1827  ;;  %v2304_v25 = vsel %vm5234_vm14, %v2299_v2, %v2303_v15  ;;  %v3318_v39 = vor.u32 %v3317_v18, %v3313_v26  ;;  %v3323_v3 = vrot.slane %v3321_v20, 5  ;;  %v4806_v34 = vcombine.low %v2758_v19, %v2761_v24  ;;  %v1041_v2 = vld [vmem:[#allocation2 + $0x64] sm:$0xf]  ;;  %v1042_v4 = vld [vmem:[#allocation2 + $0x68] sm:$0x1]  ;;  %2595 = vst.msk [vmem:[#allocation3 + $0x8] sm:$0xff] %vm2593_vm5, %v5574_v30 }
  0xc4   : > { %1874 = vst.msk [vmem:[#allocation3 + $0x10] sm:$0xff] %vm1871_vm2, %v1828_v29  ;;  %v4774_v36 = vcombine.low %v2294_v13, %v2304_v25  ;;  %v3130_v43 = vld [vmem:[#allocation2 + $0x6c] sm:$0xf]  ;;  %v3337_v6 = vrot.slane %v3335_v33, 5  ;;  %v4853_v44 = vrot.slane %v3672_v28, 9  ;;  %v3309_v40 = vrot.slane %v3308_v37, 4 }
  0xc5   : > { %v1506_v41 = vpop.permute.xlu1 %1505  ;;  %v3319_v47 = vrot.slane %v3318_v39, 4  ;;  %v3132_v48 = vld [vmem:[#allocation2 + $0x74] sm:$0x1]  ;;  %v3326_v49 = vshrl.u32 %v3130_v43, 16  ;;  %v3329_v50 = vshll.u32 %v3130_v43, 16  ;;  %v3341_v51 = vrot.slane %v3339_v35, 4 }
  0xc6   : > { %1551 = vst.msk [vmem:[#allocation3 + $0x18] sm:$0xff] %vm1547_vm1, %v1506_v41  ;;  %2559 = vrot.lane.b32.xlu1 %v4774_v36, %s5066_s13  ;;  %v3345_v54 = vshll.u32 %v3132_v48, 16  ;;  %v3794_v55 = vrot.slane %v3673_v38, 5  ;;  %v3797_v22 = vrot.slane %v3674_v27, 5  ;;  %v3314_v57 = vsel %vm5234_vm14, %v3309_v40, %v3313_v26  ;;  %v5011_v15 = vld [vmem:[#allocation2 + $0x6c] sm:$0xff]  }
  0xc7   : > { %v3324_v60 = vsel %vm5234_vm14, %v3319_v47, %v3323_v3  ;;  %v3328_v58 = vrot.slane %v3326_v49, 4  ;;  %v3331_v63 = vrot.slane %v3329_v50, 5  ;;  %v3342_v9 = vor.u32 %v3341_v51, %v3337_v6  ;;  %v5656_v13 = vpop.permute.xlu0 %2004  ;;  %v3675_v61 = vld [vmem:[#allocation2 + $0x6c] sm:$0xe]  ;;  %v3676_v25 = vld [vmem:[#allocation2 + $0x70] sm:$0xf] }
  0xc8   : > { %v4837_v7 = vcombine.low %v3314_v57, %v3324_v60  ;;  %v3347_v10 = vrot.slane %v3345_v54, 5  ;;  %v3795_v12 = vsel %vm5199_vm13, %v4853_v44, %v3794_v55  ;;  %v3796_v20 = vrot.slane %v3794_v55, 4  ;;  %v3677_v39 = vld [vmem:[#allocation2 + $0x74] sm:$0x1]  ;;  %v1044_v43 = vld [vmem:[#allocation2 + $0x70] sm:$0xf] }
  0xc9   : > { %v1830_v5 = vpop.permute.xlu1 %1829  ;;  %v3332_v19 = vor.u32 %v3331_v63, %v3328_v58  ;;  %v1260_v21 = vshrl.u32 %v1040_v56, 16  ;;  %v1263_v24 = vshll.u32 %v1040_v56, 16  ;;  %v3343_v26 = vrot.slane %v3342_v9, 4  ;;  %v1045_v49 = vld [vmem:[#allocation2 + $0x74] sm:$0x1]  ;;  %2051 = vst.msk [vmem:[#allocation3 + $0x10] sm:$0xff] %vm6748_vm4, %v5656_v13 }
  0xca   : > { %1875 = vst.msk [vmem:[#allocation3 + $0x18] sm:$0xff] %vm1871_vm2, %v1830_v5  ;;  %2880 = vrot.lane.b32.xlu1 %v4806_v34, %s5064_s11  ;;  %3601 = vrot.lane.b32.xlu0 %v4837_v7, %s5067_s14  ;;  %v1269_v18 = vshll.u32 %v1041_v2, 16  ;;  %v1273_v28 = vshrl.u32 %v1041_v2, 16  ;;  %v1279_v29 = vshll.u32 %v1042_v4, 16  ;;  %v3798_v35 = vsel %vm5199_vm13, %v3796_v20, %v3797_v22  ;;  %v1043_v34 = vld [vmem:[#allocation2 + $0x6c] sm:$0xf] }
  0xcb   : > { %v3333_v33 = vrot.slane %v3332_v19, 4  ;;  %v1262_v36 = vrot.slane %v1260_v21, 4  ;;  %v1265_v37 = vrot.slane %v1263_v24, 5  ;;  %v3348_v3 = vsel %vm5234_vm14, %v3343_v26, %v3347_v10  ;;  %v1588_v22 = vld [vmem:[#allocation2 + $0x60] sm:$0xe]  ;;  %2594 = vst.msk [vmem:[#allocation3] sm:$0xff] %vm2593_vm5, %v5623_v32 }
  0xcc   : > { %v4869_v38 = vcombine.low %v3795_v12, %v3798_v35  ;;  %v1271_v27 = vrot.slane %v1269_v18, 5  ;;  %v1275_v41 = vrot.slane %v1273_v28, 4  ;;  %v1281_v47 = vrot.slane %v1279_v29, 5  ;;  %v1589_v2 = vld [vmem:[#allocation2 + $0x64] sm:$0xf]  ;;  %2916 = vst.msk [vmem:[#allocation3 + $0x8] sm:$0xff] %vm2914_vm8, %v5549_v45 }
  0xcd   : > { %v3338_v44 = vsel %vm5234_vm14, %v3333_v33, %v3337_v6  ;;  %v1266_v40 = vor.u32 %v1265_v37, %v1262_v36  ;;  %v4854_v48 = vrot.slane %v3675_v61, 9  ;;  %v3801_v54 = vrot.slane %v3676_v25, 5  ;;  %v1590_v9 = vld [vmem:[#allocation2 + $0x68] sm:$0x1]  ;;  %v1591_v20 = vld [vmem:[#allocation2 + $0x6c] sm:$0xe] }
  0xce   : > { %3058 = vrot.lane.b32.xlu1 %v5011_v15, %s5062_s9  ;;  %v4838_v50 = vcombine.low %v3338_v44, %v3348_v3  ;;  %3922 = vrot.lane.b32.xlu0 %v4869_v38, %s5065_s12  ;;  %v1276_v51 = vor.u32 %v1275_v41, %v1271_v27  ;;  %v3804_v55 = vrot.slane %v3677_v39, 5  ;;  %v1284_v60 = vshrl.u32 %v1043_v34, 16  ;;  %v1592_v18 = vld [vmem:[#allocation2 + $0x70] sm:$0xf]  ;;  %v1593_v28 = vld [vmem:[#allocation2 + $0x74] sm:$0x1] }
  0xcf   : > { %v1267_v57 = vrot.slane %v1266_v40, 4  ;;  %v1287_v58 = vshll.u32 %v1043_v34, 16  ;;  %v1293_v63 = vshll.u32 %v1044_v43, 16  ;;  %v3802_v6 = vsel %vm5199_vm13, %v4854_v48, %v3801_v54  ;;  %v420_v37 = vld [vmem:[%s5140_s29 + $0x48] sm:$0xf]  ;;  %2915 = vst.msk [vmem:[#allocation3] sm:$0xff] %vm2914_vm8, %v5524_v52 }
  0xd0   : > { %v5668_v56 = vpop.permute.xlu0 %2549  ;;  %v1277_v4 = vrot.slane %v1276_v51, 4  ;;  %v3803_v5 = vrot.slane %v3801_v54, 4  ;;  %v1297_v7 = vshrl.u32 %v1044_v43, 16  ;;  %v1286_v12 = vrot.slane %v1284_v60, 4  ;;  %v421_v41 = vld [vmem:[%s5140_s29 + $0x4c] sm:$0xf]  ;;  %v2007_v54 = vpop.permute.xlu1 %2006 }
  0xd1   : > { %v1272_v10 = vsel %vm5234_vm14, %v1267_v57, %v1271_v27  ;;  %v1289_v15 = vrot.slane %v1287_v58, 5  ;;  %v1295_v19 = vrot.slane %v1293_v63, 5  ;;  %v1303_v26 = vshll.u32 %v1045_v49, 16  ;;  %v822_v58 = vld [vmem:[#allocation2 + $0x78] sm:$0xf]  ;;  %2052 = vst.msk [vmem:[#allocation3 + $0x18] sm:$0xff] %vm6748_vm4, %v2007_v54 }
  0xd2   : > { %3603 = vrot.lane.b32.xlu1 %v4838_v50, %s5067_s14  ;;  %v1282_v21 = vsel %vm5234_vm14, %v1277_v4, %v1281_v47  ;;  %v3805_v24 = vsel %vm5199_vm13, %v3803_v5, %v3804_v55  ;;  %v1299_v61 = vrot.slane %v1297_v7, 4  ;;  %v4727_v36 = vrot.slane %v1588_v22, 9  ;;  %v5031_v47 = vld [vmem:[#allocation2 + $0x48] sm:$0xff]   ;;  %2596 = vst.msk [vmem:[#allocation3 + $0x10] sm:$0xff] %vm2593_vm5, %v5668_v56  ;;  %v2636_v32 = vld [vmem:[#allocation2 + $0x74] sm:$0x1] }
  0xd3   : > { %v4711_v25 = vcombine.low %v1272_v10, %v1282_v21  ;;  %v4870_v33 = vcombine.low %v3802_v6, %v3805_v24  ;;  %v1290_v35 = vor.u32 %v1289_v15, %v1286_v12  ;;  %v1305_v3 = vrot.slane %v1303_v26, 5  ;;  %1006 = vst.msk [vmem:[#allocation3 + $0x30] sm:$0xff] %vm6747_vm15, %v5031_v47  ;;  %v2089_v5 = vld [vmem:[#allocation2 + $0x6c] sm:$0xf]  ;;  %v2090_v26 = vld [vmem:[#allocation2 + $0x70] sm:$0xf] }
  0xd4   : > { %v5679_v29 = vpop.permute.xlu0 %2870  ;;  %v1300_v39 = vor.u32 %v1299_v61, %v1295_v19  ;;  %v1721_v38 = vrot.slane %v1589_v2, 5  ;;  %v1724_v27 = vrot.slane %v1590_v9, 5  ;;  %v4728_v43 = vrot.slane %v1591_v20, 9  ;;  %v5032_v20 = vld [vmem:[#allocation2 + $0x54] sm:$0xff]  }
  0xd5   : > { %3924 = vrot.lane.b32.xlu0 %v4870_v33, %s5065_s12  ;;  %v1291_v34 = vrot.slane %v1290_v35, 4  ;;  %v1728_v44 = vrot.slane %v1592_v18, 5  ;;  %v1731_v40 = vrot.slane %v1593_v28, 5  ;;  %v590_v51 = vshrl.u32 %v420_v37, 16  ;;  %v5013_v28 = vld [vmem:[#allocation2 + $0x6c] sm:$0xff]   ;;  %1007 = vst.msk [vmem:[#allocation3 + $0x38] sm:$0xff] %vm6747_vm15, %v5032_v20 }
  0xd6   : > { %1515 = vrot.lane.b32.xlu1 %v4711_v25, %s5063_s10  ;;  %v1301_v48 = vrot.slane %v1300_v39, 4  ;;  %v1722_v49 = vsel %vm5199_vm13, %v4727_v36, %v1721_v38  ;;  %v1723_v50 = vrot.slane %v1721_v38, 4  ;;  %v593_v60 = vshll.u32 %v420_v37, 16  ;;  %v2091_v25 = vld [vmem:[#allocation2 + $0x74] sm:$0x1]  ;;  %2917 = vst.msk [vmem:[#allocation3 + $0x10] sm:$0xff] %vm2914_vm8, %v5679_v29 }
  0xd7   : > { %v1296_v55 = vsel %vm5234_vm14, %v1291_v34, %v1295_v19  ;;  %v1729_v22 = vsel %vm5199_vm13, %v4728_v43, %v1728_v44  ;;  %v1730_v57 = vrot.slane %v1728_v44, 4  ;;  %v592_v4 = vrot.slane %v590_v51, 7  ;;  %v378_v19 = vld [vmem:[#allocation2 + $0x80] sm:$0x1]  ;;  %v5712_v36 = vld [vmem:[#allocation2 + $0x6c] sm:$0xe] }
  0xd8   : > { %v1306_v63 = vsel %vm5234_vm14, %v1301_v48, %v1305_v3  ;;  %v1725_v2 = vsel %vm5199_vm13, %v1723_v50, %v1724_v27  ;;  %v598_v6 = vshrl.u32 %v421_v41, 16  ;;  %v5696_v7 = vpop.permute.xlu0 %3048  ;;  %v601_v15 = vshll.u32 %v421_v41, 16  ;;  %v325_v37 = vld [vmem:[#allocation2 + $0x84] sm:$0x1]  ;;  %v5715_v39 = vld [vmem:[%s5140_s29 + $0x50] sm:$0xf] }
  0xd9   : > { %v4712_v9 = vcombine.low %v1296_v55, %v1306_v63  ;;  %v4743_v10 = vcombine.low %v1722_v49, %v1725_v2  ;;  %v1732_v12 = vsel %vm5199_vm13, %v1730_v57, %v1731_v40  ;;  %v595_v21 = vor.u32 %v593_v60, %v592_v4  ;;  %v2635_v27 = vld [vmem:[#allocation2 + $0x70] sm:$0xf]  ;;  %v423_v29 = vld [vmem:[%s5140_s29 + $0x54] sm:$0xf] }
  0xda   : > { %v596_v24 = vrot.slane %v592_v4, 4  ;;  %v5700_v61 = vrot.slane %v598_v6, 7  ;;  %v4744_v18 = vcombine.low %v1729_v22, %v1732_v12  ;;  %vm6749_vm10 = vcmask 228544   ;;  %v5738_v56 = vld [vmem:[%s6740_s1 + $0x10] ss:$0 sps:$4 sm:$0x33]  }
  0xdb   : > { %1517 = vrot.lane.b32.xlu1 %v4712_v9, %s5063_s10  ;;  %1839 = vrot.lane.b32.xlu0 %v4743_v10, %s5061_s8  ;;  %v823_v35 = vsel %vm5161_vm9, %v595_v21, %v822_v58  ;;  %vm3637_vm11 = vcmask 261344   ;;  %vm3958_vm12 = vcmask 294144   ;;  %v2306_v53 = vshrl.u32 %v2089_v5, 16  ;;  %3094 = vst.msk [vmem:[#allocation3 + $0x8] sm:$0xff] %vm6749_vm10, %v5514_v31  ;;  %3093 = vst.msk [vmem:[#allocation3] sm:$0xff] %vm6749_vm10, %v5498_v46 }
  0xdc   : > { %v603_v33 = vor.u32 %v601_v15, %v5700_v61  ;;  %824 = vst [vmem:[#allocation2 + $0x78] sm:$0xf] %v823_v35  ;;  %v2309_v16 = vshll.u32 %v2089_v5, 16  ;;  %v2315_v38 = vshll.u32 %v2090_v26, 16  ;;  %v2319_v41 = vshrl.u32 %v2090_v26, 16  ;;  %3095 = vst.msk [vmem:[#allocation3 + $0x10] sm:$0xff] %vm6749_vm10, %v5696_v7 }
  0xdd   : > { %v2325_v30 = vshll.u32 %v2091_v25, 16  ;;  %v379_v34 = vsel %vm5147_vm6, 0, %v378_v19  ;;  %v605_v45 = vrot.slane %v5700_v61, 4  ;;  %v2308_v52 = vrot.slane %v2306_v53, 4  ;;  %3639 = vst.msk [vmem:[#allocation3 + $0x8] sm:$0xff] %vm3637_vm11, %v5601_v8  ;;  %3638 = vst.msk [vmem:[#allocation3] sm:$0xff] %vm3637_vm11, %v5635_v62 }
  0xde   : > { %v2552_v3 = vpop.permute.xlu1 %2551  ;;  %v604_v13 = vsel %vm5153_vm7, %v596_v24, %v603_v33  ;;  %v2311_v44 = vrot.slane %v2309_v16, 5  ;;  %v2317_v40 = vrot.slane %v2315_v38, 5  ;;  %380 = vst [vmem:[#allocation2 + $0x80] sm:$0x1] %v379_v34  ;;  %v2321_v47 = vrot.slane %v2319_v41, 4  ;;  %3960 = vst.msk [vmem:[#allocation3 + $0x8] sm:$0xff] %vm3958_vm12, %v5567_v14 }
  0xdf   : > { %2597 = vst.msk [vmem:[#allocation3 + $0x18] sm:$0xff] %vm2593_vm5, %v2552_v3  ;;  %1841 = vrot.lane.b32.xlu1 %v4744_v18, %s5061_s8  ;;  %2016 = vrot.lane.b32.xlu0 %v5013_v28, %s5060_s30  ;;  %v2327_v48 = vrot.slane %v2325_v30, 5  ;;  %v4791_v49 = vrot.slane %v5712_v36, 9  ;;  %v2764_v50 = vrot.slane %v2635_v27, 5  ;;  %v2767_v51 = vrot.slane %v2636_v32, 5 }
  0xe0   : > { %v3594_v43 = vpop.permute.xlu0 %3593  ;;  %825 = vst.msk [vmem:[#allocation2 + $0x7c] sm:$0xf] %vm280_vm0, %v604_v13  ;;  %v2312_v46 = vor.u32 %v2311_v44, %v2308_v52  ;;  %v326_v8 = vsel %vm5120_vm3, 0, %v325_v37  ;;  %v607_v54 = vshrl.u32 %v5715_v39, 16  ;;  %v2322_v55 = vor.u32 %v2321_v47, %v2317_v40  ;;  %v381_v3 = vld [vmem:[#allocation2 + $0x8c] sm:$0x1] }
  0xe1   : > { %3640 = vst.msk [vmem:[#allocation3 + $0x10] sm:$0xff] %vm3637_vm11, %v3594_v43  ;;  %v2766_v62 = vrot.slane %v2764_v50, 4  ;;  %327 = vst [vmem:[#allocation2 + $0x84] sm:$0x1] %v326_v8  ;;  %v610_v22 = vshll.u32 %v5715_v39, 16  ;;  %v615_v57 = vshrl.u32 %v423_v29, 16  ;;  %v2765_v10 = vsel %vm5199_vm13, %v4791_v49, %v2764_v50 }
  0xe2   : > { %v2873_v31 = vpop.permute.xlu1 %2872  ;;  %3959 = vst.msk [vmem:[#allocation3] sm:$0xff] %vm3958_vm12, %v5541_v59  ;;  %v2313_v14 = vrot.slane %v2312_v46, 4  ;;  %v609_v58 = vrot.slane %v607_v54, 7  ;;  %v618_v63 = vshll.u32 %v423_v29, 16  ;;  %vm4060_vm15 = vcmask 1041408  }
  0xe3   : > { %2918 = vst.msk [vmem:[#allocation3 + $0x18] sm:$0xff] %vm2914_vm8, %v2873_v31  ;;  %v2323_v59 = vrot.slane %v2322_v55, 4  ;;  %v2092_v2 = vld [vmem:[#allocation2 + $0x78] sm:$0xf]  ;;  %v5769_v4 = vrot.slane %v615_v57, 7  ;;  %4975 = vmatprep.subr.msk.bf16.mxu0 %vm4060_vm15, %v5738_v56  ;;  %4976 = vmatprep.subr.msk.bf16.mxu1 %vm4060_vm15, %v5738_v56  ;;  %v2768_v21 = vsel %vm5199_vm13, %v2766_v62, %v2767_v51  ;;  %v382_v55 = vsel %vm5147_vm6, 0, %v381_v3 }
  0xe4   : > { %v3915_v60 = vpop.permute.xlu0 %3914  ;;  %v2318_v5 = vsel %vm5234_vm14, %v2313_v14, %v2317_v40  ;;  %v2330_v7 = vshrl.u32 %v2092_v2, 16  ;;  %v2333_v9 = vshll.u32 %v2092_v2, 16  ;;  %v5779_v12 = vld [vmem:[#allocation2 + $0x78] sm:$0xe]  ;;  %v612_v24 = vor.u32 %v610_v22, %v609_v58  ;;  %383 = vst [vmem:[#allocation2 + $0x8c] sm:$0x1] %v382_v55 }
  0xe5   : > { %3961 = vst.msk [vmem:[#allocation3 + $0x10] sm:$0xff] %vm3958_vm12, %v3915_v60  ;;  %v2328_v19 = vsel %vm5234_vm14, %v2323_v59, %v2327_v48  ;;  %v826_v20 = vld [vmem:[#allocation2 + $0x80] sm:$0x1]  ;;  %v620_v61 = vor.u32 %v618_v63, %v5769_v4  ;;  %v4807_v27 = vcombine.low %v2765_v10, %v2768_v21  ;;  %v613_v13 = vrot.slane %v609_v58, 4  ;;  %v3133_v30 = vld [vmem:[#allocation2 + $0x78] sm:$0xf] }
  0xe6   : > { %v3051_v6 = vpop.permute.xlu1 %3050  ;;  %v4775_v26 = vcombine.low %v2318_v5, %v2328_v19  ;;  %v827_v18 = vsel %vm5120_vm3, %v605_v45, %v826_v20  ;;  %v2332_v25 = vrot.slane %v2330_v7, 4  ;;  %v2335_v33 = vrot.slane %v2333_v9, 5  ;;  %v3678_v22 = vld [vmem:[#allocation2 + $0x78] sm:$0xe] }
  0xe7   : > { %3096 = vst.msk [vmem:[#allocation3 + $0x18] sm:$0xff] %vm6749_vm10, %v3051_v6  ;;  %v5014_v15 = vld [vmem:[#allocation2 + $0x78] sm:$0xff]   ;;  %828 = vst [vmem:[#allocation2 + $0x80] sm:$0x1] %v827_v18  ;;  %v4792_v43 = vrot.slane %v5779_v12, 9  ;;  %v622_v45 = vrot.slane %v5769_v4, 4  ;;  %v621_v40 = vsel %vm5153_vm7, %v613_v13, %v620_v61 }
  0xe8   : > { %v2093_v28 = vld [vmem:[#allocation2 + $0x7c] sm:$0xf]  ;;  %2018 = vrot.lane.b32.xlu1 %v5014_v15, %s5060_s30  ;;  %2561 = vrot.lane.b32.xlu0 %v4775_v26, %s5066_s13  ;;  %v2336_v38 = vor.u32 %v2335_v33, %v2332_v25  ;;  %v829_v41 = vld [vmem:[#allocation2 + $0x84] sm:$0xf]  ;;  %v3350_v47 = vshrl.u32 %v3133_v30, 16  ;;  %v3353_v50 = vshll.u32 %v3133_v30, 16 }
  0xe9   : > { %v2638_v35 = vld [vmem:[#allocation2 + $0x7c] sm:$0xf]  ;;  %v2339_v36 = vshll.u32 %v2093_v28, 16  ;;  %v2343_v37 = vshrl.u32 %v2093_v28, 16  ;;  %v830_v29 = vsel %vm5161_vm9, %v612_v24, %v829_v41  ;;  %832 = vst.msk [vmem:[#allocation2 + $0x88] sm:$0xf] %vm280_vm0, %v621_v40 }
  0xea   : > { %v2771_v39 = vrot.slane %v2638_v35, 5  ;;  %v3596_v53 = vpop.permute.xlu1 %3595  ;;  %v3917_v16 = vpop.permute.xlu0 %3916  ;;  %v3134_v52 = vld [vmem:[#allocation2 + $0x7c] sm:$0xf]  ;;  %831 = vst [vmem:[#allocation2 + $0x84] sm:$0xf] %v830_v29  ;;  %v2337_v8 = vrot.slane %v2336_v38, 4 }
  0xeb   : > { %3641 = vst.msk [vmem:[#allocation3 + $0x18] sm:$0xff] %vm3637_vm11, %v3596_v53  ;;  %v5792_v34 = vrot.slane %v2339_v36, 5  ;;  %v2345_v32 = vrot.slane %v2343_v37, 4  ;;  %v5019_v49 = vld [vmem:[#allocation2 + $0x78] sm:$0xff]   ;;  %v3359_v31 = vshll.u32 %v3134_v52, 16  ;;  %v3363_v46 = vshrl.u32 %v3134_v52, 16 }
  0xec   : > { %3962 = vst.msk [vmem:[#allocation3 + $0x18] sm:$0xff] %vm3958_vm12, %v3917_v16  ;;  %v2773_v44 = vrot.slane %v2771_v39, 4  ;;  %2882 = vrot.lane.b32.xlu0 %v4807_v27, %s5064_s11  ;;  %v3352_v54 = vrot.slane %v3350_v47, 4  ;;  %v4062_v62 = vsel %vm4060_vm15, %v5738_v56, 0  ;;  %v3355_v60 = vrot.slane %v3353_v50, 5  ;;  %v3975_v26 = vld [vmem:[#allocation3] sm:$0xff] }
  0xed   : > { %v2346_v48 = vor.u32 %v2345_v32, %v5792_v34  ;;  %v3361_v14 = vrot.slane %v3359_v31, 5  ;;  %v3365_v58 = vrot.slane %v3363_v46, 4  ;;  %4931 = vmatpush3.bf16.msra.mxu0 %v4062_v62  ;;  %v3679_v63 = vld [vmem:[#allocation2 + $0x7c] sm:$0xf]  ;;  %4974 = vmatpush3.bf16.msra.mxu1 %v4062_v62  ;;  %v5811_v6 = vsel %vm5199_vm13, %v4792_v43, %v2771_v39  ;;  %v1046_v35 = vld [vmem:[#allocation2 + $0x78] sm:$0xf] }
  0xee   : > { %v1508_v51 = vpop.permute.xlu1 %1507  ;;  %v2094_v59 = vld [vmem:[#allocation2 + $0x80] sm:$0x1]  ;;  %v3356_v10 = vor.u32 %v3355_v60, %v3352_v54  ;;  %v2342_v20 = vsel %vm5234_vm14, %v2337_v8, %v5792_v34  ;;  %v4855_v24 = vrot.slane %v3678_v22, 9  ;;  %v3808_v61 = vrot.slane %v3679_v63, 5  ;;  %v3977_v36 = vld [vmem:[#allocation3 + $0x10] sm:$0xff] }
  0xef   : > { %1552 = vst.msk [vmem:[#allocation3 + $0x20] sm:$0xff] %vm1547_vm1, %v1508_v51  ;;  %v2347_v57 = vrot.slane %v2346_v48, 4  ;;  %v2639_v2 = vld [vmem:[#allocation2 + $0x80] sm:$0x1]  ;;  %v2349_v56 = vshll.u32 %v2094_v59, 16  ;;  %v3366_v12 = vor.u32 %v3365_v58, %v3361_v14  ;;  %vm4011_vm15 = vcmask 293888  }
  0xf0   : > { %v3135_v5 = vld [vmem:[#allocation2 + $0x80] sm:$0x1]  ;;  %v2774_v9 = vrot.slane %v2639_v2, 5  ;;  %3060 = vrot.lane.b32.xlu0 %v5019_v49, %s5062_s9  ;;  %v3357_v25 = vrot.slane %v3356_v10, 4  ;;  %v3809_v3 = vsel %vm5199_vm13, %v4855_v24, %v3808_v61  ;;  %v3137_v41 = vld [vmem:[#allocation2 + $0x88] sm:$0xf]  ;;  %4932 = vmatprep.mubr.msk.bf16.mxu0 %vm4011_vm15, %v3975_v26 }
  0xf1   : > { %v1832_v7 = vpop.permute.xlu0 %1831  ;;  %v3680_v15 = vld [vmem:[#allocation2 + $0x80] sm:$0x1]  ;;  %v3369_v21 = vshll.u32 %v3135_v5, 16  ;;  %v2351_v18 = vrot.slane %v2349_v56, 5  ;;  %v3367_v33 = vrot.slane %v3366_v12, 4  ;;  %v3810_v30 = vrot.slane %v3808_v61, 4 }
  0xf2   : > { %v1510_v19 = vpop.permute.xlu1 %1509  ;;  %1876 = vst.msk [vmem:[#allocation3 + $0x20] sm:$0xff] %vm1871_vm2, %v1832_v7  ;;  %v2775_v28 = vsel %vm5199_vm13, %v2773_v44, %v2774_v9  ;;  %v3811_v53 = vrot.slane %v3680_v15, 5  ;;  %v3362_v27 = vsel %vm5234_vm14, %v3357_v25, %v3361_v14  ;;  %v3136_v13 = vld [vmem:[#allocation2 + $0x84] sm:$0xf]  ;;  %v833_v52 = vld [vmem:[#allocation2 + $0x8c] sm:$0x1] }
  0xf3   : > { %1553 = vst.msk [vmem:[#allocation3 + $0x28] sm:$0xff] %vm1547_vm1, %v1510_v19  ;;  %v4808_v37 = vcombine.low %v5811_v6, %v2775_v28  ;;  %v3371_v39 = vrot.slane %v3369_v21, 5  ;;  %v2352_v38 = vsel %vm5234_vm14, %v2347_v57, %v2351_v18  ;;  %v3374_v44 = vshrl.u32 %v3136_v13, 16  ;;  %v3976_v29 = vld [vmem:[#allocation3 + $0x8] sm:$0xff]  ;;  %v1047_v31 = vld [vmem:[#allocation2 + $0x7c] sm:$0xf] }
  0xf4   : > { %v4776_v32 = vcombine.low %v2342_v20, %v2352_v38  ;;  %v3377_v40 = vshll.u32 %v3136_v13, 16  ;;  %v834_v48 = vsel %vm5120_vm3, %v622_v45, %v833_v52  ;;  %v3383_v49 = vshll.u32 %v3137_v41, 16  ;;  %v1048_v46 = vld [vmem:[#allocation2 + $0x80] sm:$0x1]  ;;  %4933 = vmatmul.mubr.msk.bf16.vlgmr.msra.gmra.mrb[0].mxu0 %vm4011_vm15, %v3976_v29  ;;  %v3681_v62 = vld [vmem:[#allocation2 + $0x84] sm:$0xe] }
  0xf5   : > { %v2009_v16 = vpop.permute.xlu0 %2008  ;;  %v3372_v43 = vsel %vm5234_vm14, %v3367_v33, %v3371_v39  ;;  %v3387_v50 = vshrl.u32 %v3137_v41, 16  ;;  %835 = vst [vmem:[#allocation2 + $0x8c] sm:$0x1] %v834_v48  ;;  %v3376_v51 = vrot.slane %v3374_v44, 4  ;;  %v3812_v54 = vsel %vm5199_vm13, %v3810_v30, %v3811_v53  ;;  %4936 = vmatprep.mubr.msk.bf16.mxu0 %vm4011_vm15, %v3977_v36  ;;  %v3682_v60 = vld [vmem:[#allocation2 + $0x88] sm:$0xf] }
  0xf6   : > { %v1834_v34 = vpop.permute.xlu1 %1833  ;;  %2053 = vst.msk [vmem:[#allocation3 + $0x20] sm:$0xff] %vm6748_vm4, %v2009_v16  ;;  %v4839_v47 = vcombine.low %v3362_v27, %v3372_v43  ;;  %2563 = vrot.lane.b32.xlu1 %v4776_v32, %s5066_s13  ;;  %v3379_v8 = vrot.slane %v3377_v40, 5  ;;  %v1308_v55 = vshrl.u32 %v1046_v35, 16  ;;  %v5843_v4 = vrot.slane %v3383_v49, 5  ;;  %v1049_v2 = vld [vmem:[#allocation2 + $0x84] sm:$0xf] }
  0xf7   : > { %1877 = vst.msk [vmem:[#allocation3 + $0x28] sm:$0xff] %vm1871_vm2, %v1834_v34  ;;  %v3389_v45 = vrot.slane %v3387_v50, 4  ;;  %v4871_v22 = vcombine.low %v3809_v3, %v3812_v54  ;;  %v1311_v57 = vshll.u32 %v1046_v35, 16  ;;  %v1317_v63 = vshll.u32 %v1047_v31, 16  ;;  %v3978_v6 = vld [vmem:[#allocation3 + $0x18] sm:$0xff]  ;;  %v5021_v5 = vld [vmem:[#allocation2 + $0x84] sm:$0xff]  }
  0xf8   : > { %3605 = vrot.lane.b32.xlu0 %v4839_v47, %s5067_s14  ;;  %v3380_v14 = vor.u32 %v3379_v8, %v3376_v51  ;;  %v1310_v58 = vrot.slane %v1308_v55, 4  ;;  %v1321_v59 = vshrl.u32 %v1047_v31, 16  ;;  %v1327_v9 = vshll.u32 %v1048_v46, 16  ;;  %v1050_v35 = vld [vmem:[#allocation2 + $0x88] sm:$0xf] }
  0xf9   : > { %v3390_v7 = vor.u32 %v3389_v45, %v5843_v4  ;;  %v1313_v56 = vrot.slane %v1311_v57, 5  ;;  %v4856_v10 = vrot.slane %v3681_v62, 9  ;;  %v1319_v15 = vrot.slane %v1317_v63, 5  ;;  %v1594_v38 = vld [vmem:[#allocation2 + $0x78] sm:$0xe] }
  0xfa   : > { %2884 = vrot.lane.b32.xlu1 %v4808_v37, %s5064_s11  ;;  %v3381_v12 = vrot.slane %v3380_v14, 4  ;;  %v1323_v19 = vrot.slane %v1321_v59, 4  ;;  %v3815_v20 = vrot.slane %v3682_v60, 5  ;;  %v1332_v61 = vshrl.u32 %v1049_v2, 16  ;;  %v1595_v29 = vld [vmem:[#allocation2 + $0x7c] sm:$0xf] }
  0xfb   : > { %v1314_v24 = vor.u32 %v1313_v56, %v1310_v58  ;;  %v3391_v18 = vrot.slane %v3390_v7, 4  ;;  %v1329_v25 = vrot.slane %v1327_v9, 5  ;;  %v1335_v34 = vshll.u32 %v1049_v2, 16  ;;  %v1596_v31 = vld [vmem:[#allocation2 + $0x80] sm:$0x1] }
  0xfc   : > { %v2554_v21 = vpop.permute.xlu0 %2553  ;;  %3926 = vrot.lane.b32.xlu0 %v4871_v22, %s5065_s12  ;;  %v1324_v28 = vor.u32 %v1323_v19, %v1319_v15  ;;  %v3817_v33 = vrot.slane %v3815_v20, 4  ;;  %v3138_v36 = vld [vmem:[#allocation2 + $0x8c] sm:$0x1]  ;;  %v3386_v37 = vsel %vm5234_vm14, %v3381_v12, %v5843_v4  ;;  %v3816_v53 = vsel %vm5199_vm13, %v4856_v10, %v3815_v20  ;;  %4937 = vmatmul.mubr.msk.bf16.gmra.mrb[4].mxu0 %vm4011_vm15, %v3978_v6  ;;  %v1597_v46 = vld [vmem:[#allocation2 + $0x84] sm:$0xe] }
  0xfd   : > { %v2011_v26 = vpop.permute.xlu1 %2010  ;;  %2598 = vst.msk [vmem:[#allocation3 + $0x20] sm:$0xff] %vm2593_vm5, %v2554_v21  ;;  %v1315_v39 = vrot.slane %v1314_v24, 4  ;;  %v3683_v3 = vld [vmem:[#allocation2 + $0x8c] sm:$0x1]  ;;  %v1334_v16 = vrot.slane %v1332_v61, 4  ;;  %v3393_v27 = vshll.u32 %v3138_v36, 16 }
  0xfe   : > { %2054 = vst.msk [vmem:[#allocation3 + $0x28] sm:$0xff] %vm6748_vm4, %v2011_v26  ;;  %3062 = vrot.lane.b32.xlu1 %v5021_v5, %s5062_s9  ;;  %v1325_v13 = vrot.slane %v1324_v28, 4  ;;  %v3818_v41 = vrot.slane %v3683_v3, 5  ;;  %v1051_v30 = vld [vmem:[#allocation2 + $0x8c] sm:$0x1]  ;;  %v1341_v52 = vshll.u32 %v1050_v35, 16 }
  0xff   : > { %v1320_v43 = vsel %vm5234_vm14, %v1315_v39, %v1319_v15  ;;  %v1345_v44 = vshrl.u32 %v1050_v35, 16  ;;  %v1351_v40 = vshll.u32 %v1051_v30, 16  ;;  %v3395_v47 = vrot.slane %v3393_v27, 5  ;;  %v1598_v62 = vld [vmem:[#allocation2 + $0x88] sm:$0xf]  ;;  %v5037_v56 = vld [vmem:[#allocation2 + $0x60] sm:$0xff]  }
 0x100   : > { %v2875_v32 = vpop.permute.xlu0 %2874  ;;  %v1330_v48 = vsel %vm5234_vm14, %v1325_v13, %v1329_v25  ;;  %v3819_v49 = vsel %vm5199_vm13, %v3817_v33, %v3818_v41  ;;  %v1337_v50 = vrot.slane %v1335_v34, 5  ;;  %v1343_v54 = vrot.slane %v1341_v52, 5  ;;  %v1599_v4 = vld [vmem:[#allocation2 + $0x8c] sm:$0x1]  ;;  %v328_v14 = vld [vmem:[#allocation2 + $0x90] sm:$0x1] }
 0x101   : > { %2919 = vst.msk [vmem:[#allocation3 + $0x20] sm:$0xff] %vm2914_vm8, %v2875_v32  ;;  %v4713_v51 = vcombine.low %v1320_v43, %v1330_v48  ;;  %v4872_v8 = vcombine.low %v3816_v53, %v3819_v49  ;;  %v1347_v55 = vrot.slane %v1345_v44, 4  ;;  %v3396_v45 = vsel %vm5234_vm14, %v3391_v18, %v3395_v47  ;;  %v424_v58 = vld [vmem:[%s5140_s29 + $0x58] sm:$0xf]  ;;  %v425_v7 = vld [vmem:[%s5140_s29 + $0x5c] sm:$0xf] }
 0x102   : > { %v1338_v22 = vor.u32 %v1337_v50, %v1334_v16  ;;  %v1353_v57 = vrot.slane %v1351_v40, 5  ;;  %v4729_v60 = vrot.slane %v1594_v38, 9  ;;  %v4840_v59 = vcombine.low %v3386_v37, %v3396_v45  ;;  %v2095_v19 = vld [vmem:[#allocation2 + $0x84] sm:$0xf]  ;;  %v2096_v26 = vld [vmem:[#allocation2 + $0x88] sm:$0xf] }
 0x103   : > { %3928 = vrot.lane.b32.xlu0 %v4872_v8, %s5065_s12  ;;  %v1348_v2 = vor.u32 %v1347_v55, %v1343_v54  ;;  %v1735_v6 = vrot.slane %v1595_v29, 5  ;;  %v1738_v5 = vrot.slane %v1596_v31, 5  ;;  %v4730_v10 = vrot.slane %v1597_v46, 9  ;;  %v5038_v33 = vld [vmem:[#allocation2 + $0x6c] sm:$0xff]   ;;  %v384_v3 = vld [vmem:[#allocation2 + $0x98] sm:$0x1] }
 0x104   : > { %v3053_v63 = vpop.permute.xlu0 %3052  ;;  %v1339_v9 = vrot.slane %v1338_v22, 4  ;;  %v1742_v12 = vrot.slane %v1598_v62, 5  ;;  %v1745_v15 = vrot.slane %v1599_v4, 5  ;;  %3607 = vrot.lane.b32.xlu1 %v4840_v59, %s5067_s14  ;;  %v329_v61 = vsel %vm5120_vm3, 0, %v328_v14  ;;  %v5888_v13 = vld [vmem:[#allocation2 + $0x84] sm:$0xe] }
 0x105   : > { %3097 = vst.msk [vmem:[#allocation3 + $0x20] sm:$0xff] %vm6749_vm10, %v3053_v63  ;;  %v1349_v20 = vrot.slane %v1348_v2, 4  ;;  %v1736_v21 = vsel %vm5199_vm13, %v4729_v60, %v1735_v6  ;;  %v1737_v24 = vrot.slane %v1735_v6, 4  ;;  %vm6762_vm4 = vcmask 31744   ;;  %330 = vst [vmem:[#allocation2 + $0x90] sm:$0x1] %v329_v61 }
 0x106   : > { %1008 = vst.msk [vmem:[#allocation3 + $0x40] sm:$0xff] %vm6762_vm4, %v5037_v56  ;;  %v1344_v18 = vsel %vm5234_vm14, %v1339_v9, %v1343_v54  ;;  %v1744_v28 = vrot.slane %v1742_v12, 4  ;;  %v624_v25 = vshrl.u32 %v424_v58, 16  ;;  %v627_v37 = vshll.u32 %v424_v58, 16  ;;  %1009 = vst.msk [vmem:[#allocation3 + $0x48] sm:$0xff] %vm6762_vm4, %v5038_v33  ;;  %v5023_v40 = vld [vmem:[#allocation2 + $0x84] sm:$0xff]  }
 0x107   : > { %v1354_v35 = vsel %vm5234_vm14, %v1349_v20, %v1353_v57  ;;  %v1739_v36 = vsel %vm5199_vm13, %v1737_v24, %v1738_v5  ;;  %v632_v39 = vshrl.u32 %v425_v7, 16  ;;  %v5884_v16 = vsel %vm5199_vm13, %v4730_v10, %v1742_v12  ;;  %v2097_v32 = vld [vmem:[#allocation2 + $0x8c] sm:$0x1]  ;;  %v2641_v50 = vld [vmem:[#allocation2 + $0x88] sm:$0xf] }
 0x108   : > { %v4745_v53 = vcombine.low %v1736_v21, %v1739_v36  ;;  %v1746_v38 = vsel %vm5199_vm13, %v1744_v28, %v1745_v15  ;;  %v626_v27 = vrot.slane %v624_v25, 7  ;;  %1519 = vrot.lane.b32.xlu1 %v4713_v51, %s5063_s10  ;;  %v4714_v41 = vcombine.low %v1344_v18, %v1354_v35  ;;  %v331_v31 = vld [vmem:[#allocation2 + $0x9c] sm:$0x1]  ;;  %v5900_v55 = vld [vmem:[%s5140_s29 + $0x60] sm:$0xf] }
 0x109   : > { %v5892_v30 = vrot.slane %v632_v39, 7  ;;  %v635_v34 = vshll.u32 %v425_v7, 16  ;;  %v2354_v43 = vshrl.u32 %v2095_v19, 16  ;;  %v2357_v48 = vshll.u32 %v2095_v19, 16  ;;  %v427_v62 = vld [vmem:[%s5140_s29 + $0x64] sm:$0xf] }
 0x10a   : > { %1843 = vrot.lane.b32.xlu0 %v4745_v53, %s5061_s8  ;;  %v629_v29 = vor.u32 %v627_v37, %v626_v27  ;;  %v630_v47 = vrot.slane %v626_v27, 4  ;;  %v2363_v49 = vshll.u32 %v2096_v26, 16  ;;  %v4746_v46 = vcombine.low %v5884_v16, %v1746_v38  ;;  %v2642_v60 = vld [vmem:[#allocation2 + $0x8c] sm:$0x1]  ;;  %v387_v9 = vld [vmem:[#allocation2 + $0xa4] sm:$0x1] }
 0x10b   : > { %v2556_v52 = vpop.permute.xlu1 %2555  ;;  %v637_v51 = vor.u32 %v635_v34, %v5892_v30  ;;  %v2356_v8 = vrot.slane %v2354_v43, 4  ;;  %v2367_v54 = vshrl.u32 %v2096_v26, 16  ;;  %v2359_v4 = vrot.slane %v2357_v48, 5  ;;  %v334_v21 = vld [vmem:[#allocation2 + $0xa8] sm:$0x1]  ;;  %v5041_v38 = vld [vmem:[#allocation2 + $0x78] sm:$0xff]  }
 0x10c   : > { %2599 = vst.msk [vmem:[#allocation3 + $0x28] sm:$0xff] %vm2593_vm5, %v2556_v52  ;;  %v2365_v45 = vrot.slane %v2363_v49, 5  ;;  %v2373_v22 = vshll.u32 %v2097_v32, 16  ;;  %v385_v57 = vsel %vm5147_vm6, 0, %v384_v3  ;;  %1521 = vrot.lane.b32.xlu1 %v4714_v41, %s5063_s10  ;;  %v836_v58 = vld [vmem:[#allocation2 + $0x90] sm:$0xf] }
 0x10d   : > { %v3598_v44 = vpop.permute.xlu0 %3597  ;;  %v638_v14 = vsel %vm5153_vm7, %v630_v47, %v637_v51  ;;  %v2369_v63 = vrot.slane %v2367_v54, 4  ;;  %386 = vst [vmem:[#allocation2 + $0x98] sm:$0x1] %v385_v57  ;;  %v4793_v59 = vrot.slane %v5888_v13, 9  ;;  %v2778_v2 = vrot.slane %v2641_v50, 5  ;;  %v5042_v27 = vld [vmem:[#allocation2 + $0x84] sm:$0xff]  }
 0x10e   : > { %3642 = vst.msk [vmem:[#allocation3 + $0x20] sm:$0xff] %vm3637_vm11, %v3598_v44  ;;  %2020 = vrot.lane.b32.xlu0 %v5023_v40, %s5060_s30  ;;  %v837_v5 = vsel %vm5161_vm9, %v629_v29, %v836_v58  ;;  %v2360_v7 = vor.u32 %v2359_v4, %v2356_v8  ;;  %v2375_v56 = vrot.slane %v2373_v22, 5  ;;  %v2781_v19 = vrot.slane %v2642_v60, 5  ;;  %v5920_v28 = vld [vmem:[%s5140_s29 + $0x68] sm:$0xf] }
 0x10f   : > { %v2877_v6 = vpop.permute.xlu1 %2876  ;;  %839 = vst.msk [vmem:[#allocation2 + $0x94] sm:$0xf] %vm280_vm0, %v638_v14  ;;  %838 = vst [vmem:[#allocation2 + $0x90] sm:$0xf] %v837_v5  ;;  %v2370_v12 = vor.u32 %v2369_v63, %v2365_v45  ;;  %v2780_v15 = vrot.slane %v2778_v2, 4  ;;  %v332_v20 = vsel %vm5120_vm3, 0, %v331_v31  ;;  %v2779_v33 = vsel %vm5199_vm13, %v4793_v59, %v2778_v2 }
 0x110   : > { %2920 = vst.msk [vmem:[#allocation3 + $0x28] sm:$0xff] %vm2914_vm8, %v2877_v6  ;;  %v639_v24 = vrot.slane %v5892_v30, 4  ;;  %v2361_v61 = vrot.slane %v2360_v7, 4  ;;  %333 = vst [vmem:[#allocation2 + $0x9c] sm:$0x1] %v332_v20  ;;  %v641_v26 = vshrl.u32 %v5900_v55, 16  ;;  %1845 = vrot.lane.b32.xlu1 %v4746_v46, %s5061_s8 }
 0x111   : > { %v3919_v10 = vpop.permute.xlu0 %3918  ;;  %v649_v18 = vshrl.u32 %v427_v62, 16  ;;  %v2371_v25 = vrot.slane %v2370_v12, 4  ;;  %v652_v35 = vshll.u32 %v427_v62, 16  ;;  %v388_v36 = vsel %vm5147_vm6, 0, %v387_v9  ;;  %1010 = vst.msk [vmem:[#allocation3 + $0x50] sm:$0xff] %vm6762_vm4, %v5041_v38 }
 0x112   : > { %3963 = vst.msk [vmem:[#allocation3 + $0x20] sm:$0xff] %vm3958_vm12, %v3919_v10  ;;  %v2366_v39 = vsel %vm5234_vm14, %v2361_v61, %v2365_v45  ;;  %v643_v3 = vrot.slane %v641_v26, 7  ;;  %v644_v53 = vshll.u32 %v5900_v55, 16  ;;  %389 = vst [vmem:[#allocation2 + $0xa4] sm:$0x1] %v388_v36  ;;  %v2782_v41 = vsel %vm5199_vm13, %v2780_v15, %v2781_v19 }
 0x113   : > { %v3055_v37 = vpop.permute.xlu1 %3054  ;;  %v5930_v16 = vrot.slane %v649_v18, 7  ;;  %v2376_v13 = vsel %vm5234_vm14, %v2371_v25, %v2375_v56  ;;  %v335_v30 = vsel %vm5120_vm3, 0, %v334_v21  ;;  %v658_v34 = vshrl.u32 %v5920_v28, 16 }
 0x114   : > { %3098 = vst.msk [vmem:[#allocation3 + $0x28] sm:$0xff] %vm6749_vm10, %v3055_v37  ;;  %v4777_v32 = vcombine.low %v2366_v39, %v2376_v13  ;;  %v840_v43 = vld [vmem:[#allocation2 + $0x98] sm:$0x1]  ;;  %v647_v52 = vrot.slane %v643_v3, 4  ;;  %336 = vst [vmem:[#allocation2 + $0xa8] sm:$0x1] %v335_v30  ;;  %v4809_v8 = vcombine.low %v2779_v33, %v2782_v41  ;;  %v646_v54 = vor.u32 %v644_v53, %v643_v3 }
 0x115   : > { %v654_v44 = vor.u32 %v652_v35, %v5930_v16  ;;  %v661_v40 = vshll.u32 %v5920_v28, 16  ;;  %vm6763_vm10 = vmmov %vm6762_vm4  ;;  %v841_v29 = vsel %vm5120_vm3, %v639_v24, %v840_v43  ;;  %v656_v56 = vrot.slane %v5930_v16, 4 }
 0x116   : > { %1011 = vst.msk [vmem:[#allocation3 + $0x58] sm:$0xff] %vm6763_vm10, %v5042_v27  ;;  %v2099_v47 = vld [vmem:[#allocation2 + $0x94] sm:$0xf]  ;;  %2565 = vrot.lane.b32.xlu0 %v4777_v32, %s5066_s13  ;;  %842 = vst [vmem:[#allocation2 + $0x98] sm:$0x1] %v841_v29  ;;  %v5957_v12 = vrot.slane %v658_v34, 7 }
 0x117   : > { %v2644_v48 = vld [vmem:[#allocation2 + $0x94] sm:$0xf]  ;;  %v3600_v49 = vpop.permute.xlu1 %3599  ;;  %v3921_v50 = vpop.permute.xlu0 %3920  ;;  %v2098_v46 = vld [vmem:[#allocation2 + $0x90] sm:$0xf]  ;;  %v2387_v51 = vshll.u32 %v2099_v47, 16  ;;  %v655_v55 = vsel %vm5153_vm7, %v647_v52, %v654_v44  ;;  %v2391_v45 = vshrl.u32 %v2099_v47, 16 }
 0x118   : > { %v5024_v31 = vld [vmem:[#allocation2 + $0x90] sm:$0xff]   ;;  %3643 = vst.msk [vmem:[#allocation3 + $0x28] sm:$0xff] %vm3637_vm11, %v3600_v49  ;;  %v2378_v62 = vshrl.u32 %v2098_v46, 16  ;;  %v2381_v4 = vshll.u32 %v2098_v46, 16  ;;  %v2785_v57 = vrot.slane %v2644_v48, 5  ;;  %vm6764_vm10 = vcmask 130144  }
 0x119   : > { %v2643_v22 = vld [vmem:[#allocation2 + $0x90] sm:$0xe]  ;;  %846 = vst.msk [vmem:[#allocation2 + $0xa0] sm:$0xf] %vm280_vm0, %v655_v55  ;;  %2022 = vrot.lane.b32.xlu1 %v5024_v31, %s5060_s30  ;;  %v5953_v60 = vrot.slane %v2387_v51, 5  ;;  %v2393_v59 = vrot.slane %v2391_v45, 4 }
 0x11a   : > { %3964 = vst.msk [vmem:[#allocation3 + $0x28] sm:$0xff] %vm3958_vm12, %v3921_v50  ;;  %v4794_v14 = vrot.slane %v2643_v22, 9  ;;  %v2380_v58 = vrot.slane %v2378_v62, 4  ;;  %v2383_v63 = vrot.slane %v2381_v4, 5  ;;  %v2787_v2 = vrot.slane %v2785_v57, 4  ;;  %v5027_v6 = vld [vmem:[#allocation2 + $0x90] sm:$0xff]   ;;  %2886 = vrot.lane.b32.xlu0 %v4809_v8, %s5064_s11 }
 0x11b   : > { %v1512_v5 = vpop.permute.xlu1 %1511  ;;  %v3979_v7 = vld [vmem:[#allocation3 + $0x20] sm:$0xff]  ;;  %v3139_v10 = vld [vmem:[#allocation2 + $0x90] sm:$0xf]  ;;  %v2394_v19 = vor.u32 %v2393_v59, %v5953_v60  ;;  %v3140_v21 = vld [vmem:[#allocation2 + $0x94] sm:$0xf]  ;;  %v5985_v22 = vor.u32 %v661_v40, %v5957_v12 }
 0x11c   : > { %v843_v9 = vld [vmem:[#allocation2 + $0x9c] sm:$0xf]  ;;  %1554 = vst.msk [vmem:[#allocation3 + $0x30] sm:$0xff] %vm1547_vm1, %v1512_v5  ;;  %4940 = vmatprep.mubr.msk.bf16.mxu0 %vm4011_vm15, %v3979_v7  ;;  %v2384_v15 = vor.u32 %v2383_v63, %v2380_v58  ;;  %v3398_v24 = vshrl.u32 %v3139_v10, 16  ;;  %v847_v61 = vld [vmem:[#allocation2 + $0xa4] sm:$0x1]  ;;  %v5969_v38 = vsel %vm5199_vm13, %v4794_v14, %v2785_v57 }
 0x11d   : > { %v844_v20 = vsel %vm5161_vm9, %v646_v54, %v843_v9  ;;  %v3401_v26 = vshll.u32 %v3139_v10, 16  ;;  %v3407_v18 = vshll.u32 %v3140_v21, 16  ;;  %v3411_v25 = vshrl.u32 %v3140_v21, 16  ;;  %v1836_v35 = vpop.permute.xlu0 %1835  ;;  %v2100_v36 = vld [vmem:[#allocation2 + $0x98] sm:$0x1] }
 0x11e   : > { %845 = vst [vmem:[#allocation2 + $0x9c] sm:$0xf] %v844_v20  ;;  %v848_v33 = vsel %vm5120_vm3, %v656_v56, %v847_v61  ;;  %v2385_v37 = vrot.slane %v2384_v15, 4  ;;  %v2395_v39 = vrot.slane %v2394_v19, 4  ;;  %v2645_v3 = vld [vmem:[#allocation2 + $0x98] sm:$0x1]  ;;  %3064 = vrot.lane.b32.xlu0 %v5027_v6, %s5062_s9 }
 0x11f   : > { %849 = vst [vmem:[#allocation2 + $0xa4] sm:$0x1] %v848_v33  ;;  %v1514_v53 = vpop.permute.xlu1 %1513  ;;  %1878 = vst.msk [vmem:[#allocation3 + $0x30] sm:$0xff] %vm1871_vm2, %v1836_v35  ;;  %v2397_v16 = vshll.u32 %v2100_v36, 16  ;;  %v2788_v27 = vrot.slane %v2645_v3, 5  ;;  %v3400_v30 = vrot.slane %v3398_v24, 4 }
 0x120   : > { %v3141_v13 = vld [vmem:[#allocation2 + $0x98] sm:$0x1]  ;;  %1555 = vst.msk [vmem:[#allocation3 + $0x38] sm:$0xff] %vm1547_vm1, %v1514_v53  ;;  %v2390_v41 = vsel %vm5234_vm14, %v2385_v37, %v5953_v60  ;;  %v3403_v34 = vrot.slane %v3401_v26, 5  ;;  %v3409_v32 = vrot.slane %v3407_v18, 5  ;;  %v3413_v47 = vrot.slane %v3411_v25, 4 }
 0x121   : > { %v3143_v43 = vld [vmem:[#allocation2 + $0xa0] sm:$0xf]  ;;  %v2399_v44 = vrot.slane %v2397_v16, 5  ;;  %v2789_v29 = vsel %vm5199_vm13, %v2787_v2, %v2788_v27  ;;  %v3417_v48 = vshll.u32 %v3141_v13, 16  ;;  %v3684_v49 = vld [vmem:[#allocation2 + $0x90] sm:$0xe]  ;;  %v2013_v50 = vpop.permute.xlu0 %2012 }
 0x122   : > { %v3980_v52 = vld [vmem:[#allocation3 + $0x28] sm:$0xff]  ;;  %v3404_v31 = vor.u32 %v3403_v34, %v3400_v30  ;;  %v3431_v46 = vshll.u32 %v3143_v43, 16  ;;  %v3435_v51 = vshrl.u32 %v3143_v43, 16  ;;  %2055 = vst.msk [vmem:[#allocation3 + $0x30] sm:$0xff] %vm6764_vm10, %v2013_v50  ;;  %v3414_v55 = vor.u32 %v3413_v47, %v3409_v32  ;;  %v3685_v4 = vld [vmem:[#allocation2 + $0x94] sm:$0xf] }
 0x123   : > { %4941 = vmatmul.mubr.msk.bf16.gmra.mrb[8].mxu0 %vm4011_vm15, %v3980_v52  ;;  %v1838_v8 = vpop.permute.xlu1 %1837  ;;  %v2400_v54 = vsel %vm5234_vm14, %v2395_v39, %v2399_v44  ;;  %v3419_v62 = vrot.slane %v3417_v48, 5  ;;  %v3686_v45 = vld [vmem:[#allocation2 + $0x98] sm:$0x1]  ;;  %v4810_v60 = vcombine.low %v5969_v38, %v2789_v29  ;;  %v4857_v63 = vrot.slane %v3684_v49, 9  ;;  %v1052_v59 = vld [vmem:[#allocation2 + $0x90] sm:$0xf] }
 0x124   : > { %1879 = vst.msk [vmem:[#allocation3 + $0x38] sm:$0xff] %vm1871_vm2, %v1838_v8  ;;  %v4778_v57 = vcombine.low %v2390_v41, %v2400_v54  ;;  %v3405_v14 = vrot.slane %v3404_v31, 4  ;;  %v3415_v2 = vrot.slane %v3414_v55, 4  ;;  %v3433_v56 = vrot.slane %v3431_v46, 5  ;;  %v1053_v15 = vld [vmem:[#allocation2 + $0x94] sm:$0xf] }
 0x125   : > { %v3142_v58 = vld [vmem:[#allocation2 + $0x9c] sm:$0xf]  ;;  %v3437_v40 = vrot.slane %v3435_v51, 4  ;;  %v3822_v10 = vrot.slane %v3685_v4, 5  ;;  %v3825_v24 = vrot.slane %v3686_v45, 5  ;;  %v5043_v26 = vld [vmem:[#allocation2 + $0x90] sm:$0xff]  }
 0x126   : > { %v3144_v6 = vld [vmem:[#allocation2 + $0xa4] sm:$0x1]  ;;  %v3422_v5 = vshrl.u32 %v3142_v58, 16  ;;  %v3425_v7 = vshll.u32 %v3142_v58, 16  ;;  %2567 = vrot.lane.b32.xlu1 %v4778_v57, %s5066_s13  ;;  %v3410_v28 = vsel %vm5234_vm14, %v3405_v14, %v3409_v32  ;;  %v3420_v19 = vsel %vm5234_vm14, %v3415_v2, %v3419_v62  ;;  %v1054_v61 = vld [vmem:[#allocation2 + $0x98] sm:$0x1] }
 0x127   : > { %v3441_v9 = vshll.u32 %v3144_v6, 16  ;;  %v5028_v18 = vld [vmem:[#allocation2 + $0x9c] sm:$0xff]   ;;  %v4841_v25 = vcombine.low %v3410_v28, %v3420_v19  ;;  %v3438_v33 = vor.u32 %v3437_v40, %v3433_v56  ;;  %v3823_v36 = vsel %vm5199_vm13, %v4857_v63, %v3822_v10  ;;  %1012 = vst.msk [vmem:[#allocation3 + $0x60] sm:$0xff] %vm6762_vm4, %v5043_v26  ;;  %v3689_v48 = vld [vmem:[#allocation2 + $0xa4] sm:$0x1] }
 0x128   : > { %v3424_v20 = vrot.slane %v3422_v5, 4  ;;  %v3427_v21 = vrot.slane %v3425_v7, 5  ;;  %v3824_v3 = vrot.slane %v3822_v10, 4  ;;  %v1356_v53 = vshrl.u32 %v1052_v59, 16  ;;  %v3687_v38 = vld [vmem:[#allocation2 + $0x9c] sm:$0xe] }
 0x129   : > { %v3443_v35 = vrot.slane %v3441_v9, 5  ;;  %v2558_v37 = vpop.permute.xlu0 %2557  ;;  %v1359_v16 = vshll.u32 %v1052_v59, 16  ;;  %v5044_v27 = vld [vmem:[#allocation2 + $0x9c] sm:$0xff]   ;;  %3609 = vrot.lane.b32.xlu0 %v4841_v25, %s5067_s14  ;;  %v3439_v13 = vrot.slane %v3438_v33, 4  ;;  %v1365_v41 = vshll.u32 %v1053_v15, 16 }
 0x12a   : > { %v3428_v39 = vor.u32 %v3427_v21, %v3424_v20  ;;  %2600 = vst.msk [vmem:[#allocation3 + $0x30] sm:$0xff] %vm2593_vm5, %v2558_v37  ;;  %2888 = vrot.lane.b32.xlu1 %v4810_v60, %s5064_s11  ;;  %v1369_v30 = vshrl.u32 %v1053_v15, 16  ;;  %v1375_v34 = vshll.u32 %v1054_v61, 16  ;;  %v3688_v32 = vld [vmem:[#allocation2 + $0xa0] sm:$0xf]  ;;  %v2015_v43 = vpop.permute.xlu1 %2014  ;;  %v3826_v44 = vsel %vm5199_vm13, %v3824_v3, %v3825_v24 }
 0x12b   : > { %v1358_v29 = vrot.slane %v1356_v53, 4  ;;  %v1361_v47 = vrot.slane %v1359_v16, 5  ;;  %2056 = vst.msk [vmem:[#allocation3 + $0x38] sm:$0xff] %vm6764_vm10, %v2015_v43  ;;  %v3444_v49 = vsel %vm5234_vm14, %v3439_v13, %v3443_v35  ;;  %v4873_v50 = vcombine.low %v3823_v36, %v3826_v44  ;;  %v1055_v51 = vld [vmem:[#allocation2 + $0x9c] sm:$0xf] }
 0x12c   : > { %v3429_v52 = vrot.slane %v3428_v39, 4  ;;  %1013 = vst.msk [vmem:[#allocation3 + $0x68] sm:$0xff] %vm6762_vm4, %v5044_v27  ;;  %v1367_v31 = vrot.slane %v1365_v41, 5  ;;  %v1371_v46 = vrot.slane %v1369_v30, 4  ;;  %v1056_v8 = vld [vmem:[#allocation2 + $0xa0] sm:$0xf] }
 0x12d   : > { %v2879_v54 = vpop.permute.xlu0 %2878  ;;  %v1362_v62 = vor.u32 %v1361_v47, %v1358_v29  ;;  %v1377_v4 = vrot.slane %v1375_v34, 5  ;;  %v4858_v45 = vrot.slane %v3687_v38, 9  ;;  %v1057_v57 = vld [vmem:[#allocation2 + $0xa4] sm:$0x1]  ;;  %3930 = vrot.lane.b32.xlu0 %v4873_v50, %s5065_s12  ;;  %v3829_v58 = vrot.slane %v3688_v32, 5 }
 0x12e   : > { %v3434_v55 = vsel %vm5234_vm14, %v3429_v52, %v3433_v56  ;;  %2921 = vst.msk [vmem:[#allocation3 + $0x30] sm:$0xff] %vm2914_vm8, %v2879_v54  ;;  %3066 = vrot.lane.b32.xlu1 %v5028_v18, %s5062_s9  ;;  %v1372_v14 = vor.u32 %v1371_v46, %v1367_v31  ;;  %v3832_v63 = vrot.slane %v3689_v48, 5  ;;  %v1600_v59 = vld [vmem:[#allocation2 + $0x90] sm:$0xe]  ;;  %v1380_v6 = vshrl.u32 %v1055_v51, 16 }
 0x12f   : > { %v4842_v60 = vcombine.low %v3434_v55, %v3444_v49  ;;  %v1363_v2 = vrot.slane %v1362_v62, 4  ;;  %v1383_v5 = vshll.u32 %v1055_v51, 16  ;;  %v1389_v7 = vshll.u32 %v1056_v8, 16  ;;  %v1601_v56 = vld [vmem:[#allocation2 + $0x94] sm:$0xf] }
 0x130   : > { %v1373_v28 = vrot.slane %v1372_v14, 4  ;;  %v3830_v40 = vsel %vm5199_vm13, %v4858_v45, %v3829_v58  ;;  %v3831_v9 = vrot.slane %v3829_v58, 4  ;;  %v1393_v10 = vshrl.u32 %v1056_v8, 16  ;;  %v1602_v15 = vld [vmem:[#allocation2 + $0x98] sm:$0x1] }
 0x131   : > { %v3057_v19 = vpop.permute.xlu0 %3056  ;;  %v1368_v20 = vsel %vm5234_vm14, %v1363_v2, %v1367_v31  ;;  %v1382_v21 = vrot.slane %v1380_v6, 4  ;;  %v1385_v24 = vrot.slane %v1383_v5, 5  ;;  %v1391_v61 = vrot.slane %v1389_v7, 5  ;;  %v1603_v26 = vld [vmem:[#allocation2 + $0x9c] sm:$0xe] }
 0x132   : > { %vm6765_vm10 = vcmask 228544   ;;  %3611 = vrot.lane.b32.xlu1 %v4842_v60, %s5067_s14  ;;  %v1378_v18 = vsel %vm5234_vm14, %v1373_v28, %v1377_v4  ;;  %v3833_v25 = vsel %vm5199_vm13, %v3831_v9, %v3832_v63  ;;  %v1395_v33 = vrot.slane %v1393_v10, 4  ;;  %v1604_v36 = vld [vmem:[#allocation2 + $0xa0] sm:$0xf]  ;;  %v1605_v37 = vld [vmem:[#allocation2 + $0xa4] sm:$0x1] }
 0x133   : > { %3099 = vst.msk [vmem:[#allocation3 + $0x30] sm:$0xff] %vm6765_vm10, %v3057_v19  ;;  %v1399_v35 = vshll.u32 %v1057_v57, 16  ;;  %v4715_v39 = vcombine.low %v1368_v20, %v1378_v18  ;;  %v4874_v3 = vcombine.low %v3830_v40, %v3833_v25  ;;  %v1386_v53 = vor.u32 %v1385_v24, %v1382_v21  ;;  %v429_v38 = vld [vmem:[%s5140_s29 + $0x6c] sm:$0xf]  ;;  %v850_v34 = vld [vmem:[#allocation2 + $0xa8] sm:$0xf]  ;;  %vm6766_vm4 = vmmov %vm6765_vm10 }
 0x134   : > { %v4731_v16 = vrot.slane %v1600_v59, 9  ;;  %v1396_v27 = vor.u32 %v1395_v33, %v1391_v61  ;;  %v1749_v41 = vrot.slane %v1601_v56, 5  ;;  %v1752_v30 = vrot.slane %v1602_v15, 5  ;;  %v2101_v29 = vld [vmem:[#allocation2 + $0x9c] sm:$0xf] }
 0x135   : > { %v1401_v13 = vrot.slane %v1399_v35, 5  ;;  %3932 = vrot.lane.b32.xlu0 %v4874_v3, %s5065_s12  ;;  %v1387_v32 = vrot.slane %v1386_v53, 4  ;;  %v4732_v43 = vrot.slane %v1603_v26, 9  ;;  %v1756_v52 = vrot.slane %v1604_v36, 5  ;;  %v2102_v47 = vld [vmem:[#allocation2 + $0xa0] sm:$0xf] }
 0x136   : > { %v1759_v44 = vrot.slane %v1605_v37, 5  ;;  %1523 = vrot.lane.b32.xlu1 %v4715_v39, %s5063_s10  ;;  %v1397_v48 = vrot.slane %v1396_v27, 4  ;;  %v1750_v49 = vsel %vm5199_vm13, %v4731_v16, %v1749_v41  ;;  %v1751_v50 = vrot.slane %v1749_v41, 4  ;;  %v2103_v57 = vld [vmem:[#allocation2 + $0xa4] sm:$0x1]  ;;  %v5029_v9 = vld [vmem:[#allocation2 + $0x9c] sm:$0xff]  }
 0x137   : > { %v664_v31 = vrot.slane %v5957_v12, 4  ;;  %v1392_v46 = vsel %vm5234_vm14, %v1387_v32, %v1391_v61  ;;  %v1757_v51 = vsel %vm5199_vm13, %v4732_v43, %v1756_v52  ;;  %v1758_v8 = vrot.slane %v1756_v52, 4  ;;  %v390_v60 = vld [vmem:[#allocation2 + $0xb0] sm:$0x1]  ;;  %v2646_v2 = vld [vmem:[#allocation2 + $0x9c] sm:$0xe] }
 0x138   : > { %v666_v54 = vshrl.u32 %v429_v38, 16  ;;  %v2560_v55 = vpop.permute.xlu1 %2559  ;;  %v1402_v62 = vsel %vm5234_vm14, %v1397_v48, %v1401_v13  ;;  %v1753_v4 = vsel %vm5199_vm13, %v1751_v50, %v1752_v30  ;;  %v669_v45 = vshll.u32 %v429_v38, 16  ;;  %v337_v6 = vld [vmem:[#allocation2 + $0xb4] sm:$0x1]  ;;  %v430_v40 = vld [vmem:[%s5140_s29 + $0x70] sm:$0xf] }
 0x139   : > { %v851_v12 = vsel %vm5161_vm9, %v5985_v22, %v850_v34  ;;  %2601 = vst.msk [vmem:[#allocation3 + $0x38] sm:$0xff] %vm2593_vm5, %v2560_v55  ;;  %v4716_v14 = vcombine.low %v1392_v46, %v1402_v62  ;;  %v4747_v58 = vcombine.low %v1750_v49, %v1753_v4  ;;  %v1760_v63 = vsel %vm5199_vm13, %v1758_v8, %v1759_v44  ;;  %v2647_v22 = vld [vmem:[#allocation2 + $0xa0] sm:$0xf]  ;;  %v2648_v21 = vld [vmem:[#allocation2 + $0xa4] sm:$0x1] }
 0x13a   : > { %v6041_v59 = vrot.slane %v666_v54, 7  ;;  %852 = vst [vmem:[#allocation2 + $0xa8] sm:$0xf] %v851_v12  ;;  %v4748_v5 = vcombine.low %v1757_v51, %v1760_v63  ;;  %v2402_v7 = vshrl.u32 %v2101_v29, 16  ;;  %v2405_v56 = vshll.u32 %v2101_v29, 16 }
 0x13b   : > { %v2411_v28 = vshll.u32 %v2102_v47, 16  ;;  %1525 = vrot.lane.b32.xlu1 %v4716_v14, %s5063_s10  ;;  %1847 = vrot.lane.b32.xlu0 %v4747_v58, %s5061_s8  ;;  %v2415_v19 = vshrl.u32 %v2102_v47, 16  ;;  %v2421_v20 = vshll.u32 %v2103_v57, 16  ;;  %v391_v25 = vsel %vm5147_vm6, 0, %v390_v60  ;;  %v431_v33 = vld [vmem:[%s5140_s29 + $0x74] sm:$0xf] }
 0x13c   : > { %v671_v10 = vor.u32 %v669_v45, %v6041_v59  ;;  %v673_v15 = vrot.slane %v6041_v59, 4  ;;  %v2881_v24 = vpop.permute.xlu1 %2880  ;;  %v2404_v61 = vrot.slane %v2402_v7, 4  ;;  %v2407_v26 = vrot.slane %v2405_v56, 5  ;;  %v3602_v35 = vpop.permute.xlu0 %3601  ;;  %392 = vst [vmem:[#allocation2 + $0xb0] sm:$0x1] %v391_v25 }
 0x13d   : > { %v2413_v18 = vrot.slane %v2411_v28, 5  ;;  %2922 = vst.msk [vmem:[#allocation3 + $0x38] sm:$0xff] %vm2914_vm8, %v2881_v24  ;;  %v2417_v37 = vrot.slane %v2415_v19, 4  ;;  %v2423_v39 = vrot.slane %v2421_v20, 5  ;;  %v4795_v3 = vrot.slane %v2646_v2, 9 }
 0x13e   : > { %v672_v36 = vsel %vm5153_vm7, %v664_v31, %v671_v10  ;;  %3644 = vst.msk [vmem:[#allocation3 + $0x30] sm:$0xff] %vm3637_vm11, %v3602_v35  ;;  %v2408_v53 = vor.u32 %v2407_v26, %v2404_v61  ;;  %v2792_v16 = vrot.slane %v2647_v22, 5  ;;  %v2795_v38 = vrot.slane %v2648_v21, 5  ;;  %v393_v10 = vld [vmem:[#allocation2 + $0xbc] sm:$0x1] }
 0x13f   : > { %853 = vst.msk [vmem:[#allocation2 + $0xac] sm:$0xf] %vm280_vm0, %v672_v36  ;;  %v338_v27 = vsel %vm5120_vm3, 0, %v337_v6  ;;  %1849 = vrot.lane.b32.xlu1 %v4748_v5, %s5061_s8  ;;  %2024 = vrot.lane.b32.xlu0 %v5029_v9, %s5060_s30  ;;  %v2418_v13 = vor.u32 %v2417_v37, %v2413_v18  ;;  %v675_v41 = vshrl.u32 %v430_v40, 16  ;;  %v678_v30 = vshll.u32 %v430_v40, 16 }
 0x140   : > { %339 = vst [vmem:[#allocation2 + $0xb4] sm:$0x1] %v338_v27  ;;  %v683_v34 = vshrl.u32 %v431_v33, 16  ;;  %v3059_v32 = vpop.permute.xlu1 %3058  ;;  %v2409_v43 = vrot.slane %v2408_v53, 4  ;;  %v2794_v44 = vrot.slane %v2792_v16, 4  ;;  %v3923_v29 = vpop.permute.xlu0 %3922  ;;  %v2793_v46 = vsel %vm5199_vm13, %v4795_v3, %v2792_v16 }
 0x141   : > { %v2104_v52 = vld [vmem:[#allocation2 + $0xa8] sm:$0xf]  ;;  %3100 = vst.msk [vmem:[#allocation3 + $0x38] sm:$0xff] %vm6766_vm4, %v3059_v32  ;;  %v2419_v47 = vrot.slane %v2418_v13, 4  ;;  %v677_v50 = vrot.slane %v675_v41, 7  ;;  %v686_v58 = vshll.u32 %v431_v33, 16 }
 0x142   : > { %v2426_v48 = vshrl.u32 %v2104_v52, 16  ;;  %v2429_v49 = vshll.u32 %v2104_v52, 16  ;;  %3965 = vst.msk [vmem:[#allocation3 + $0x30] sm:$0xff] %vm3958_vm12, %v3923_v29  ;;  %v2414_v31 = vsel %vm5234_vm14, %v2409_v43, %v2413_v18  ;;  %v6066_v51 = vld [vmem:[#allocation2 + $0xa8] sm:$0xe]  ;;  %v6068_v8 = vrot.slane %v683_v34, 7 }
 0x143   : > { %v2424_v54 = vsel %vm5234_vm14, %v2419_v47, %v2423_v39  ;;  %v2796_v4 = vsel %vm5199_vm13, %v2794_v44, %v2795_v38  ;;  %v854_v57 = vld [vmem:[#allocation2 + $0xb0] sm:$0x1]  ;;  %v680_v60 = vor.u32 %v678_v30, %v677_v50  ;;  %v681_v14 = vrot.slane %v677_v50, 4  ;;  %v3145_v63 = vld [vmem:[#allocation2 + $0xa8] sm:$0xf] }
 0x144   : > { %v2428_v55 = vrot.slane %v2426_v48, 4  ;;  %v2431_v62 = vrot.slane %v2429_v49, 5  ;;  %v3604_v45 = vpop.permute.xlu1 %3603  ;;  %v4779_v12 = vcombine.low %v2414_v31, %v2424_v54  ;;  %v855_v2 = vsel %vm5120_vm3, %v673_v15, %v854_v57  ;;  %v3690_v19 = vld [vmem:[#allocation2 + $0xa8] sm:$0xe] }
 0x145   : > { %3645 = vst.msk [vmem:[#allocation3 + $0x38] sm:$0xff] %vm3637_vm11, %v3604_v45  ;;  %v4796_v7 = vrot.slane %v6066_v51, 9  ;;  %856 = vst [vmem:[#allocation2 + $0xb0] sm:$0x1] %v855_v2  ;;  %v4811_v22 = vcombine.low %v2793_v46, %v2796_v4  ;;  %v688_v9 = vor.u32 %v686_v58, %v6068_v8  ;;  %v3446_v15 = vshrl.u32 %v3145_v63, 16 }
 0x146   : > { %v5030_v59 = vld [vmem:[#allocation2 + $0xa8] sm:$0xff]   ;;  %v2432_v5 = vor.u32 %v2431_v62, %v2428_v55  ;;  %2569 = vrot.lane.b32.xlu0 %v4779_v12, %s5066_s13  ;;  %v690_v3 = vrot.slane %v6068_v8, 4  ;;  %v3449_v16 = vshll.u32 %v3145_v63, 16  ;;  %v394_v43 = vsel %vm5147_vm6, 0, %v393_v10 }
 0x147   : > { %v2105_v6 = vld [vmem:[#allocation2 + $0xac] sm:$0xf]  ;;  %2026 = vrot.lane.b32.xlu1 %v5030_v59, %s5060_s30  ;;  %v857_v21 = vld [vmem:[#allocation2 + $0xb4] sm:$0xf]  ;;  %v6081_v24 = vld [vmem:[#allocation2 + $0xa8] sm:$0xf]  ;;  %v3925_v26 = vpop.permute.xlu0 %3924  ;;  %v689_v33 = vsel %vm5153_vm7, %v681_v14, %v688_v9 }
 0x148   : > { %v2435_v56 = vshll.u32 %v2105_v6, 16  ;;  %v2439_v28 = vshrl.u32 %v2105_v6, 16  ;;  %v2650_v40 = vld [vmem:[#allocation2 + $0xac] sm:$0xf]  ;;  %v1516_v61 = vpop.permute.xlu1 %1515  ;;  %v858_v35 = vsel %vm5161_vm9, %v680_v60, %v857_v21  ;;  %3966 = vst.msk [vmem:[#allocation3 + $0x38] sm:$0xff] %vm3958_vm12, %v3925_v26  ;;  %v2433_v39 = vrot.slane %v2432_v5, 4 }
 0x149   : > { %v2799_v20 = vrot.slane %v2650_v40, 5  ;;  %v3146_v36 = vld [vmem:[#allocation2 + $0xac] sm:$0xf]  ;;  %1556 = vst.msk [vmem:[#allocation3 + $0x40] sm:$0xff] %vm1547_vm1, %v1516_v61  ;;  %859 = vst [vmem:[#allocation2 + $0xb4] sm:$0xf] %v858_v35 }
 0x14a   : > { %v6083_v18 = vrot.slane %v2435_v56, 5  ;;  %v2441_v25 = vrot.slane %v2439_v28, 4  ;;  %v3691_v37 = vld [vmem:[#allocation2 + $0xac] sm:$0xf]  ;;  %860 = vst.msk [vmem:[#allocation2 + $0xb8] sm:$0xf] %vm280_vm0, %v689_v33  ;;  %2890 = vrot.lane.b32.xlu0 %v4811_v22, %s5064_s11 }
 0x14b   : > { %v3448_v53 = vrot.slane %v3446_v15, 4  ;;  %v3981_v38 = vld [vmem:[#allocation3 + $0x30] sm:$0xff]  ;;  %v2801_v13 = vrot.slane %v2799_v20, 4  ;;  %v3455_v30 = vshll.u32 %v3146_v36, 16  ;;  %v3459_v34 = vshrl.u32 %v3146_v36, 16 }
 0x14c   : > { %v2442_v27 = vor.u32 %v2441_v25, %v6083_v18  ;;  %v5033_v41 = vld [vmem:[#allocation2 + $0xa8] sm:$0xff]   ;;  %4944 = vmatprep.mubr.msk.bf16.mxu0 %vm4011_vm15, %v3981_v38  ;;  %v3451_v32 = vrot.slane %v3449_v16, 5  ;;  %v4859_v52 = vrot.slane %v3690_v19, 9  ;;  %v3836_v44 = vrot.slane %v3691_v37, 5  ;;  %395 = vst [vmem:[#allocation2 + $0xbc] sm:$0x1] %v394_v43 }
 0x14d   : > { %v3457_v47 = vrot.slane %v3455_v30, 5  ;;  %v3461_v48 = vrot.slane %v3459_v34, 4  ;;  %v1404_v49 = vshrl.u32 %v6081_v24, 16  ;;  %v2106_v50 = vld [vmem:[#allocation2 + $0xb0] sm:$0x1]  ;;  %v6101_v46 = vsel %vm5199_vm13, %v4796_v7, %v2799_v20  ;;  %v1518_v55 = vpop.permute.xlu1 %1517  ;;  %v1840_v62 = vpop.permute.xlu0 %1839 }
 0x14e   : > { %v2443_v29 = vrot.slane %v2442_v27, 4  ;;  %v2651_v31 = vld [vmem:[#allocation2 + $0xb0] sm:$0x1]  ;;  %v3452_v54 = vor.u32 %v3451_v32, %v3448_v53  ;;  %v2445_v4 = vshll.u32 %v2106_v50, 16  ;;  %3068 = vrot.lane.b32.xlu0 %v5033_v41, %s5062_s9  ;;  %1557 = vst.msk [vmem:[#allocation3 + $0x48] sm:$0xff] %vm1547_vm1, %v1518_v55  ;;  %v2438_v14 = vsel %vm5234_vm14, %v2433_v39, %v6083_v18 }
 0x14f   : > { %v3147_v51 = vld [vmem:[#allocation2 + $0xb0] sm:$0x1]  ;;  %v2802_v45 = vrot.slane %v2651_v31, 5  ;;  %v3462_v12 = vor.u32 %v3461_v48, %v3457_v47  ;;  %1880 = vst.msk [vmem:[#allocation3 + $0x40] sm:$0xff] %vm1871_vm2, %v1840_v62  ;;  %v3838_v63 = vrot.slane %v3836_v44, 4  ;;  %v3837_v5 = vsel %vm5199_vm13, %v4859_v52, %v3836_v44 }
 0x150   : > { %v3465_v57 = vshll.u32 %v3147_v51, 16  ;;  %v3692_v60 = vld [vmem:[#allocation2 + $0xb0] sm:$0x1]  ;;  %v3453_v58 = vrot.slane %v3452_v54, 4  ;;  %v2447_v2 = vrot.slane %v2445_v4, 5  ;;  %v6113_v7 = vrot.slane %v1404_v49, 4 }
 0x151   : > { %v3839_v59 = vrot.slane %v3692_v60, 5  ;;  %v2803_v6 = vsel %vm5199_vm13, %v2801_v13, %v2802_v45  ;;  %v3463_v22 = vrot.slane %v3462_v12, 4  ;;  %v3148_v9 = vld [vmem:[#allocation2 + $0xb4] sm:$0xf]  ;;  %v3149_v10 = vld [vmem:[#allocation2 + $0xb8] sm:$0xf]  ;;  %v1842_v19 = vpop.permute.xlu1 %1841  ;;  %v2017_v20 = vpop.permute.xlu0 %2016 }
 0x152   : > { %v4812_v56 = vcombine.low %v6101_v46, %v2803_v6  ;;  %v3458_v28 = vsel %vm5234_vm14, %v3453_v58, %v3457_v47  ;;  %v3467_v40 = vrot.slane %v3465_v57, 5  ;;  %v2448_v21 = vsel %vm5234_vm14, %v2443_v29, %v2447_v2  ;;  %v1059_v18 = vld [vmem:[#allocation2 + $0xac] sm:$0xf]  ;;  %1881 = vst.msk [vmem:[#allocation3 + $0x48] sm:$0xff] %vm1871_vm2, %v1842_v19  ;;  %v1060_v39 = vld [vmem:[#allocation2 + $0xb0] sm:$0x1] }
 0x153   : > { %v3470_v15 = vshrl.u32 %v3148_v9, 16  ;;  %v3473_v61 = vshll.u32 %v3148_v9, 16  ;;  %v3479_v26 = vshll.u32 %v3149_v10, 16  ;;  %vm6767_vm10 = vcmask 130144   ;;  %v861_v35 = vld [vmem:[#allocation2 + $0xbc] sm:$0x1] }
 0x154   : > { %2057 = vst.msk [vmem:[#allocation3 + $0x40] sm:$0xff] %vm6767_vm10, %v2017_v20  ;;  %v4780_v25 = vcombine.low %v2438_v14, %v2448_v21  ;;  %v3468_v33 = vsel %vm5234_vm14, %v3463_v22, %v3467_v40  ;;  %v3483_v36 = vshrl.u32 %v3149_v10, 16  ;;  %v3840_v37 = vsel %vm5199_vm13, %v3838_v63, %v3839_v59  ;;  %v3982_v53 = vld [vmem:[#allocation3 + $0x38] sm:$0xff]  ;;  %v3694_v41 = vld [vmem:[#allocation2 + $0xb8] sm:$0xf]  ;;  %v5045_v51 = vld [vmem:[#allocation2 + $0xa8] sm:$0xff]  }
 0x155   : > { %v4843_v16 = vcombine.low %v3458_v28, %v3468_v33  ;;  %v862_v38 = vsel %vm5120_vm3, %v690_v3, %v861_v35  ;;  %v3472_v27 = vrot.slane %v3470_v15, 4  ;;  %v3475_v13 = vrot.slane %v3473_v61, 5  ;;  %4945 = vmatmul.mubr.msk.bf16.gmra.mrb[12].mxu0 %vm4011_vm15, %v3982_v53  ;;  %v3693_v52 = vld [vmem:[#allocation2 + $0xb4] sm:$0xe]  ;;  %v6136_v48 = vld [vmem:[#allocation2 + $0xa8] sm:$0xe] }
 0x156   : > { %2571 = vrot.lane.b32.xlu1 %v4780_v25, %s5066_s13  ;;  %863 = vst [vmem:[#allocation2 + $0xbc] sm:$0x1] %v862_v38  ;;  %v6132_v30 = vrot.slane %v3479_v26, 5  ;;  %v3485_v34 = vrot.slane %v3483_v36, 4  ;;  %v4875_v32 = vcombine.low %v3837_v5, %v3840_v37  ;;  %v1407_v43 = vshll.u32 %v6081_v24, 16  ;;  %v5034_v62 = vld [vmem:[#allocation2 + $0xb4] sm:$0xff]  }
 0x157   : > { %3613 = vrot.lane.b32.xlu0 %v4843_v16, %s5067_s14  ;;  %v3476_v8 = vor.u32 %v3475_v13, %v3472_v27  ;;  %v1413_v44 = vshll.u32 %v1059_v18, 16  ;;  %v1417_v3 = vshrl.u32 %v1059_v18, 16  ;;  %v1423_v29 = vshll.u32 %v1060_v39, 16  ;;  %v1061_v47 = vld [vmem:[#allocation2 + $0xb4] sm:$0xf] }
 0x158   : > { %v3486_v49 = vor.u32 %v3485_v34, %v6132_v30  ;;  %v1409_v50 = vrot.slane %v1407_v43, 5  ;;  %v3843_v31 = vrot.slane %v3694_v41, 5  ;;  %v1062_v46 = vld [vmem:[#allocation2 + $0xb8] sm:$0xf]  ;;  %v4860_v24 = vrot.slane %v3693_v52, 9 }
 0x159   : > { %v6139_v54 = vrot.slane %v1413_v44, 5  ;;  %v1419_v55 = vrot.slane %v1417_v3, 4  ;;  %v3477_v4 = vrot.slane %v3476_v8, 4  ;;  %v1425_v57 = vrot.slane %v1423_v29, 5  ;;  %v1608_v20 = vld [vmem:[#allocation2 + $0xb0] sm:$0x1] }
 0x15a   : > { %2892 = vrot.lane.b32.xlu1 %v4812_v56, %s5064_s11  ;;  %v3487_v45 = vrot.slane %v3486_v49, 4  ;;  %v1410_v12 = vor.u32 %v1409_v50, %v6113_v7  ;;  %vm6768_vm4 = vcmask 31744   ;;  %v3845_v14 = vrot.slane %v3843_v31, 4  ;;  %v2019_v59 = vpop.permute.xlu1 %2018  ;;  %v1607_v56 = vld [vmem:[#allocation2 + $0xac] sm:$0xf]  ;;  %v2562_v7 = vpop.permute.xlu0 %2561  ;;  %v5046_v25 = vld [vmem:[#allocation2 + $0xb4] sm:$0xff]  }
 0x15b   : > { %1014 = vst.msk [vmem:[#allocation3 + $0x70] sm:$0xff] %vm6768_vm4, %v5045_v51  ;;  %3934 = vrot.lane.b32.xlu0 %v4875_v32, %s5065_s12  ;;  %v1420_v60 = vor.u32 %v1419_v55, %v6139_v54  ;;  %v1428_v58 = vshrl.u32 %v1061_v47, 16  ;;  %v1431_v63 = vshll.u32 %v1061_v47, 16  ;;  %v1437_v6 = vshll.u32 %v1062_v46, 16  ;;  %v1609_v39 = vld [vmem:[#allocation2 + $0xb4] sm:$0xe] }
 0x15c   : > { %v1411_v2 = vrot.slane %v1410_v12, 4  ;;  %v1441_v5 = vshrl.u32 %v1062_v46, 16  ;;  %v4733_v28 = vrot.slane %v6136_v48, 9  ;;  %2058 = vst.msk [vmem:[#allocation3 + $0x48] sm:$0xff] %vm6767_vm10, %v2019_v59  ;;  %v3844_v10 = vsel %vm5199_vm13, %v4860_v24, %v3843_v31  ;;  %v340_v53 = vld [vmem:[#allocation2 + $0xc0] sm:$0x1] }
 0x15d   : > { %v3150_v22 = vld [vmem:[#allocation2 + $0xbc] sm:$0x1]  ;;  %v1421_v40 = vrot.slane %v1420_v60, 4  ;;  %v1430_v19 = vrot.slane %v1428_v58, 4  ;;  %2602 = vst.msk [vmem:[#allocation3 + $0x40] sm:$0xff] %vm2593_vm5, %v2562_v7  ;;  %v3482_v21 = vsel %vm5234_vm14, %v3477_v4, %v6132_v30  ;;  %v1433_v18 = vrot.slane %v1431_v63, 5 }
 0x15e   : > { %v3695_v9 = vld [vmem:[#allocation2 + $0xbc] sm:$0x1]  ;;  %3070 = vrot.lane.b32.xlu1 %v5034_v62, %s5062_s9  ;;  %v3489_v15 = vshll.u32 %v3150_v22, 16  ;;  %v1416_v33 = vsel %vm5234_vm14, %v1411_v2, %v6139_v54  ;;  %v1439_v35 = vrot.slane %v1437_v6, 5  ;;  %v1443_v36 = vrot.slane %v1441_v5, 4  ;;  %v2883_v34 = vpop.permute.xlu0 %2882  ;;  %1015 = vst.msk [vmem:[#allocation3 + $0x78] sm:$0xff] %vm6768_vm4, %v5046_v25 }
 0x15f   : > { %v3846_v61 = vrot.slane %v3695_v9, 5  ;;  %v1063_v26 = vld [vmem:[#allocation2 + $0xbc] sm:$0x1]  ;;  %v1426_v38 = vsel %vm5234_vm14, %v1421_v40, %v1425_v57  ;;  %v1434_v13 = vor.u32 %v1433_v18, %v1430_v19  ;;  %v1610_v41 = vld [vmem:[#allocation2 + $0xb8] sm:$0xf]  ;;  %v1763_v8 = vrot.slane %v1607_v56, 5 }
 0x160   : > { %v1447_v37 = vshll.u32 %v1063_v26, 16  ;;  %v3491_v16 = vrot.slane %v3489_v15, 5  ;;  %v1611_v30 = vld [vmem:[#allocation2 + $0xbc] sm:$0x1]  ;;  %v1444_v43 = vor.u32 %v1443_v36, %v1439_v35  ;;  %2923 = vst.msk [vmem:[#allocation3 + $0x40] sm:$0xff] %vm2914_vm8, %v2883_v34  ;;  %v1766_v29 = vrot.slane %v1608_v20, 5 }
 0x161   : > { %v3847_v27 = vsel %vm5199_vm13, %v3845_v14, %v3846_v61  ;;  %v1435_v3 = vrot.slane %v1434_v13, 4  ;;  %v4734_v47 = vrot.slane %v1609_v39, 9  ;;  %v432_v48 = vld [vmem:[%s5140_s29 + $0x78] sm:$0xf]  ;;  %v1764_v31 = vsel %vm5199_vm13, %v4733_v28, %v1763_v8  ;;  %v433_v51 = vld [vmem:[%s5140_s29 + $0x7c] sm:$0xf] }
 0x162   : > { %v4876_v32 = vcombine.low %v3844_v10, %v3847_v27  ;;  %v1449_v52 = vrot.slane %v1447_v37, 5  ;;  %v3492_v44 = vsel %vm5234_vm14, %v3487_v45, %v3491_v16  ;;  %v1445_v50 = vrot.slane %v1444_v43, 4  ;;  %v2107_v4 = vld [vmem:[#allocation2 + $0xb4] sm:$0xf]  ;;  %v3061_v45 = vpop.permute.xlu0 %3060  ;;  %v2108_v58 = vld [vmem:[#allocation2 + $0xb8] sm:$0xf] }
 0x163   : > { %v4844_v49 = vcombine.low %v3482_v21, %v3492_v44  ;;  %v1765_v46 = vrot.slane %v1763_v8, 4  ;;  %v4717_v54 = vcombine.low %v1416_v33, %v1426_v38  ;;  %v1770_v55 = vrot.slane %v1610_v41, 5  ;;  %v396_v22 = vld [vmem:[#allocation2 + $0xc8] sm:$0x1]  ;;  %v5035_v9 = vld [vmem:[#allocation2 + $0xb4] sm:$0xff]  }
 0x164   : > { %3936 = vrot.lane.b32.xlu0 %v4876_v32, %s5065_s12  ;;  %v1773_v24 = vrot.slane %v1611_v30, 5  ;;  %v341_v62 = vsel %vm5120_vm3, 0, %v340_v53  ;;  %v1440_v12 = vsel %vm5234_vm14, %v1435_v3, %v1439_v35  ;;  %v692_v60 = vshrl.u32 %v432_v48, 16  ;;  %v2109_v10 = vld [vmem:[#allocation2 + $0xbc] sm:$0x1] }
 0x165   : > { %3615 = vrot.lane.b32.xlu1 %v4844_v49, %s5067_s14  ;;  %v1767_v57 = vsel %vm5199_vm13, %v1765_v46, %v1766_v29  ;;  %342 = vst [vmem:[#allocation2 + $0xc0] sm:$0x1] %v341_v62  ;;  %v695_v14 = vshll.u32 %v432_v48, 16  ;;  %vm6769_vm10 = vcmask 228544   ;;  %v1450_v63 = vsel %vm5234_vm14, %v1445_v50, %v1449_v52  ;;  %v2652_v25 = vld [vmem:[#allocation2 + $0xb4] sm:$0xe] }
 0x166   : > { %3101 = vst.msk [vmem:[#allocation3 + $0x40] sm:$0xff] %vm6769_vm10, %v3061_v45  ;;  %v4749_v59 = vcombine.low %v1764_v31, %v1767_v57  ;;  %v6183_v2 = vsel %vm5199_vm13, %v4734_v47, %v1770_v55  ;;  %v1772_v6 = vrot.slane %v1770_v55, 4  ;;  %v694_v5 = vrot.slane %v692_v60, 7  ;;  %v2653_v33 = vld [vmem:[#allocation2 + $0xb8] sm:$0xf] }
 0x167   : > { %v700_v56 = vshrl.u32 %v433_v51, 16  ;;  %v703_v28 = vshll.u32 %v433_v51, 16  ;;  %v2450_v7 = vshrl.u32 %v2107_v4, 16  ;;  %v2453_v19 = vshll.u32 %v2107_v4, 16  ;;  %v2654_v53 = vld [vmem:[#allocation2 + $0xbc] sm:$0x1] }
 0x168   : > { %1851 = vrot.lane.b32.xlu0 %v4749_v59, %s5061_s8  ;;  %v1774_v40 = vsel %vm5199_vm13, %v1772_v6, %v1773_v24  ;;  %v2459_v20 = vshll.u32 %v2108_v58, 16  ;;  %v2463_v21 = vshrl.u32 %v2108_v58, 16  ;;  %v4718_v15 = vcombine.low %v1440_v12, %v1450_v63  ;;  %v2564_v16 = vpop.permute.xlu1 %2563  ;;  %v343_v30 = vld [vmem:[#allocation2 + $0xcc] sm:$0x1]  ;;  %v399_v34 = vld [vmem:[#allocation2 + $0xd4] sm:$0x1] }
 0x169   : > { %1527 = vrot.lane.b32.xlu1 %v4717_v54, %s5063_s10  ;;  %v697_v61 = vor.u32 %v695_v14, %v694_v5  ;;  %v698_v26 = vrot.slane %v694_v5, 4  ;;  %v702_v18 = vrot.slane %v700_v56, 7  ;;  %v2452_v35 = vrot.slane %v2450_v7, 4  ;;  %2603 = vst.msk [vmem:[#allocation3 + $0x48] sm:$0xff] %vm2593_vm5, %v2564_v16  ;;  %v3155_v29 = vld [vmem:[#allocation2 + $0xd0] sm:$0xf] }
 0x16a   : > { %v2455_v36 = vrot.slane %v2453_v19, 5  ;;  %v2461_v37 = vrot.slane %v2459_v20, 5  ;;  %v2465_v39 = vrot.slane %v2463_v21, 4  ;;  %v4750_v38 = vcombine.low %v6183_v2, %v1774_v40  ;;  %v3606_v32 = vpop.permute.xlu0 %3605  ;;  %v6216_v14 = vld [vmem:[#allocation2 + $0xd0] sm:$0xf] }
 0x16b   : > { %v705_v27 = vor.u32 %v703_v28, %v702_v18  ;;  %v2469_v13 = vshll.u32 %v2109_v10, 16  ;;  %v397_v41 = vsel %vm5147_vm6, 0, %v396_v22  ;;  %v4797_v44 = vrot.slane %v2652_v25, 9  ;;  %3646 = vst.msk [vmem:[#allocation3 + $0x40] sm:$0xff] %vm3637_vm11, %v3606_v32 }
 0x16c   : > { %2028 = vrot.lane.b32.xlu0 %v5035_v9, %s5060_s30  ;;  %v864_v43 = vld [vmem:[#allocation2 + $0xc0] sm:$0xf]  ;;  %v2456_v52 = vor.u32 %v2455_v36, %v2452_v35  ;;  %v2466_v8 = vor.u32 %v2465_v39, %v2461_v37  ;;  %398 = vst [vmem:[#allocation2 + $0xc8] sm:$0x1] %v397_v41  ;;  %v2806_v3 = vrot.slane %v2653_v33, 5  ;;  %v2809_v50 = vrot.slane %v2654_v53, 5  ;;  %v2885_v55 = vpop.permute.xlu1 %2884 }
 0x16d   : > { %1529 = vrot.lane.b32.xlu1 %v4718_v15, %s5063_s10  ;;  %v706_v47 = vsel %vm5153_vm7, %v698_v26, %v705_v27  ;;  %v865_v48 = vsel %vm5161_vm9, %v697_v61, %v864_v43  ;;  %v2471_v49 = vrot.slane %v2469_v13, 5  ;;  %v707_v31 = vrot.slane %v702_v18, 4  ;;  %2924 = vst.msk [vmem:[#allocation3 + $0x48] sm:$0xff] %vm2914_vm8, %v2885_v55 }
 0x16e   : > { %866 = vst [vmem:[#allocation2 + $0xc0] sm:$0xf] %v865_v48  ;;  %867 = vst.msk [vmem:[#allocation2 + $0xc4] sm:$0xf] %vm280_vm0, %v706_v47  ;;  %v2457_v46 = vrot.slane %v2456_v52, 4  ;;  %v2467_v51 = vrot.slane %v2466_v8, 4  ;;  %v2807_v24 = vsel %vm5199_vm13, %v4797_v44, %v2806_v3  ;;  %v3927_v4 = vpop.permute.xlu0 %3926 }
 0x16f   : > { %v2808_v54 = vrot.slane %v2806_v3, 4  ;;  %v344_v17 = vsel %vm5120_vm3, 0, %v343_v30  ;;  %v400_v23 = vsel %vm5147_vm6, 0, %v399_v34  ;;  %v3527_v62 = vshll.u32 %v3155_v29, 16  ;;  %3967 = vst.msk [vmem:[#allocation3 + $0x40] sm:$0xff] %vm3958_vm12, %v3927_v4  ;;  %vm6770_vm0 = vmmov %vm6769_vm10 }
 0x170   : > { %v2462_v45 = vsel %vm5234_vm14, %v2457_v46, %v2461_v37  ;;  %v2472_v12 = vsel %vm5234_vm14, %v2467_v51, %v2471_v49  ;;  %345 = vst [vmem:[#allocation2 + $0xcc] sm:$0x1] %v344_v17  ;;  %401 = vst [vmem:[#allocation2 + $0xd4] sm:$0x1] %v400_v23  ;;  %v3531_v60 = vshrl.u32 %v3155_v29, 16  ;;  %v3063_v58 = vpop.permute.xlu1 %3062  ;;  %v3857_v28 = vrot.slane %v6216_v14, 5 }
 0x171   : > { %v2810_v57 = vsel %vm5199_vm13, %v2808_v54, %v2809_v50  ;;  %1853 = vrot.lane.b32.xlu1 %v4750_v38, %s5061_s8  ;;  %v4781_v11 = vcombine.low %v2462_v45, %v2472_v12  ;;  %3102 = vst.msk [vmem:[#allocation3 + $0x48] sm:$0xff] %vm6770_vm0, %v3063_v58  ;;  %v6222_v6 = vrot.slane %v3527_v62, 5  ;;  %vm6773_vm7 = vmmov %vm6770_vm0  ;;  %vm4335_vm10 = vcmask 64512  }
 0x172   : > { %v4813_v59 = vcombine.low %v2807_v24, %v2810_v57  ;;  %v6224_v5 = vrot.slane %v3531_v60, 4  ;;  %vm6774_vm9 = vmmov %vm6770_vm0 }
 0x173   : > { %2573 = vrot.lane.b32.xlu0 %v4781_v11, %s5066_s13  ;;  %v868_v63 = vld [vmem:[#allocation2 + $0xc8] sm:$0x1]  ;;  %vm6777_vm4 = vmmov %vm6770_vm0 }
 0x174   : > { %v869_v2 = vsel %vm5120_vm3, %v707_v31, %v868_v63  ;;  %v3534_v43 = vor.u32 %v6224_v5, %v6222_v6  ;;  %vm6771_vm3 = vcmask 130144  }
 0x175   : > { %v5036_v56 = vld [vmem:[#allocation2 + $0xc0] sm:$0xff]   ;;  %870 = vst [vmem:[#allocation2 + $0xc8] sm:$0x1] %v869_v2  ;;  %v3929_v61 = vpop.permute.xlu0 %3928  ;;  %vm6772_vm6 = vmmov %vm6771_vm3 }
 0x176   : > { %v2110_v7 = vld [vmem:[#allocation2 + $0xc0] sm:$0xf]  ;;  %v2111_v22 = vld [vmem:[#allocation2 + $0xc4] sm:$0xf]  ;;  %2030 = vrot.lane.b32.xlu1 %v5036_v56, %s5060_s30  ;;  %v3608_v36 = vpop.permute.xlu1 %3607  ;;  %v3983_v53 = vld [vmem:[#allocation3 + $0x40] sm:$0xff]  ;;  %s6320_s30 = scalar_lea.vmem %s6746_s7, %s4904_s27 }
 0x177   : > { %v2655_v40 = vld [vmem:[#allocation2 + $0xc0] sm:$0xe]  ;;  %v2474_v9 = vshrl.u32 %v2110_v7, 16  ;;  %v2477_v10 = vshll.u32 %v2110_v7, 16  ;;  %v2483_v19 = vshll.u32 %v2111_v22, 16  ;;  %v2487_v20 = vshrl.u32 %v2111_v22, 16  ;;  %2894 = vrot.lane.b32.xlu0 %v4813_v59, %s5064_s11  ;;  %4948 = vmatprep.mubr.msk.bf16.mxu0 %vm4011_vm15, %v3983_v53 }
 0x178   : > { %v2656_v0 = vld [vmem:[#allocation2 + $0xc4] sm:$0xf]  ;;  %v4798_v21 = vrot.slane %v2655_v40, 9  ;;  %v3151_v39 = vld [vmem:[#allocation2 + $0xc0] sm:$0xf]  ;;  %3647 = vst.msk [vmem:[#allocation3 + $0x48] sm:$0xff] %vm3637_vm11, %v3608_v36 }
 0x179   : > { %v2813_v15 = vrot.slane %v2656_v0, 5  ;;  %v2476_v26 = vrot.slane %v2474_v9, 4  ;;  %v2479_v18 = vrot.slane %v2477_v10, 5  ;;  %v2485_v25 = vrot.slane %v2483_v19, 5  ;;  %v5039_v35 = vld [vmem:[#allocation2 + $0xc0] sm:$0xff]   ;;  %3968 = vst.msk [vmem:[#allocation3 + $0x48] sm:$0xff] %vm3958_vm12, %v3929_v61 }
 0x17a   : > { %v2489_v33 = vrot.slane %v2487_v20, 4  ;;  %v3152_v27 = vld [vmem:[#allocation2 + $0xc4] sm:$0xf]  ;;  %v3494_v13 = vshrl.u32 %v3151_v39, 16  ;;  %v3497_v41 = vshll.u32 %v3151_v39, 16  ;;  %v1520_v29 = vpop.permute.xlu1 %1519 }
 0x17b   : > { %v2815_v37 = vrot.slane %v2813_v15, 4  ;;  %v2480_v16 = vor.u32 %v2479_v18, %v2476_v26  ;;  %3072 = vrot.lane.b32.xlu0 %v5039_v35, %s5062_s9  ;;  %v3503_v49 = vshll.u32 %v3152_v27, 16  ;;  %v3507_v50 = vshrl.u32 %v3152_v27, 16  ;;  %v3154_v31 = vld [vmem:[#allocation2 + $0xcc] sm:$0xf]  ;;  %1558 = vst.msk [vmem:[#allocation3 + $0x50] sm:$0xff] %vm1547_vm1, %v1520_v29 }
 0x17c   : > { %v2490_v38 = vor.u32 %v2489_v33, %v2485_v25  ;;  %v2112_v30 = vld [vmem:[#allocation2 + $0xc8] sm:$0x1]  ;;  %v3496_v47 = vrot.slane %v3494_v13, 4  ;;  %v3499_v48 = vrot.slane %v3497_v41, 5  ;;  %v1844_v46 = vpop.permute.xlu0 %1843  ;;  %v2814_v55 = vsel %vm5199_vm13, %v4798_v21, %v2813_v15  ;;  %v3156_v17 = vld [vmem:[#allocation2 + $0xd4] sm:$0x1] }
 0x17d   : > { %v2657_v34 = vld [vmem:[#allocation2 + $0xc8] sm:$0x1]  ;;  %v2481_v52 = vrot.slane %v2480_v16, 4  ;;  %v2493_v44 = vshll.u32 %v2112_v30, 16  ;;  %1882 = vst.msk [vmem:[#allocation3 + $0x50] sm:$0xff] %vm1871_vm2, %v1844_v46  ;;  %v3505_v4 = vrot.slane %v3503_v49, 5 }
 0x17e   : > { %v3153_v32 = vld [vmem:[#allocation2 + $0xc8] sm:$0x1]  ;;  %v2491_v8 = vrot.slane %v2490_v38, 4  ;;  %v2816_v3 = vrot.slane %v2657_v34, 5  ;;  %v3500_v62 = vor.u32 %v3499_v48, %v3496_v47  ;;  %v3509_v45 = vrot.slane %v3507_v50, 4  ;;  %v1522_v2 = vpop.permute.xlu1 %1521  ;;  %v5040_v41 = vld [vmem:[#allocation2 + $0xcc] sm:$0xff]  }
 0x17f   : > { %v2486_v51 = vsel %vm5234_vm14, %v2481_v52, %v2485_v25  ;;  %v2495_v54 = vrot.slane %v2493_v44, 5  ;;  %v3513_v24 = vshll.u32 %v3153_v32, 16  ;;  %v3696_v12 = vld [vmem:[#allocation2 + $0xc0] sm:$0xe]  ;;  %v3697_v57 = vld [vmem:[#allocation2 + $0xc4] sm:$0xf] }
 0x180   : > { %v2817_v23 = vsel %vm5199_vm13, %v2815_v37, %v2816_v3  ;;  %v3518_v58 = vshrl.u32 %v3154_v31, 16  ;;  %v3521_v63 = vshll.u32 %v3154_v31, 16  ;;  %v3698_v59 = vld [vmem:[#allocation2 + $0xc8] sm:$0x1]  ;;  %v3501_v56 = vrot.slane %v3500_v62, 4  ;;  %1559 = vst.msk [vmem:[#allocation3 + $0x58] sm:$0xff] %vm1547_vm1, %v1522_v2  ;;  %v2021_v40 = vpop.permute.xlu0 %2020 }
 0x181   : > { %v2496_v60 = vsel %vm5234_vm14, %v2491_v8, %v2495_v54  ;;  %v3515_v11 = vrot.slane %v3513_v24, 5  ;;  %v3510_v7 = vor.u32 %v3509_v45, %v3505_v4  ;;  %v3537_v22 = vshll.u32 %v3156_v17, 16  ;;  %v3984_v9 = vld [vmem:[#allocation3 + $0x48] sm:$0xff]  ;;  %2059 = vst.msk [vmem:[#allocation3 + $0x50] sm:$0xff] %vm6771_vm3, %v2021_v40  ;;  %v3699_v36 = vld [vmem:[#allocation2 + $0xcc] sm:$0xe] }
 0x182   : > { %v4782_v5 = vcombine.low %v2486_v51, %v2496_v60  ;;  %v3520_v10 = vrot.slane %v3518_v58, 4  ;;  %v3523_v19 = vrot.slane %v3521_v63, 5  ;;  %v4861_v20 = vrot.slane %v3696_v12, 9  ;;  %4949 = vmatmul.mubr.msk.bf16.gmra.mrb[16].mxu0 %vm4011_vm15, %v3984_v9  ;;  %v1846_v37 = vpop.permute.xlu1 %1845  ;;  %v3701_v16 = vld [vmem:[#allocation2 + $0xd4] sm:$0x1] }
 0x183   : > { %v3850_v0 = vrot.slane %v3697_v57, 5  ;;  %v4814_v21 = vcombine.low %v2814_v55, %v2817_v23  ;;  %v3506_v15 = vsel %vm5234_vm14, %v3501_v56, %v3505_v4  ;;  %v3511_v61 = vrot.slane %v3510_v7, 4  ;;  %1883 = vst.msk [vmem:[#allocation3 + $0x58] sm:$0xff] %vm1871_vm2, %v1846_v37  ;;  %v6302_v58 = vld [vmem:[%s6741_s2] ss:$0 sm:$0xff] }
 0x184   : > { %2575 = vrot.lane.b32.xlu1 %v4782_v5, %s5066_s13  ;;  %v3853_v26 = vrot.slane %v3698_v59, 5  ;;  %v3524_v18 = vor.u32 %v3523_v19, %v3520_v10  ;;  %v3535_v25 = vrot.slane %v3534_v43, 4  ;;  %v3539_v33 = vrot.slane %v3537_v22, 5  ;;  %v6309_v2 = vld [vmem:[%s6742_s3] ss:$0 sm:$0xff] }
 0x185   : > { %v3852_v35 = vrot.slane %v3850_v0, 4  ;;  %v3516_v39 = vsel %vm5234_vm14, %v3511_v61, %v3515_v11  ;;  %v3851_v53 = vsel %vm5199_vm13, %v4861_v20, %v3850_v0  ;;  %v4862_v30 = vrot.slane %v3699_v36, 9 }
 0x186   : > { %v4845_v38 = vcombine.low %v3506_v15, %v3516_v39  ;;  %v3525_v27 = vrot.slane %v3524_v18, 4  ;;  %v3859_v34 = vrot.slane %v3857_v28, 4  ;;  %v3540_v43 = vsel %vm5234_vm14, %v3535_v25, %v3539_v33 }
 0x187   : > { %v3854_v13 = vsel %vm5199_vm13, %v3852_v35, %v3853_v26  ;;  %v3860_v8 = vrot.slane %v3701_v16, 5  ;;  %v3858_v47 = vsel %vm5199_vm13, %v4862_v30, %v3857_v28 }
 0x188   : > { %2896 = vrot.lane.b32.xlu1 %v4814_v21, %s5064_s11  ;;  %3617 = vrot.lane.b32.xlu0 %v4845_v38, %s5067_s14  ;;  %v3530_v32 = vsel %vm5234_vm14, %v3525_v27, %v6222_v6  ;;  %v4877_v52 = vcombine.low %v3851_v53, %v3854_v13  ;;  %v2566_v44 = vpop.permute.xlu0 %2565  ;;  %vm6776_vm14 = vmmov %vm6771_vm3 }
 0x189   : > { %2604 = vst.msk [vmem:[#allocation3 + $0x50] sm:$0xff] %vm2593_vm5, %v2566_v44  ;;  %v4846_v3 = vcombine.low %v3530_v32, %v3540_v43  ;;  %v3861_v42 = vsel %vm5199_vm13, %v3859_v34, %v3860_v8  ;;  %vm6775_vm13 = vmmov %vm6771_vm3 }
 0x18a   : > { %v4878_v48 = vcombine.low %v3858_v47, %v3861_v42 }
 0x18b   : > { %v2023_v29 = vpop.permute.xlu1 %2022 }
 0x18c   : > { %3074 = vrot.lane.b32.xlu1 %v5040_v41, %s5062_s9  ;;  %3938 = vrot.lane.b32.xlu0 %v4877_v52, %s5065_s12  ;;  %2060 = vst.msk [vmem:[#allocation3 + $0x58] sm:$0xff] %vm6772_vm6, %v2023_v29  ;;  %v2887_v6 = vpop.permute.xlu0 %2886  ;;  %vm6778_vm6 = vmmov %vm6771_vm3 }
 0x18d   : > { %2925 = vst.msk [vmem:[#allocation3 + $0x50] sm:$0xff] %vm2914_vm8, %v2887_v6 }
 0x190   : > { %3619 = vrot.lane.b32.xlu1 %v4846_v3, %s5067_s14  ;;  %v3065_v49 = vpop.permute.xlu0 %3064 }
 0x191   : > { %3103 = vst.msk [vmem:[#allocation3 + $0x50] sm:$0xff] %vm6773_vm7, %v3065_v49  ;;  %vm6779_vm7 = vmmov %vm6770_vm0 }
 0x194   : > { %3940 = vrot.lane.b32.xlu1 %v4878_v48, %s5065_s12 }
 0x198   : > { %v2568_v14 = vpop.permute.xlu1 %2567 }
 0x199   : > { %2605 = vst.msk [vmem:[#allocation3 + $0x58] sm:$0xff] %vm2593_vm5, %v2568_v14 }
 0x19b   : > { %v3610_v50 = vpop.permute.xlu0 %3609 }
 0x19c   : > { %v2889_v28 = vpop.permute.xlu1 %2888  ;;  %3648 = vst.msk [vmem:[#allocation3 + $0x50] sm:$0xff] %vm3637_vm11, %v3610_v50 }
 0x19d   : > { %2926 = vst.msk [vmem:[#allocation3 + $0x58] sm:$0xff] %vm2914_vm8, %v2889_v28 }
 0x19f   : > { %v3931_v31 = vpop.permute.xlu0 %3930 }
 0x1a0   : > { %v3067_v1 = vpop.permute.xlu1 %3066  ;;  %3969 = vst.msk [vmem:[#allocation3 + $0x50] sm:$0xff] %vm3958_vm12, %v3931_v31 }
 0x1a1   : > { %3104 = vst.msk [vmem:[#allocation3 + $0x58] sm:$0xff] %vm6774_vm9, %v3067_v1 }
 0x1a4   : > { %v3612_v46 = vpop.permute.xlu1 %3611 }
 0x1a5   : > { %3649 = vst.msk [vmem:[#allocation3 + $0x58] sm:$0xff] %vm3637_vm11, %v3612_v46 }
 0x1a7   : > { %v3933_v51 = vpop.permute.xlu0 %3932  ;;  %v3985_v55 = vld [vmem:[#allocation3 + $0x50] sm:$0xff] }
 0x1a8   : > { %v1524_v54 = vpop.permute.xlu1 %1523  ;;  %3970 = vst.msk [vmem:[#allocation3 + $0x58] sm:$0xff] %vm3958_vm12, %v3933_v51  ;;  %4952 = vmatprep.mubr.msk.bf16.mxu1 %vm4011_vm15, %v3985_v55 }
 0x1a9   : > { %1560 = vst.msk [vmem:[#allocation3 + $0x60] sm:$0xff] %vm1547_vm1, %v1524_v54 }
 0x1ad   : > { %v1526_v24 = vpop.permute.xlu1 %1525  ;;  %v1848_v17 = vpop.permute.xlu0 %1847 }
 0x1ae   : > { %1561 = vst.msk [vmem:[#allocation3 + $0x68] sm:$0xff] %vm1547_vm1, %v1526_v24 }
 0x1af   : > { %1884 = vst.msk [vmem:[#allocation3 + $0x60] sm:$0xff] %vm1871_vm2, %v1848_v17  ;;  %v3986_v23 = vld [vmem:[#allocation3 + $0x58] sm:$0xff] }
 0x1b0   : > { %4953 = vmatmul.mubr.msk.bf16.vlgmr.msra.gmra.mrb[0].mxu1 %vm4011_vm15, %v3986_v23 }
 0x1b1   : > { %v1850_v62 = vpop.permute.xlu1 %1849  ;;  %v2025_v4 = vpop.permute.xlu0 %2024 }
 0x1b2   : > { %1885 = vst.msk [vmem:[#allocation3 + $0x68] sm:$0xff] %vm1871_vm2, %v1850_v62 }
 0x1b3   : > { %2061 = vst.msk [vmem:[#allocation3 + $0x60] sm:$0xff] %vm6775_vm13, %v2025_v4 }
 0x1b8   : > { %v2570_v45 = vpop.permute.xlu0 %2569 }
 0x1b9   : > { %v2027_v12 = vpop.permute.xlu1 %2026  ;;  %2606 = vst.msk [vmem:[#allocation3 + $0x60] sm:$0xff] %vm2593_vm5, %v2570_v45 }
 0x1ba   : > { %2062 = vst.msk [vmem:[#allocation3 + $0x68] sm:$0xff] %vm6776_vm14, %v2027_v12 }
 0x1bc   : > { %v2891_v57 = vpop.permute.xlu0 %2890 }
 0x1bd   : > { %2927 = vst.msk [vmem:[#allocation3 + $0x60] sm:$0xff] %vm2914_vm8, %v2891_v57 }
 0x1c0   : > { %v3069_v60 = vpop.permute.xlu0 %3068 }
 0x1c1   : > { %3105 = vst.msk [vmem:[#allocation3 + $0x60] sm:$0xff] %vm6777_vm4, %v3069_v60 }
 0x1c7   : > { %v4934_v59 = vpop.f32.mrb[0].mxu0 }
 0x1c8   : > { %v2572_v11 = vpop.permute.xlu1 %2571  ;;  %v4234_v5 = vmul.f32 %v4934_v59, %v6302_v58  ;;  %v4098_v56 = vpop.f32.mrb[1].mxu0 }
 0x1c9   : > { %2607 = vst.msk [vmem:[#allocation3 + $0x68] sm:$0xff] %vm2593_vm5, %v2572_v11  ;;  %v3614_v63 = vpop.permute.xlu0 %3613  ;;  %v4232_v22 = vmul.f32 %v6302_v58, %v4098_v56  ;;  %v4935_v40 = vpop.f32.mrb[2].mxu0 }
 0x1ca   : > { %3650 = vst.msk [vmem:[#allocation3 + $0x60] sm:$0xff] %vm3637_vm11, %v3614_v63  ;;  %v4273_v10 = vadd.f32 %v6309_v2, %v4234_v5  ;;  %v4235_v19 = vmul.f32 %v4935_v40, %v6302_v58  ;;  %v4101_v20 = vpop.f32.mrb[3].mxu0 }
 0x1cb   : > { %v4271_v0 = vadd.f32 %v6309_v2, %v4232_v22  ;;  %v4233_v21 = vmul.f32 %v6302_v58, %v4101_v20 }
 0x1cc   : > { %v2893_v7 = vpop.permute.xlu1 %2892  ;;  %v4305_v15 = vmax.f32 %v4273_v10, 0.0  ;;  %v4274_v61 = vadd.f32 %v6309_v2, %v4235_v19 }
 0x1cd   : > { %2928 = vst.msk [vmem:[#allocation3 + $0x68] sm:$0xff] %vm2914_vm8, %v2893_v7  ;;  %v3935_v9 = vpop.permute.xlu0 %3934  ;;  %v4303_v18 = vmax.f32 %v4271_v0, 0.0  ;;  %v4272_v25 = vadd.f32 %v6309_v2, %v4233_v21 }
 0x1ce   : > { %3971 = vst.msk [vmem:[#allocation3 + $0x60] sm:$0xff] %vm3958_vm12, %v3935_v9  ;;  %v4306_v33 = vmax.f32 %v4274_v61, 0.0 }
 0x1cf   : > { %4338 = vst.msk [vmem:[%s6320_s30 + $0x10] sm:$0xff] %vm4335_vm10, %v4305_v15  ;;  %4336 = vst.msk [vmem:[%s6320_s30] sm:$0xff] %vm4335_vm10, %v4303_v18  ;;  %v4304_v35 = vmax.f32 %v4272_v25, 0.0  ;;  %v4938_v36 = vpop.f32.mrb[4].mxu0 }
 0x1d0   : > { %v3071_v26 = vpop.permute.xlu1 %3070  ;;  %4339 = vst.msk [vmem:[%s6320_s30 + $0x18] sm:$0xff] %vm4335_vm10, %v4306_v33  ;;  %v4238_v37 = vmul.f32 %v4938_v36, %v6302_v58  ;;  %v4114_v39 = vpop.f32.mrb[5].mxu0 }
 0x1d1   : > { %3106 = vst.msk [vmem:[#allocation3 + $0x68] sm:$0xff] %vm6770_vm0, %v3071_v26  ;;  %v4236_v53 = vmul.f32 %v6302_v58, %v4114_v39  ;;  %v4939_v16 = vpop.f32.mrb[6].mxu0 }
 0x1d2   : > { %4337 = vst.msk [vmem:[%s6320_s30 + $0x8] sm:$0xff] %vm4335_vm10, %v4304_v35  ;;  %v4277_v13 = vadd.f32 %v6309_v2, %v4238_v37  ;;  %v4239_v41 = vmul.f32 %v4939_v16, %v6302_v58  ;;  %v4117_v30 = vpop.f32.mrb[7].mxu0 }
 0x1d3   : > { %v4275_v34 = vadd.f32 %v6309_v2, %v4236_v53  ;;  %v4237_v32 = vmul.f32 %v6302_v58, %v4117_v30 }
 0x1d4   : > { %v4309_v52 = vmax.f32 %v4277_v13, 0.0  ;;  %v4278_v8 = vadd.f32 %v6309_v2, %v4239_v41 }
 0x1d5   : > { %v3987_v27 = vld [vmem:[#allocation3 + $0x60] sm:$0xff]  ;;  %v4307_v44 = vmax.f32 %v4275_v34, 0.0  ;;  %v4276_v3 = vadd.f32 %v6309_v2, %v4237_v32 }
 0x1d6   : > { %v3937_v38 = vpop.permute.xlu0 %3936  ;;  %4956 = vmatprep.mubr.msk.bf16.mxu1 %vm4011_vm15, %v3987_v27  ;;  %4342 = vst.msk [vmem:[%s6320_s30 + $0x30] sm:$0xff] %vm4335_vm10, %v4309_v52  ;;  %v4310_v29 = vmax.f32 %v4278_v8, 0.0 }
 0x1d7   : > { %v3616_v43 = vpop.permute.xlu1 %3615  ;;  %4340 = vst.msk [vmem:[%s6320_s30 + $0x20] sm:$0xff] %vm4335_vm10, %v4307_v44  ;;  %v4308_v42 = vmax.f32 %v4276_v3, 0.0 }
 0x1d8   : > { %3651 = vst.msk [vmem:[#allocation3 + $0x68] sm:$0xff] %vm3637_vm11, %v3616_v43 }
 0x1d9   : > { %3972 = vst.msk [vmem:[#allocation3 + $0x68] sm:$0xff] %vm3958_vm12, %v3937_v38 }
 0x1da   : > { %v1852_v47 = vpop.permute.xlu0 %1851  ;;  %4343 = vst.msk [vmem:[%s6320_s30 + $0x38] sm:$0xff] %vm4335_vm10, %v4310_v29  ;;  %4341 = vst.msk [vmem:[%s6320_s30 + $0x28] sm:$0xff] %vm4335_vm10, %v4308_v42 }
 0x1db   : > { %v1528_v6 = vpop.permute.xlu1 %1527 }
 0x1dc   : > { %1562 = vst.msk [vmem:[#allocation3 + $0x70] sm:$0xff] %vm1547_vm1, %v1528_v6 }
 0x1dd   : > { %1886 = vst.msk [vmem:[#allocation3 + $0x70] sm:$0xff] %vm1871_vm2, %v1852_v47 }
 0x1de   : > { %v2029_v48 = vpop.permute.xlu0 %2028 }
 0x1df   : > { %v1530_v49 = vpop.permute.xlu1 %1529  ;;  %2063 = vst.msk [vmem:[#allocation3 + $0x70] sm:$0xff] %vm6771_vm3, %v2029_v48 }
 0x1e0   : > { %1563 = vst.msk [vmem:[#allocation3 + $0x78] sm:$0xff] %vm1547_vm1, %v1530_v49  ;;  %v3988_v14 = vld [vmem:[#allocation3 + $0x68] sm:$0xff]  ;;  %vm6780_vm1 = vmmov %vm6770_vm0 }
 0x1e1   : > { %4957 = vmatmul.mubr.msk.bf16.gmra.mrb[4].mxu1 %vm4011_vm15, %v3988_v14 }
 0x1e3   : > { %v1854_v28 = vpop.permute.xlu1 %1853 }
 0x1e4   : > { %1887 = vst.msk [vmem:[#allocation3 + $0x78] sm:$0xff] %vm1871_vm2, %v1854_v28  ;;  %v4471_v28 = vld [vmem:[%s6743_s4] sm:$0xff]  ;;  %vm5069_vm2 = vmmov 0  }
 0x1e5   : > { %v2574_v50 = vpop.permute.xlu0 %2573 }
 0x1e6   : > { %2608 = vst.msk [vmem:[#allocation3 + $0x70] sm:$0xff] %vm2593_vm5, %v2574_v50  ;;  %v5068_v50 = vmov 0.0  }
 0x1e7   : > { %4964 = vmatprep.subr.mxu1 %v5068_v50 }
 0x1e8   : > { %v2031_v1 = vpop.permute.xlu1 %2030  ;;  %4965 = vmatpush3.msra.mxu1 %v4471_v28 }
 0x1e9   : > { %v2895_v31 = vpop.permute.xlu0 %2894  ;;  %2064 = vst.msk [vmem:[#allocation3 + $0x78] sm:$0xff] %vm6778_vm6, %v2031_v1 }
 0x1ea   : > { %2929 = vst.msk [vmem:[#allocation3 + $0x70] sm:$0xff] %vm2914_vm8, %v2895_v31 }
 0x1ed   : > { %v3073_v46 = vpop.permute.xlu0 %3072 }
 0x1ee   : > { %3107 = vst.msk [vmem:[#allocation3 + $0x70] sm:$0xff] %vm6779_vm7, %v3073_v46 }
 0x1f6   : > { %v4942_v51 = vpop.f32.mrb[8].mxu0  ;;  %v2576_v54 = vpop.permute.xlu1 %2575 }
 0x1f7   : > { %v4242_v55 = vmul.f32 %v4942_v51, %v6302_v58  ;;  %v4130_v24 = vpop.f32.mrb[9].mxu0  ;;  %2609 = vst.msk [vmem:[#allocation3 + $0x78] sm:$0xff] %vm2593_vm5, %v2576_v54 }
 0x1f8   : > { %v4240_v17 = vmul.f32 %v6302_v58, %v4130_v24  ;;  %v4943_v23 = vpop.f32.mrb[10].mxu0 }
 0x1f9   : > { %v4281_v62 = vadd.f32 %v6309_v2, %v4242_v55  ;;  %v4243_v4 = vmul.f32 %v4943_v23, %v6302_v58  ;;  %v4133_v45 = vpop.f32.mrb[11].mxu0 }
 0x1fa   : > { %v4279_v12 = vadd.f32 %v6309_v2, %v4240_v17  ;;  %v4241_v57 = vmul.f32 %v6302_v58, %v4133_v45  ;;  %v2897_v60 = vpop.permute.xlu1 %2896  ;;  %v3618_v59 = vpop.permute.xlu0 %3617 }
 0x1fb   : > { %v4313_v11 = vmax.f32 %v4281_v62, 0.0  ;;  %v4282_v63 = vadd.f32 %v6309_v2, %v4243_v4  ;;  %2930 = vst.msk [vmem:[#allocation3 + $0x78] sm:$0xff] %vm2914_vm8, %v2897_v60 }
 0x1fc   : > { %v4311_v5 = vmax.f32 %v4279_v12, 0.0  ;;  %v4280_v56 = vadd.f32 %v6309_v2, %v4241_v57  ;;  %3652 = vst.msk [vmem:[#allocation3 + $0x70] sm:$0xff] %vm3637_vm11, %v3618_v59  ;;  %v6445_v59 = vld [vmem:[%s6320_s30] sm:$0xff] }
 0x1fd   : > { %4346 = vst.msk [vmem:[%s6320_s30 + $0x50] sm:$0xff] %vm4335_vm10, %v4313_v11  ;;  %v4314_v7 = vmax.f32 %v4282_v63, 0.0  ;;  %v6442_v63 = vld [vmem:[%s6320_s30 + $0x8] sm:$0xff] }
 0x1fe   : > { %4344 = vst.msk [vmem:[%s6320_s30 + $0x40] sm:$0xff] %vm4335_vm10, %v4311_v5  ;;  %v4312_v22 = vmax.f32 %v4280_v56, 0.0  ;;  %v3075_v40 = vpop.permute.xlu1 %3074  ;;  %v3939_v9 = vpop.permute.xlu0 %3938  ;;  %v4401_v5 = vsel %vm4335_vm10, %v6442_v63, 0.0  ;;  %v4400_v56 = vsel %vm4335_vm10, %v6445_v59, 0.0 }
 0x1ff   : > { %4347 = vst.msk [vmem:[%s6320_s30 + $0x58] sm:$0xff] %vm4335_vm10, %v4314_v7  ;;  %v6452_v7 = vld [vmem:[%s6320_s30 + $0x10] sm:$0xff] }
 0x200   : > { %3108 = vst.msk [vmem:[#allocation3 + $0x78] sm:$0xff] %vm6780_vm1, %v3075_v40  ;;  %v4403_v40 = vsel %vm4335_vm10, %v6452_v7, 0.0 }
 0x201   : > { %4345 = vst.msk [vmem:[%s6320_s30 + $0x48] sm:$0xff] %vm4335_vm10, %v4312_v22  ;;  %v4402_v22 = vadd.f32 %v4401_v5, %v4400_v56 }
 0x202   : > { %3973 = vst.msk [vmem:[#allocation3 + $0x70] sm:$0xff] %vm3958_vm12, %v3939_v9  ;;  %v3620_v10 = vpop.permute.xlu1 %3619  ;;  %v6457_v9 = vld [vmem:[%s6320_s30 + $0x18] sm:$0xff] }
 0x203   : > { %3653 = vst.msk [vmem:[#allocation3 + $0x78] sm:$0xff] %vm3637_vm11, %v3620_v10  ;;  %v4404_v10 = vadd.f32 %v4403_v40, %v4402_v22 }
 0x206   : > { %v3941_v19 = vpop.permute.xlu1 %3940 }
 0x207   : > { %3974 = vst.msk [vmem:[#allocation3 + $0x78] sm:$0xff] %vm3958_vm12, %v3941_v19  ;;  %v6460_v19 = vld [vmem:[%s6320_s30 + $0x20] sm:$0xff] }
 0x209   : > { %v3989_v20 = vld [vmem:[#allocation3 + $0x70] sm:$0xff] }
 0x20a   : > { %4960 = vmatprep.mubr.msk.bf16.mxu1 %vm4011_vm15, %v3989_v20  ;;  %v4405_v20 = vsel %vm4335_vm10, %v6457_v9, 0.0 }
 0x20e   : > { %v3990_v0 = vld [vmem:[#allocation3 + $0x78] sm:$0xff] }
 0x20f   : > { %4961 = vmatmul.mubr.msk.bf16.gmra.mrb[8].mxu1 %vm4011_vm15, %v3990_v0  ;;  %v4407_v0 = vsel %vm4335_vm10, %v6460_v19, 0.0 }
 0x210   : > { %4966 = vmatprep.mubr.msk.f32.mxu1 %vm5069_vm2, %v5068_v50 }
 0x228   : > { %v4946_v21 = vpop.f32.mrb[12].mxu0 }
 0x229   : > { %v4246_v15 = vmul.f32 %v4946_v21, %v6302_v58  ;;  %v4146_v61 = vpop.f32.mrb[13].mxu0  ;;  %v4406_v21 = vadd.f32 %v4405_v20, %v4404_v10 }
 0x22a   : > { %v4244_v26 = vmul.f32 %v6302_v58, %v4146_v61  ;;  %v4947_v18 = vpop.f32.mrb[14].mxu0 }
 0x22b   : > { %v4285_v25 = vadd.f32 %v6309_v2, %v4246_v15  ;;  %v4247_v33 = vmul.f32 %v4947_v18, %v6302_v58  ;;  %v4149_v35 = vpop.f32.mrb[15].mxu0  ;;  %v6467_v15 = vld [vmem:[%s6320_s30 + $0x28] sm:$0xff]  ;;  %v4408_v61 = vadd.f32 %v4407_v0, %v4406_v21  ;;  %v6472_v18 = vld [vmem:[%s6320_s30 + $0x30] sm:$0xff] }
 0x22c   : > { %v4283_v36 = vadd.f32 %v6309_v2, %v4244_v26  ;;  %v4245_v37 = vmul.f32 %v6302_v58, %v4149_v35  ;;  %v4409_v26 = vsel %vm4335_vm10, %v6467_v15, 0.0  ;;  %v6477_v35 = vld [vmem:[%s6320_s30 + $0x38] sm:$0xff] }
 0x22d   : > { %v4317_v39 = vmax.f32 %v4285_v25, 0.0  ;;  %v4286_v53 = vadd.f32 %v6309_v2, %v4247_v33  ;;  %v4410_v25 = vadd.f32 %v4409_v26, %v4408_v61  ;;  %v4411_v33 = vsel %vm4335_vm10, %v6472_v18, 0.0 }
 0x22e   : > { %v4315_v16 = vmax.f32 %v4283_v36, 0.0  ;;  %v4284_v38 = vadd.f32 %v6309_v2, %v4245_v37  ;;  %v6480_v37 = vld [vmem:[%s6320_s30 + $0x40] sm:$0xff] }
 0x22f   : > { %4350 = vst.msk [vmem:[%s6320_s30 + $0x70] sm:$0xff] %vm4335_vm10, %v4317_v39  ;;  %v4318_v27 = vmax.f32 %v4286_v53, 0.0  ;;  %v4412_v36 = vadd.f32 %v4411_v33, %v4410_v25  ;;  %v4413_v39 = vsel %vm4335_vm10, %v6477_v35, 0.0  ;;  %v4415_v53 = vsel %vm4335_vm10, %v6480_v37, 0.0 }
 0x230   : > { %4348 = vst.msk [vmem:[%s6320_s30 + $0x60] sm:$0xff] %vm4335_vm10, %v4315_v16  ;;  %v4316_v13 = vmax.f32 %v4284_v38, 0.0  ;;  %v6487_v38 = vld [vmem:[%s6320_s30 + $0x48] sm:$0xff] }
 0x231   : > { %4351 = vst.msk [vmem:[%s6320_s30 + $0x78] sm:$0xff] %vm4335_vm10, %v4318_v27  ;;  %v4414_v16 = vadd.f32 %v4413_v39, %v4412_v36 }
 0x232   : > { %4349 = vst.msk [vmem:[%s6320_s30 + $0x68] sm:$0xff] %vm4335_vm10, %v4316_v13  ;;  %v4417_v13 = vsel %vm4335_vm10, %v6487_v38, 0.0 }
 0x233   : > { %v4416_v27 = vadd.f32 %v4415_v53, %v4414_v16 }
 0x255   : > { %v4950_v41 = vpop.f32.mrb[16].mxu0 }
 0x256   : > { %v4250_v30 = vmul.f32 %v4950_v41, %v6302_v58  ;;  %v4162_v34 = vpop.f32.mrb[17].mxu0  ;;  %v6492_v41 = vld [vmem:[%s6320_s30 + $0x50] sm:$0xff] }
 0x257   : > { %v4248_v32 = vmul.f32 %v6302_v58, %v4162_v34  ;;  %v4951_v43 = vpop.f32.mrb[18].mxu0  ;;  %v4419_v34 = vsel %vm4335_vm10, %v6492_v41, 0.0 }
 0x258   : > { %v4289_v52 = vadd.f32 %v6309_v2, %v4250_v30  ;;  %v4251_v8 = vmul.f32 %v4951_v43, %v6302_v58  ;;  %v4165_v44 = vpop.f32.mrb[19].mxu0  ;;  %v4418_v30 = vadd.f32 %v4417_v13, %v4416_v27  ;;  %v6497_v43 = vld [vmem:[%s6320_s30 + $0x58] sm:$0xff] }
 0x259   : > { %v4287_v3 = vadd.f32 %v6309_v2, %v4248_v32  ;;  %v4249_v29 = vmul.f32 %v6302_v58, %v4165_v44 }
 0x25a   : > { %v4321_v47 = vmax.f32 %v4289_v52, 0.0  ;;  %v4290_v42 = vadd.f32 %v6309_v2, %v4251_v8  ;;  %v4420_v52 = vadd.f32 %v4419_v34, %v4418_v30  ;;  %v6500_v8 = vld [vmem:[%s6320_s30 + $0x60] sm:$0xff] }
 0x25b   : > { %v4319_v6 = vmax.f32 %v4287_v3, 0.0  ;;  %v4288_v48 = vadd.f32 %v6309_v2, %v4249_v29 }
 0x25c   : > { %4354 = vst.msk [vmem:[%s6320_s30 + $0x90] sm:$0xff] %vm4335_vm10, %v4321_v47  ;;  %v4322_v49 = vmax.f32 %v4290_v42, 0.0 }
 0x25d   : > { %4352 = vst.msk [vmem:[%s6320_s30 + $0x80] sm:$0xff] %vm4335_vm10, %v4319_v6  ;;  %v4320_v14 = vmax.f32 %v4288_v48, 0.0 }
 0x25e   : > { %4355 = vst.msk [vmem:[%s6320_s30 + $0x98] sm:$0xff] %vm4335_vm10, %v4322_v49  ;;  %v4421_v49 = vsel %vm4335_vm10, %v6497_v43, 0.0 }
 0x25f   : > { %4353 = vst.msk [vmem:[%s6320_s30 + $0x88] sm:$0xff] %vm4335_vm10, %v4320_v14  ;;  %v4423_v14 = vsel %vm4335_vm10, %v6500_v8, 0.0 }
 0x263   : > { %v6548_v0 = vld [vmem:[%s6320_s30 + $0x90] sm:$0xff] }
 0x264   : > { %v4435_v61 = vsel %vm4335_vm10, %v6548_v0, 0.0 }
 0x265   : > { %v6553_v26 = vld [vmem:[%s6320_s30 + $0x98] sm:$0xff] }
 0x266   : > { %v6543_v40 = vld [vmem:[%s6320_s30 + $0x88] sm:$0xff]  ;;  %v4437_v36 = vsel %vm4335_vm10, %v6553_v26, 0.0 }
 0x267   : > { %v4433_v20 = vsel %vm4335_vm10, %v6543_v40, 0.0 }
 0x283   : > { %v4954_v1 = vpop.f32.mrb[0].mxu1 }
 0x284   : > { %v4254_v31 = vmul.f32 %v4954_v1, %v6302_v58  ;;  %v4178_v46 = vpop.f32.mrb[1].mxu1  ;;  %v4422_v1 = vadd.f32 %v4421_v49, %v4420_v52 }
 0x285   : > { %v4252_v51 = vmul.f32 %v6302_v58, %v4178_v46  ;;  %v4955_v54 = vpop.f32.mrb[2].mxu1 }
 0x286   : > { %v4293_v55 = vadd.f32 %v6309_v2, %v4254_v31  ;;  %v4255_v24 = vmul.f32 %v4955_v54, %v6302_v58  ;;  %v4181_v17 = vpop.f32.mrb[3].mxu1  ;;  %v6513_v31 = vld [vmem:[%s6320_s30 + $0x68] sm:$0xff] }
 0x287   : > { %v4291_v23 = vadd.f32 %v6309_v2, %v4252_v51  ;;  %v4253_v62 = vmul.f32 %v6302_v58, %v4181_v17 }
 0x288   : > { %v4325_v4 = vmax.f32 %v4293_v55, 0.0  ;;  %v4294_v45 = vadd.f32 %v6309_v2, %v4255_v24  ;;  %v4424_v24 = vadd.f32 %v4423_v14, %v4422_v1 }
 0x289   : > { %v4323_v12 = vmax.f32 %v4291_v23, 0.0  ;;  %v4292_v57 = vadd.f32 %v6309_v2, %v4253_v62  ;;  %v4425_v23 = vsel %vm4335_vm10, %v6513_v31, 0.0 }
 0x28a   : > { %4358 = vst.msk [vmem:[%s6320_s30 + $0xb0] sm:$0xff] %vm4335_vm10, %v4325_v4  ;;  %v4326_v60 = vmax.f32 %v4294_v45, 0.0  ;;  %v6528_v4 = vld [vmem:[%s6320_s30 + $0x70] sm:$0xff]  ;;  %v4426_v45 = vadd.f32 %v4425_v23, %v4424_v24 }
 0x28b   : > { %4356 = vst.msk [vmem:[%s6320_s30 + $0xa0] sm:$0xff] %vm4335_vm10, %v4323_v12  ;;  %v4324_v11 = vmax.f32 %v4292_v57, 0.0  ;;  %v4427_v12 = vsel %vm4335_vm10, %v6528_v4, 0.0  ;;  %v6533_v57 = vld [vmem:[%s6320_s30 + $0x78] sm:$0xff] }
 0x28c   : > { %4359 = vst.msk [vmem:[%s6320_s30 + $0xb8] sm:$0xff] %vm4335_vm10, %v4326_v60  ;;  %v4428_v60 = vadd.f32 %v4427_v12, %v4426_v45  ;;  %v4429_v5 = vsel %vm4335_vm10, %v6533_v57, 0.0 }
 0x28d   : > { %4357 = vst.msk [vmem:[%s6320_s30 + $0xa8] sm:$0xff] %vm4335_vm10, %v4324_v11  ;;  %v6536_v11 = vld [vmem:[%s6320_s30 + $0x80] sm:$0xff] }
 0x28e   : > { %v4431_v56 = vsel %vm4335_vm10, %v6536_v11, 0.0  ;;  %v4430_v22 = vadd.f32 %v4429_v5, %v4428_v60 }
 0x290   : > { %v4432_v10 = vadd.f32 %v4431_v56, %v4430_v22 }
 0x291   : > { %v6568_v30 = vld [vmem:[%s6320_s30 + $0xb0] sm:$0xff] }
 0x292   : > { %v4434_v21 = vadd.f32 %v4433_v20, %v4432_v10  ;;  %v6556_v33 = vld [vmem:[%s6320_s30 + $0xa0] sm:$0xff] }
 0x293   : > { %v4439_v39 = vsel %vm4335_vm10, %v6556_v33, 0.0  ;;  %v6573_v52 = vld [vmem:[%s6320_s30 + $0xb8] sm:$0xff] }
 0x294   : > { %v4436_v25 = vadd.f32 %v4435_v61, %v4434_v21  ;;  %v6563_v16 = vld [vmem:[%s6320_s30 + $0xa8] sm:$0xff] }
 0x295   : > { %v4441_v13 = vsel %vm4335_vm10, %v6563_v16, 0.0 }
 0x296   : > { %v4438_v53 = vadd.f32 %v4437_v36, %v4436_v25 }
 0x298   : > { %v4440_v27 = vadd.f32 %v4439_v39, %v4438_v53 }
 0x29a   : > { %v4442_v34 = vadd.f32 %v4441_v13, %v4440_v27 }
 0x2b4   : > { %v4958_v32 = vpop.f32.mrb[4].mxu1 }
 0x2b5   : > { %v4258_v44 = vmul.f32 %v4958_v32, %v6302_v58  ;;  %v4194_v3 = vpop.f32.mrb[5].mxu1  ;;  %v4443_v32 = vsel %vm4335_vm10, %v6568_v30, 0.0 }
 0x2b6   : > { %v4256_v29 = vmul.f32 %v6302_v58, %v4194_v3  ;;  %v4959_v47 = vpop.f32.mrb[6].mxu1  ;;  %v4444_v3 = vadd.f32 %v4443_v32, %v4442_v34 }
 0x2b7   : > { %v4297_v42 = vadd.f32 %v6309_v2, %v4258_v44  ;;  %v4259_v6 = vmul.f32 %v4959_v47, %v6302_v58  ;;  %v4197_v48 = vpop.f32.mrb[7].mxu1  ;;  %v4445_v47 = vsel %vm4335_vm10, %v6573_v52, 0.0 }
 0x2b8   : > { %v4295_v28 = vadd.f32 %v6309_v2, %v4256_v29  ;;  %v4257_v50 = vmul.f32 %v6302_v58, %v4197_v48  ;;  %v4446_v14 = vadd.f32 %v4445_v47, %v4444_v3 }
 0x2b9   : > { %v4329_v46 = vmax.f32 %v4297_v42, 0.0  ;;  %v4298_v51 = vadd.f32 %v6309_v2, %v4259_v6 }
 0x2ba   : > { %v4327_v54 = vmax.f32 %v4295_v28, 0.0  ;;  %v4296_v55 = vadd.f32 %v6309_v2, %v4257_v50 }
 0x2bb   : > { %4362 = vst.msk [vmem:[%s6320_s30 + $0xd0] sm:$0xff] %vm4335_vm10, %v4329_v46  ;;  %v4330_v17 = vmax.f32 %v4298_v51, 0.0 }
 0x2bc   : > { %4360 = vst.msk [vmem:[%s6320_s30 + $0xc0] sm:$0xff] %vm4335_vm10, %v4327_v54  ;;  %v4328_v62 = vmax.f32 %v4296_v55, 0.0 }
 0x2bd   : > { %4363 = vst.msk [vmem:[%s6320_s30 + $0xd8] sm:$0xff] %vm4335_vm10, %v4330_v17 }
 0x2be   : > { %4361 = vst.msk [vmem:[%s6320_s30 + $0xc8] sm:$0xff] %vm4335_vm10, %v4328_v62 }
 0x2c2   : > { %v6598_v5 = vld [vmem:[%s6320_s30 + $0xd0] sm:$0xff] }
 0x2c3   : > { %v6576_v44 = vld [vmem:[%s6320_s30 + $0xc0] sm:$0xff]  ;;  %v4451_v22 = vsel %vm4335_vm10, %v6598_v5, 0.0 }
 0x2c4   : > { %v4447_v42 = vsel %vm4335_vm10, %v6576_v44, 0.0 }
 0x2c5   : > { %v6584_v49 = vld [vmem:[%s6320_s30 + $0xc8] sm:$0xff]  ;;  %v4448_v54 = vadd.f32 %v4447_v42, %v4446_v14 }
 0x2c6   : > { %v4449_v17 = vsel %vm4335_vm10, %v6584_v49, 0.0 }
 0x2c7   : > { %v4450_v56 = vadd.f32 %v4449_v17, %v4448_v54  ;;  %v4547_v54 = vld [vmem:[%s6745_s6] sm:$0x1] }
 0x2c9   : > { %v4452_v10 = vadd.f32 %v4451_v22, %v4450_v56 }
 0x2e2   : > { %v4962_v29 = vpop.f32.mrb[8].mxu1 }
 0x2e3   : > { %v4262_v6 = vmul.f32 %v4962_v29, %v6302_v58  ;;  %v4210_v48 = vpop.f32.mrb[9].mxu1 }
 0x2e4   : > { %v4260_v28 = vmul.f32 %v6302_v58, %v4210_v48  ;;  %v4963_v50 = vpop.f32.mrb[10].mxu1 }
 0x2e5   : > { %v4301_v1 = vadd.f32 %v6309_v2, %v4262_v6  ;;  %v4263_v46 = vmul.f32 %v4963_v50, %v6302_v58  ;;  %v4213_v51 = vpop.f32.mrb[11].mxu1 }
 0x2e6   : > { %v4299_v55 = vadd.f32 %v6309_v2, %v4260_v28  ;;  %v4261_v24 = vmul.f32 %v6302_v58, %v4213_v51 }
 0x2e7   : > { %v4333_v23 = vmax.f32 %v4301_v1, 0.0  ;;  %v4302_v62 = vadd.f32 %v6309_v2, %v4263_v46  ;;  %v4545_v46 = vld [vmem:[%s6744_s5] sm:$0x1] }
 0x2e8   : > { %v4331_v45 = vmax.f32 %v4299_v55, 0.0  ;;  %v4300_v12 = vadd.f32 %v6309_v2, %v4261_v24  ;;  %v6609_v2 = vld [vmem:[%s6320_s30 + $0xd8] sm:$0xff] }
 0x2e9   : > { %4366 = vst.msk [vmem:[%s6320_s30 + $0xf0] sm:$0xff] %vm4335_vm10, %v4333_v23  ;;  %v4334_v60 = vmax.f32 %v4302_v62, 0.0  ;;  %v4453_v20 = vsel %vm4335_vm10, %v6609_v2, 0.0 }
 0x2ea   : > { %4364 = vst.msk [vmem:[%s6320_s30 + $0xe0] sm:$0xff] %vm4335_vm10, %v4331_v45  ;;  %v4332_v58 = vmax.f32 %v4300_v12, 0.0  ;;  %v4454_v61 = vadd.f32 %v4453_v20, %v4452_v10 }
 0x2eb   : > { %4367 = vst.msk [vmem:[%s6320_s30 + $0xf8] sm:$0xff] %vm4335_vm10, %v4334_v60  ;;  %v4555_v60 = vlaneseq }
 0x2ec   : > { %4365 = vst.msk [vmem:[%s6320_s30 + $0xe8] sm:$0xff] %vm4335_vm10, %v4332_v58 }
 0x2ed   : > { %v4556_v56 = vshrl.u32 %v4555_v60, 7 }
 0x2ef   : > { %v4557_v58 = vsub.s32 0, %v4556_v56 }
 0x2f0   : > { %v6622_v39 = vld [vmem:[%s6320_s30 + $0xf0] sm:$0xff] }
 0x2f1   : > { %v6614_v21 = vld [vmem:[%s6320_s30 + $0xe0] sm:$0xff]  ;;  %v4459_v32 = vsel %vm4335_vm10, %v6622_v39, 0.0 }
 0x2f2   : > { %v4455_v25 = vsel %vm4335_vm10, %v6614_v21, 0.0  ;;  %v6627_v13 = vld [vmem:[%s6320_s30 + $0xf8] sm:$0xff] }
 0x2f3   : > { %v6619_v36 = vld [vmem:[%s6320_s30 + $0xe8] sm:$0xff]  ;;  %v4456_v53 = vadd.f32 %v4455_v25, %v4454_v61  ;;  %v4461_v29 = vsel %vm4335_vm10, %v6627_v13, 0.0 }
 0x2f4   : > { %v4457_v27 = vsel %vm4335_vm10, %v6619_v36, 0.0 }
 0x2f5   : > { %v4458_v34 = vadd.f32 %v4457_v27, %v4456_v53 }
 0x2f7   : > { %v4460_v3 = vadd.f32 %v4459_v32, %v4458_v34 }
 0x2f9   : > { %v4462_v47 = vadd.f32 %v4461_v29, %v4460_v3 }
 0x2fb   : > { %v4463_v42 = vrot.slane %v4462_v47, 4 }
 0x2fd   : > { %v4464_v6 = vadd.f32 %v4463_v42, %v4462_v47 }
 0x2ff   : > { %v4465_v48 = vrot.slane %v4464_v6, 2 }
 0x301   : > { %v4466_v14 = vadd.f32 %v4465_v48, %v4464_v6 }
 0x303   : > { %v4467_v28 = vrot.slane %v4466_v14, 1 }
 0x305   : > { %v4468_v50 = vadd.f32 %v4467_v28, %v4466_v14 }
 0x307   : > { %v4470_v1 = vmul.f32 0.00390625, %v4468_v50 }
 0x309   : > { %4967 = vmatmul.mubr.msk.f32.vlgmr.msra.gmra.mrb[12].mxu1 %vm4335_vm10, %v4470_v1 }
 0x3dc   : > { %v4541_v51 = vpop.f32.mrb[12].mxu1 }
 0x3dd   : > { %v4546_v55 = vmul.f32 %v4545_v46, %v4541_v51  ;;  %v4968_v24 = vpop.f32.mrb[13].mxu1 }
 0x3df   : > { %v4548_v17 = vadd.f32 %v4547_v54, %v4546_v55 }
 0x3e1   : > { %v4549_v23 = vsub.f32 0.0, %v4548_v17 }
 0x3e3   : > { %v4550_v62 = vmul.f32 1.442695, %v4549_v23 }
 0x3e5   : > { %5047 = vpow2.f32 %v4550_v62 }
 0x3ef   : > { %v5048_v45 = vpop.eup %5047 }
 0x3f0   : > { %v4552_v12 = vadd.f32 1.0, %v5048_v45 }
 0x3f2   : > { %5049 = vrcp.f32 %v4552_v12 }
 0x3fc   : > { %v5050_v22 = vpop.eup %5049 }
 0x3fd   : > { %v4558_v10 = vrot.slane %v5050_v22, %v4557_v58 }
 0x3ff   : > { %v4559_v20 = vmul.f32 %v4558_v10, %v6445_v59  ;;  %v4560_v61 = vmul.f32 %v4558_v10, %v6442_v63  ;;  %v4561_v25 = vmul.f32 %v4558_v10, %v6452_v7  ;;  %v4562_v53 = vmul.f32 %v4558_v10, %v6457_v9 }
 0x400   : > { %v4563_v27 = vmul.f32 %v4558_v10, %v6460_v19  ;;  %v4564_v34 = vmul.f32 %v4558_v10, %v6467_v15  ;;  %v4565_v32 = vmul.f32 %v4558_v10, %v6472_v18  ;;  %v4566_v3 = vmul.f32 %v4558_v10, %v6477_v35 }
 0x401   : > { %v4567_v59 = vmul.f32 %v4558_v10, %v6480_v37  ;;  %v4568_v63 = vmul.f32 %v4558_v10, %v6487_v38  ;;  %v4569_v7 = vmul.f32 %v4558_v10, %v6492_v41  ;;  %v4570_v9 = vmul.f32 %v4558_v10, %v6497_v43  ;;  %4591 = vst.msk [vmem:[%s6320_s30] sm:$0xff] %vm4335_vm10, %v4559_v20 }
 0x402   : > { %4592 = vst.msk [vmem:[%s6320_s30 + $0x8] sm:$0xff] %vm4335_vm10, %v4560_v61  ;;  %4593 = vst.msk [vmem:[%s6320_s30 + $0x10] sm:$0xff] %vm4335_vm10, %v4561_v25  ;;  %v4571_v19 = vmul.f32 %v4558_v10, %v6500_v8  ;;  %v4572_v15 = vmul.f32 %v4558_v10, %v6513_v31  ;;  %v4573_v18 = vmul.f32 %v4558_v10, %v6528_v4 }
 0x403   : > { %4594 = vst.msk [vmem:[%s6320_s30 + $0x18] sm:$0xff] %vm4335_vm10, %v4562_v53  ;;  %v4574_v35 = vmul.f32 %v4558_v10, %v6533_v57  ;;  %4595 = vst.msk [vmem:[%s6320_s30 + $0x20] sm:$0xff] %vm4335_vm10, %v4563_v27  ;;  %v4575_v37 = vmul.f32 %v4558_v10, %v6536_v11  ;;  %v4576_v38 = vmul.f32 %v4558_v10, %v6543_v40 }
 0x404   : > { %4596 = vst.msk [vmem:[%s6320_s30 + $0x28] sm:$0xff] %vm4335_vm10, %v4564_v34  ;;  %4597 = vst.msk [vmem:[%s6320_s30 + $0x30] sm:$0xff] %vm4335_vm10, %v4565_v32  ;;  %v4577_v41 = vmul.f32 %v4558_v10, %v6548_v0  ;;  %v4578_v43 = vmul.f32 %v4558_v10, %v6553_v26  ;;  %v4579_v8 = vmul.f32 %v4558_v10, %v6556_v33 }
 0x405   : > { %4598 = vst.msk [vmem:[%s6320_s30 + $0x38] sm:$0xff] %vm4335_vm10, %v4566_v3  ;;  %4599 = vst.msk [vmem:[%s6320_s30 + $0x40] sm:$0xff] %vm4335_vm10, %v4567_v59  ;;  %v4580_v31 = vmul.f32 %v4558_v10, %v6563_v16  ;;  %v4581_v4 = vmul.f32 %v4558_v10, %v6568_v30  ;;  %v4582_v57 = vmul.f32 %v4558_v10, %v6573_v52 }
 0x406   : > { %4600 = vst.msk [vmem:[%s6320_s30 + $0x48] sm:$0xff] %vm4335_vm10, %v4568_v63  ;;  %4601 = vst.msk [vmem:[%s6320_s30 + $0x50] sm:$0xff] %vm4335_vm10, %v4569_v7  ;;  %v4583_v11 = vmul.f32 %v4558_v10, %v6576_v44  ;;  %v4584_v40 = vmul.f32 %v4558_v10, %v6584_v49  ;;  %v4585_v0 = vmul.f32 %v4558_v10, %v6598_v5 }
 0x407   : > { %4602 = vst.msk [vmem:[%s6320_s30 + $0x58] sm:$0xff] %vm4335_vm10, %v4570_v9  ;;  %4603 = vst.msk [vmem:[%s6320_s30 + $0x60] sm:$0xff] %vm4335_vm10, %v4571_v19  ;;  %v4586_v26 = vmul.f32 %v4558_v10, %v6609_v2  ;;  %v4587_v33 = vmul.f32 %v4558_v10, %v6614_v21  ;;  %v4588_v16 = vmul.f32 %v4558_v10, %v6619_v36 }
 0x408   : > { %4604 = vst.msk [vmem:[%s6320_s30 + $0x68] sm:$0xff] %vm4335_vm10, %v4572_v15  ;;  %4605 = vst.msk [vmem:[%s6320_s30 + $0x70] sm:$0xff] %vm4335_vm10, %v4573_v18  ;;  %v4589_v30 = vmul.f32 %v4558_v10, %v6622_v39  ;;  %v4590_v52 = vmul.f32 %v4558_v10, %v6627_v13 }
 0x409   : > { %4606 = vst.msk [vmem:[%s6320_s30 + $0x78] sm:$0xff] %vm4335_vm10, %v4574_v35  ;;  %4607 = vst.msk [vmem:[%s6320_s30 + $0x80] sm:$0xff] %vm4335_vm10, %v4575_v37 }
 0x40a   : > { %4608 = vst.msk [vmem:[%s6320_s30 + $0x88] sm:$0xff] %vm4335_vm10, %v4576_v38  ;;  %4609 = vst.msk [vmem:[%s6320_s30 + $0x90] sm:$0xff] %vm4335_vm10, %v4577_v41 }
 0x40b   : > { %4610 = vst.msk [vmem:[%s6320_s30 + $0x98] sm:$0xff] %vm4335_vm10, %v4578_v43  ;;  %4611 = vst.msk [vmem:[%s6320_s30 + $0xa0] sm:$0xff] %vm4335_vm10, %v4579_v8 }
 0x40c   : > { %4612 = vst.msk [vmem:[%s6320_s30 + $0xa8] sm:$0xff] %vm4335_vm10, %v4580_v31  ;;  %4613 = vst.msk [vmem:[%s6320_s30 + $0xb0] sm:$0xff] %vm4335_vm10, %v4581_v4 }
 0x40d   : > { %4614 = vst.msk [vmem:[%s6320_s30 + $0xb8] sm:$0xff] %vm4335_vm10, %v4582_v57  ;;  %4615 = vst.msk [vmem:[%s6320_s30 + $0xc0] sm:$0xff] %vm4335_vm10, %v4583_v11 }
 0x40e   : > { %4616 = vst.msk [vmem:[%s6320_s30 + $0xc8] sm:$0xff] %vm4335_vm10, %v4584_v40  ;;  %4617 = vst.msk [vmem:[%s6320_s30 + $0xd0] sm:$0xff] %vm4335_vm10, %v4585_v0 }
 0x40f   : > { %4618 = vst.msk [vmem:[%s6320_s30 + $0xd8] sm:$0xff] %vm4335_vm10, %v4586_v26  ;;  %4619 = vst.msk [vmem:[%s6320_s30 + $0xe0] sm:$0xff] %vm4335_vm10, %v4587_v33 }
 0x410   : > { %4620 = vst.msk [vmem:[%s6320_s30 + $0xe8] sm:$0xff] %vm4335_vm10, %v4588_v16  ;;  %4621 = vst.msk [vmem:[%s6320_s30 + $0xf0] sm:$0xff] %vm4335_vm10, %v4589_v30 }
 0x411   : > { %4622 = vst.msk [vmem:[%s6320_s30 + $0xf8] sm:$0xff] %vm4335_vm10, %v4590_v52 }
 0x412 PF: > { %s17_s24 = sadd.s32 1, %s5057_s24  }
 0x413   : > { %p14_p4 = scmp.ge.s32.totalorder %s17_s24, 4  }
 0x415   :  { %16 = sbr.rel (!%p14_p4) target bundleno = 1 (0x1), region = 81 }

</bundles_post_ra>
